<compile_context>
chip_gen: v7x
topology: tpu7x:2x2x1
jax: 0.10.0
libtpu: 0.0.40
codegen_flags: <defaults>
</compile_context>

<pallas_src>
import functools

import jax
import jax.numpy as jnp
from jax.experimental import pallas as pl
from jax.experimental.pallas import tpu as pltpu

# ---------------- small synthetic config (real module: 224x224, dec_dim=512, vocab=49408) ----
B = 2
IMG_C, IMG_HW, PATCH = 3, 32, 16
NUM_PATCHES = (IMG_HW // PATCH) ** 2          # 4
PATCH_DIM = IMG_C * PATCH * PATCH             # 768
ENC_DIM, ENC_HEADS, ENC_LAYERS, ENC_FFN = 64, 2, 2, 128
ENC_PROMPT_LEN = 4
ENC_SKIP_LAYERS = (0,)                        # encoder layers that receive a prompt
DEC_DIM, DEC_HEADS, DEC_LAYERS, DEC_FFN = 32, 2, 2, 64
N_IMG_TOKENS = 2                              # projector output -> (B, N_IMG_TOKENS, DEC_DIM)
VOCAB = 256                                   # stands in for 49408
TEXT_LEN = 8
MAX_POS = 16
NEG_INF = -1e9
SEQ_PAD = 8                                   # pad sequence dims to multiples of 8
VOCAB_TILE = 512                              # N-tile for the decoder head (review: 512-2048)
BLOCK_VMEM_LIMIT = 32 * 1024 * 1024           # fused-block scoped VMEM (raise at real dims)
HEAD_VMEM_LIMIT = 16 * 1024 * 1024            # right-sized for the vocab-tiled head


def _round_up(v, m):
    return -(-v // m) * m


# ----------------------------- in-kernel helpers ---------------------------------------------
def _bf16(x):
    return x.astype(jnp.bfloat16)


def _ln_rows(x, g, b, eps=1e-5):
    """Row-wise LayerNorm in f32.  x: (S, D); g/b: (1, D)."""
    mu = jnp.mean(x, axis=-1, keepdims=True)
    var = jnp.mean((x - mu) ** 2, axis=-1, keepdims=True)
    return (x - mu) * jax.lax.rsqrt(var + eps) * g + b


def _mha_into(q, k, v, bias, n_heads, out_ref):
    """q: (Sq, D), k/v: (Skv, D) f32, bias: (Sq, Skv) additive.  Heads are static
    lane slices of the packed D axis.  Each head's (Sq, Dh) result is written
    immediately into its lane slice of `out_ref` (VMEM scratch) — no lane-axis
    concatenate and shorter live ranges."""
    _, D = q.shape
    Dh = D // n_heads
    scale = 1.0 / float(Dh) ** 0.5
    for h in range(n_heads):
        sl = slice(h * Dh, (h + 1) * Dh)
        s = jnp.dot(_bf16(q[:, sl]), _bf16(k[:, sl]).T,
                    preferred_element_type=jnp.float32) * scale + bias
        s = s - jnp.max(s, axis=-1, keepdims=True)
        p = jnp.exp(s)
        p = p * pl.reciprocal(jnp.sum(p, axis=-1, keepdims=True), approx=True)
        out_ref[:, sl] = jnp.dot(_bf16(p), _bf16(v[:, sl]),
                                 preferred_element_type=jnp.float32)


# ----------------------------- fused layer-stack kernels --------------------------------------
def _enc_stack_kernel(meta_ref, x0_ref, prompt_ref, ln_ref, wqkv_ref, bqkv_ref,
                      wo_ref, bo_ref, wf1_ref, bf1_ref, wf2_ref, bf2_ref,
                      cls_ref, acc_sc, attn_sc, *, n_heads):
    """All encoder layers for one batch item.  grid=(B, L); the residual lives in
    acc_sc across the (arbitrary) L axis; per-layer weights stream through the
    default double-buffer (cross-layer prefetch).  meta_ref (SMEM, Lx4 int32):
    [valid_len_after_injection, inject_flag, inject_offset, prompt_len]."""
    l = pl.program_id(1)
    nl = pl.num_programs(1)
    S, D = acc_sc.shape

    @pl.when(l == 0)
    def _():
        acc_sc[...] = x0_ref[0]

    # prompt injection: overwrite rows [off, off+plen) with the prompt embeddings
    # exactly at the layer where the reference appends them (mask built from iota).
    @pl.when(meta_ref[l, 1] == 1)
    def _():
        off = meta_ref[l, 2]
        plen = meta_ref[l, 3]
        row = jax.lax.broadcasted_iota(jnp.int32, (S, 1), 0)
        sel = (row >= off) & (row < off + plen)
        acc_sc[...] = jnp.where(sel, prompt_ref[0], acc_sc[...])

    valid = meta_ref[l, 0]
    x = acc_sc[...]                                   # (S, D) f32
    ln = ln_ref[0]                                    # (4, D): ln1_g, ln1_b, ln2_g, ln2_b
    hn = _ln_rows(x, ln[0:1], ln[1:2])
    qkv = jnp.dot(_bf16(hn), wqkv_ref[0],
                  preferred_element_type=jnp.float32) + bqkv_ref[0]
    q, k, v = qkv[:, 0:D], qkv[:, D:2 * D], qkv[:, 2 * D:3 * D]
    col = jax.lax.broadcasted_iota(jnp.int32, (S, S), 1)
    bias = jnp.where(col < valid, 0.0, NEG_INF).astype(jnp.float32)
    _mha_into(q, k, v, bias, n_heads, attn_sc)
    attn = jnp.dot(_bf16(attn_sc[...]), wo_ref[0],
                   preferred_element_type=jnp.float32) + bo_ref[0]
    x = x + attn
    hn2 = _ln_rows(x, ln[2:3], ln[3:4])
    f = jnp.dot(_bf16(hn2), wf1_ref[0],
                preferred_element_type=jnp.float32) + bf1_ref[0]
    f = jax.nn.gelu(f, approximate=True)  # TODO(synk): PyTorch nn.GELU default is exact erf
    f = jnp.dot(_bf16(f), wf2_ref[0],
                preferred_element_type=jnp.float32) + bf2_ref[0]
    acc_sc[...] = x + f

    @pl.when(l == nl - 1)
    def _():
        cls_ref[0] = acc_sc[0:1, :]                   # CLS feature only


def _dec_stack_kernel(meta_ref, h0_ref, prefix_ref, tbias_ref, ln_ref, wqkv_ref,
                      bqkv_ref, wo_ref, bo_ref, wf1_ref, bf1_ref, wf2_ref, bf2_ref,
                      lnf_ref, hn_ref, acc_sc, attn_sc, *, n_heads):
    """All prefix-conditioned decoder layers for one batch item.  grid=(B, L).
    Residual resident in acc_sc across L; final LayerNorm + bf16 cast fused as the
    last-layer epilogue so the vocab-tiled head kernel is a pure matmul."""
    l = pl.program_id(1)
    nl = pl.num_programs(1)
    T, D = acc_sc.shape

    @pl.when(l == 0)
    def _():
        acc_sc[...] = h0_ref[0]

    pvalid = meta_ref[l]                              # valid prefix length this layer
    h = acc_sc[...]                                   # (T, D) f32
    pref = prefix_ref[0]                              # (Pp, D) f32 (padded prefix)
    Pp = pref.shape[0]
    ln = ln_ref[0]
    hn = _ln_rows(h, ln[0:1], ln[1:2])
    # packed QKV on the normalized text; K/V on the raw prefix (matches reference port)
    qkv_t = jnp.dot(_bf16(hn), wqkv_ref[0],
                    preferred_element_type=jnp.float32) + bqkv_ref[0]
    qkv_p = jnp.dot(_bf16(pref), wqkv_ref[0],
                    preferred_element_type=jnp.float32) + bqkv_ref[0]
    q = qkv_t[:, 0:D]
    k = jnp.concatenate([qkv_p[:, D:2 * D], qkv_t[:, D:2 * D]], axis=0)   # (Pp+T, D)
    v = jnp.concatenate([qkv_p[:, 2 * D:3 * D], qkv_t[:, 2 * D:3 * D]], axis=0)
    pcol = jax.lax.broadcasted_iota(jnp.int32, (T, Pp), 1)
    pbias = jnp.where(pcol < pvalid, 0.0, NEG_INF).astype(jnp.float32)
    row = jax.lax.broadcasted_iota(jnp.int32, (T, T), 0)
    col = jax.lax.broadcasted_iota(jnp.int32, (T, T), 1)
    causal = jnp.where(col <= row, 0.0, NEG_INF).astype(jnp.float32)
    bias = jnp.concatenate([pbias, causal + tbias_ref[0]], axis=-1)       # (T, Pp+T)
    _mha_into(q, k, v, bias, n_heads, attn_sc)
    attn = jnp.dot(_bf16(attn_sc[...]), wo_ref[0],
                   preferred_element_type=jnp.float32) + bo_ref[0]
    h = h + attn
    hn2 = _ln_rows(h, ln[2:3], ln[3:4])
    f = jnp.dot(_bf16(hn2), wf1_ref[0],
                preferred_element_type=jnp.float32) + bf1_ref[0]
    f = jax.nn.gelu(f, approximate=True)
    f = jnp.dot(_bf16(f), wf2_ref[0],
                preferred_element_type=jnp.float32) + bf2_ref[0]
    acc_sc[...] = h + f

    @pl.when(l == nl - 1)
    def _():
        # final LayerNorm + bf16 cast, done ONCE (not per vocab tile in the head)
        hn_ref[0] = _ln_rows(acc_sc[...], lnf_ref[0:1], lnf_ref[1:2]).astype(hn_ref.dtype)


# ----------------------------- small fused kernels --------------------------------------------
def _linear_kernel(x_ref, w_ref, b_ref, o_ref):
    o_ref[...] = jnp.dot(_bf16(x_ref[...]), w_ref[...],
                         preferred_element_type=jnp.float32) + b_ref[...]


def _mlp2_kernel(x_ref, w1_ref, b1_ref, w2_ref, b2_ref, o_ref, *, act):
    h = jnp.dot(_bf16(x_ref[...]), w1_ref[...],
                preferred_element_type=jnp.float32) + b1_ref[...]
    if act == "gelu":
        h = jax.nn.gelu(h, approximate=True)
    o_ref[...] = jnp.dot(_bf16(h), w2_ref[...],
                         preferred_element_type=jnp.float32) + b2_ref[...]


def _stacked_mlp2_kernel(x_ref, w1_ref, b1_ref, w2_ref, b2_ref, o_ref):
    """One prompt-projector MLP per grid step; all skip layers in one pallas_call."""
    h = jnp.dot(_bf16(x_ref[0]), w1_ref[0],
                preferred_element_type=jnp.float32) + b1_ref[0]
    h = jax.nn.gelu(h, approximate=True)
    o_ref[0] = jnp.dot(_bf16(h), w2_ref[0],
                       preferred_element_type=jnp.float32) + b2_ref[0]


def _head_kernel(h_ref, w_ref, b_ref, o_ref):
    """One vocab tile of the decoder head.  h is already final-LayerNormed bf16."""
    o_ref[...] = jnp.dot(h_ref[...], w_ref[...],
                         preferred_element_type=jnp.float32) + b_ref[...]


# ----------------------------- pallas_call wrappers --------------------------------------------
def _full2d(shape):
    return pl.BlockSpec(shape, lambda i: (0, 0))


def linear_rows(x, w, b, tile_m=128):
    """Linear tiled over rows (real grid; at 224x224 scale M = B*196)."""
    M, K = x.shape
    N = w.shape[1]
    if M <= tile_m:
        tile = _round_up(M, SEQ_PAD)
        Mp = tile
    else:
        tile = tile_m
        Mp = _round_up(M, tile_m)
    if Mp != M:
        x = jnp.concatenate([x, jnp.zeros((Mp - M, K), x.dtype)], axis=0)
    out = pl.pallas_call(
        _linear_kernel,
        out_shape=jax.ShapeDtypeStruct((Mp, N), jnp.float32),
        grid=(Mp // tile,),
        in_specs=[pl.BlockSpec((tile, K), lambda i: (i, 0)),
                  pl.BlockSpec((K, N), lambda i: (0, 0)),
                  pl.BlockSpec((1, N), lambda i: (0, 0))],
        out_specs=pl.BlockSpec((tile, N), lambda i: (i, 0)),
        compiler_params=pltpu.CompilerParams(dimension_semantics=("parallel",)),
    )(x, w, b)
    return out[:M]


def mlp2(x, p, act="gelu"):
    M, K = x.shape
    H = p["w1"].shape[1]
    N = p["w2"].shape[1]
    return pl.pallas_call(
        functools.partial(_mlp2_kernel, act=act),
        out_shape=jax.ShapeDtypeStruct((M, N), jnp.float32),
        grid=(1,),
        in_specs=[_full2d((M, K)), _full2d((K, H)), _full2d((1, H)),
                  _full2d((H, N)), _full2d((1, N))],
        out_specs=_full2d((M, N)),
    )(x, p["w1"], p["b1"], p["w2"], p["b2"])


def stacked_mlp2(x, w1, b1, w2, b2):
    """All prompt projectors (one per encoder skip layer) in a single call."""
    Ls, P, Din = x.shape
    H = w1.shape[-1]
    Dout = w2.shape[-1]
    return pl.pallas_call(
        _stacked_mlp2_kernel,
        out_shape=jax.ShapeDtypeStruct((Ls, P, Dout), jnp.float32),
        grid=(Ls,),
        in_specs=[
            pl.BlockSpec((1, P, Din), lambda i: (i, 0, 0)),
            pl.BlockSpec((1, Din, H), lambda i: (i, 0, 0)),
            pl.BlockSpec((1, 1, H), lambda i: (i, 0, 0)),
            pl.BlockSpec((1, H, Dout), lambda i: (i, 0, 0)),
            pl.BlockSpec((1, 1, Dout), lambda i: (i, 0, 0)),
        ],
        out_specs=pl.BlockSpec((1, P, Dout), lambda i: (i, 0, 0)),
        compiler_params=pltpu.CompilerParams(dimension_semantics=("parallel",)),
    )(x, w1, b1, w2, b2)


def encoder_stack(x0, prompts, meta, w, n_heads):
    """Fused encoder: grid=(B, L); residual resident in VMEM across L; returns CLS only."""
    Bb, S, D = x0.shape
    L = prompts.shape[0]
    F = w["wf1"].shape[-1]
    return pl.pallas_call(
        functools.partial(_enc_stack_kernel, n_heads=n_heads),
        out_shape=jax.ShapeDtypeStruct((Bb, 1, D), jnp.float32),
        grid_spec=pltpu.PrefetchScalarGridSpec(
            num_scalar_prefetch=1,
            grid=(Bb, L),
            in_specs=[
                pl.BlockSpec((1, S, D), lambda b, l, m: (b, 0, 0)),
                pl.BlockSpec((1, S, D), lambda b, l, m: (l, 0, 0)),
                pl.BlockSpec((1, 4, D), lambda b, l, m: (l, 0, 0)),
                pl.BlockSpec((1, D, 3 * D), lambda b, l, m: (l, 0, 0)),
                pl.BlockSpec((1, 1, 3 * D), lambda b, l, m: (l, 0, 0)),
                pl.BlockSpec((1, D, D), lambda b, l, m: (l, 0, 0)),
                pl.BlockSpec((1, 1, D), lambda b, l, m: (l, 0, 0)),
                pl.BlockSpec((1, D, F), lambda b, l, m: (l, 0, 0)),
                pl.BlockSpec((1, 1, F), lambda b, l, m: (l, 0, 0)),
                pl.BlockSpec((1, F, D), lambda b, l, m: (l, 0, 0)),
                pl.BlockSpec((1, 1, D), lambda b, l, m: (l, 0, 0)),
            ],
            out_specs=pl.BlockSpec((1, 1, D), lambda b, l, m: (b, 0, 0)),
            scratch_shapes=[pltpu.VMEM((S, D), jnp.float32),
                            pltpu.VMEM((S, D), jnp.float32)]),
        compiler_params=pltpu.CompilerParams(
            dimension_semantics=("parallel", "arbitrary"),
            vmem_limit_bytes=BLOCK_VMEM_LIMIT),
    )(meta, x0, prompts, w["ln"], w["wqkv"], w["bqkv"], w["wo"], w["bo"],
      w["wf1"], w["bf1"], w["wf2"], w["bf2"])


def decoder_stack(h0, prefix, prefix_valid, tbias, w, lnf, n_heads):
    """Fused decoder: grid=(B, L); residual resident across L; emits LN_f(h) in bf16."""
    Bb, T, D = h0.shape
    L = int(prefix_valid.shape[0])
    Pp = prefix.shape[1]                               # prefix is (B*L, Pp, D)
    F = w["wf1"].shape[-1]
    return pl.pallas_call(
        functools.partial(_dec_stack_kernel, n_heads=n_heads),
        out_shape=jax.ShapeDtypeStruct((Bb, T, D), jnp.bfloat16),
        grid_spec=pltpu.PrefetchScalarGridSpec(
            num_scalar_prefetch=1,
            grid=(Bb, L),
            in_specs=[
                pl.BlockSpec((1, T, D), lambda b, l, m: (b, 0, 0)),
                pl.BlockSpec((1, Pp, D), lambda b, l, m, _L=L: (b * _L + l, 0, 0)),
                pl.BlockSpec((1, 1, T), lambda b, l, m: (b, 0, 0)),
                pl.BlockSpec((1, 4, D), lambda b, l, m: (l, 0, 0)),
                pl.BlockSpec((1, D, 3 * D), lambda b, l, m: (l, 0, 0)),
                pl.BlockSpec((1, 1, 3 * D), lambda b, l, m: (l, 0, 0)),
                pl.BlockSpec((1, D, D), lambda b, l, m: (l, 0, 0)),
                pl.BlockSpec((1, 1, D), lambda b, l, m: (l, 0, 0)),
                pl.BlockSpec((1, D, F), lambda b, l, m: (l, 0, 0)),
                pl.BlockSpec((1, 1, F), lambda b, l, m: (l, 0, 0)),
                pl.BlockSpec((1, F, D), lambda b, l, m: (l, 0, 0)),
                pl.BlockSpec((1, 1, D), lambda b, l, m: (l, 0, 0)),
                pl.BlockSpec((2, D), lambda b, l, m: (0, 0)),
            ],
            out_specs=pl.BlockSpec((1, T, D), lambda b, l, m: (b, 0, 0)),
            scratch_shapes=[pltpu.VMEM((T, D), jnp.float32),
                            pltpu.VMEM((T, D), jnp.float32)]),
        compiler_params=pltpu.CompilerParams(
            dimension_semantics=("parallel", "arbitrary"),
            vmem_limit_bytes=BLOCK_VMEM_LIMIT),
    )(prefix_valid, h0, prefix, tbias, w["ln"], w["wqkv"], w["bqkv"], w["wo"], w["bo"],
      w["wf1"], w["bf1"], w["wf2"], w["bf2"], lnf)


def decoder_head(hn_bf16, w, b, tile_n=VOCAB_TILE):
    """Vocab projection tiled over N with a wide tile.  The vocab is padded up to a
    multiple of tile_n (real scale: 49408 -> 49664) and logits are sliced back."""
    M, D = hn_bf16.shape
    V = w.shape[1]
    Vp = _round_up(V, tile_n)
    if Vp != V:
        w = jnp.pad(w, ((0, 0), (0, Vp - V)))
        b = jnp.pad(b, ((0, 0), (0, Vp - V)))
    out = pl.pallas_call(
        _head_kernel,
        out_shape=jax.ShapeDtypeStruct((M, Vp), jnp.float32),
        grid=(Vp // tile_n,),
        in_specs=[
            pl.BlockSpec((M, D), lambda j: (0, 0)),
            pl.BlockSpec((D, tile_n), lambda j: (0, j)),
            pl.BlockSpec((1, tile_n), lambda j: (0, j)),
        ],
        out_specs=pl.BlockSpec((M, tile_n), lambda j: (0, j)),
        compiler_params=pltpu.CompilerParams(
            dimension_semantics=("parallel",),
            vmem_limit_bytes=HEAD_VMEM_LIMIT),
    )(hn_bf16, w, b)
    return out[:, :V]


# ----------------------------- model pieces --------------------------------------------------
def patchify(img, patch):
    Bb, C, H, W = img.shape
    ph, pw = H // patch, W // patch
    x = img.reshape(Bb, C, ph, patch, pw, patch)
    x = x.transpose(0, 2, 4, 1, 3, 5).reshape(Bb, ph * pw, C * patch * patch)
    return x


def encoder_forward(img, ep, prompt_dict):
    patches = patchify(img, PATCH)                                # (B, P, PATCH_DIM)
    Bb, Np, pd = patches.shape
    x = linear_rows(patches.reshape(Bb * Np, pd), ep["patch_w"], ep["patch_b"])
    x = x.reshape(Bb, Np, ENC_DIM)
    cls = jnp.broadcast_to(ep["cls"], (Bb, 1, ENC_DIM))
    x = jnp.concatenate([cls, x], axis=1) + ep["pos"]             # (B, 5, D)
    base_valid = x.shape[1]

    # per-layer metadata + prompt slabs for the fused (B, L) grid
    total = base_valid + sum(p.shape[0] for p in prompt_dict.values() if p is not None)
    S = _round_up(total, SEQ_PAD)
    valid = base_valid
    metas, slabs = [], []
    for l in range(ENC_LAYERS):
        pr = prompt_dict.get(l)
        if pr is not None:
            off, plen = valid, pr.shape[0]
            valid = valid + plen
            slab = jnp.zeros((S, ENC_DIM), jnp.float32).at[off:off + plen].set(pr)
            metas.append((valid, 1, off, plen))
        else:
            slab = jnp.zeros((S, ENC_DIM), jnp.float32)
            metas.append((valid, 0, 0, 0))
        slabs.append(slab)
    meta = jnp.array(metas, jnp.int32)                            # (L, 4) -> SMEM
    prompts = jnp.stack(slabs, axis=0)                            # (L, S, D)
    x0 = jnp.concatenate(
        [x, jnp.zeros((Bb, S - base_valid, ENC_DIM), x.dtype)], axis=1)

    cls_feat = encoder_stack(x0, prompts, meta, ep["layers"], ENC_HEADS)  # (B, 1, D)
    return cls_feat[:, 0, :]                                      # CLS feature (B, ENC_DIM)


def decoder_forward(dp, proj_feat, dec_prompts, input_ids, attention_mask):
    Bb, T = input_ids.shape
    h0 = jnp.take(dp["tok_emb"], input_ids, axis=0) + dp["pos_emb"][:T][None, :, :]
    # layer-invariant text key-padding bias, hoisted out of the layer loop.
    # NOTE: padded text positions are masked as keys only; their logits are garbage
    # (the loss is expected to mask them), matching the reference behaviour.
    tbias = jnp.where(attention_mask[:, None, :] > 0, 0.0, NEG_INF).astype(jnp.float32)

    # per-layer visual-prefix stack (proj feature + projected prompt where present)
    maxp = max(N_IMG_TOKENS + (dec_prompts[l].shape[0] if dec_prompts.get(l) is not None else 0)
               for l in range(DEC_LAYERS))
    Pp = _round_up(maxp, SEQ_PAD)
    prefix_list, pvalid = [], []
    for l in range(DEC_LAYERS):
        pr = dec_prompts.get(l)
        pieces = [proj_feat]                                      # visual prefix always present
        if pr is not None:
            pieces.append(jnp.broadcast_to(pr[None], (Bb, pr.shape[0], DEC_DIM)))
        pre = jnp.concatenate(pieces, axis=1)
        pvalid.append(pre.shape[1])
        pad = Pp - pre.shape[1]
        if pad:
            pre = jnp.concatenate([pre, jnp.zeros((Bb, pad, DEC_DIM), pre.dtype)], axis=1)
        prefix_list.append(pre)
    prefix = jnp.stack(prefix_list, axis=1).reshape(Bb * DEC_LAYERS, Pp, DEC_DIM)
    pvalid = jnp.array(pvalid, jnp.int32)                         # (L,) -> SMEM
    lnf = jnp.concatenate([dp["ln_f_g"], dp["ln_f_b"]], axis=0)   # (2, D)

    # returns LN_f(last_hidden_state) as bf16 — head kernel does no LN work
    return decoder_stack(h0, prefix, pvalid, tbias, dp["layers"], lnf, DEC_HEADS)


def prompt_model_forward(params, img, input_ids, attention_mask):
    # encoder with prompts (real module: frozen ctranspath / CLIP vision, use_prompt=True)
    feat = encoder_forward(img, params["encoder"], params["enc_prompt_dict"])
    # projector MLP
    proj = mlp2(feat, params["projector"], act="gelu")            # (B, N_IMG_TOKENS*DEC_DIM)

    # connection: project each encoder prompt into decoder prompt space.
    # All prompt_projector_{id} MLPs are batched into ONE stacked pallas_call.
    skip_layers = [l for l, p in params["enc_prompt_dict"].items() if p is not None]
    dec_prompts = {l: None for l in params["enc_prompt_dict"]}
    if skip_layers:
        xs = jnp.stack([params["enc_prompt_dict"][l] for l in skip_layers], axis=0)
        w1 = jnp.stack([params[f"prompt_projector_{l}"]["w1"] for l in skip_layers], axis=0)
        b1 = jnp.stack([params[f"prompt_projector_{l}"]["b1"] for l in skip_layers], axis=0)
        w2 = jnp.stack([params[f"prompt_projector_{l}"]["w2"] for l in skip_layers], axis=0)
        b2 = jnp.stack([params[f"prompt_projector_{l}"]["b2"] for l in skip_layers], axis=0)
        outs = stacked_mlp2(xs, w1, b1, w2, b2)
        for i, l in enumerate(skip_layers):
            dec_prompts[l] = outs[i]

    proj = proj.reshape(proj.shape[0], -1, DEC_DIM)               # img.reshape(B, -1, 512)
    hn = decoder_forward(params["decoder"], proj, dec_prompts, input_ids, attention_mask)
    Bb, T = input_ids.shape
    logits = decoder_head(hn.reshape(Bb * T, DEC_DIM),
                          params["decoder_head_w"], params["decoder_head_b"])
    return {"input_ids": input_ids,
            "last_layer_logits": logits.reshape(Bb, T, VOCAB)}


# ----------------------------- deterministic parameter init ---------------------------------
def _wb(key, d_in, d_out, scale=0.02):
    w = (scale * jax.random.normal(key, (d_in, d_out), jnp.float32)).astype(jnp.bfloat16)
    b = jnp.zeros((1, d_out), jnp.float32)
    return w, b


def block_init(key, dim, ffn):
    ks = jax.random.split(key, 6)
    wq = 0.02 * jax.random.normal(ks[0], (dim, dim), jnp.float32)
    wk = 0.02 * jax.random.normal(ks[1], (dim, dim), jnp.float32)
    wv = 0.02 * jax.random.normal(ks[2], (dim, dim), jnp.float32)
    wo, bo = _wb(ks[3], dim, dim)
    wf1, bf1 = _wb(ks[4], dim, ffn)
    wf2, bf2 = _wb(ks[5], ffn, dim)
    ln = jnp.concatenate([jnp.ones((1, dim), jnp.float32), jnp.zeros((1, dim), jnp.float32),
                          jnp.ones((1, dim), jnp.float32), jnp.zeros((1, dim), jnp.float32)],
                         axis=0)
    return {"ln": ln,
            "wqkv": jnp.concatenate([wq, wk, wv], axis=1).astype(jnp.bfloat16),  # packed QKV
            "bqkv": jnp.zeros((1, 3 * dim), jnp.float32),
            "wo": wo, "bo": bo,
            "wf1": wf1, "bf1": bf1, "wf2": wf2, "bf2": bf2}


def stacked_layers_init(key, dim, ffn, n_layers):
    per = [block_init(jax.random.fold_in(key, l), dim, ffn) for l in range(n_layers)]
    return {k: jnp.stack([p[k] for p in per], axis=0) for k in per[0]}


def init_params(key):
    ks = jax.random.split(key, 16)
    patch_w, patch_b = _wb(ks[0], PATCH_DIM, ENC_DIM)
    encoder = {
        "patch_w": patch_w, "patch_b": patch_b,
        "cls": 0.02 * jax.random.normal(ks[1], (1, 1, ENC_DIM), jnp.float32),
        "pos": 0.02 * jax.random.normal(ks[2], (1, 1 + NUM_PATCHES, ENC_DIM), jnp.float32),
        "layers": stacked_layers_init(ks[3], ENC_DIM, ENC_FFN, ENC_LAYERS),
    }
    enc_prompt_dict = {
        l: (0.02 * jax.random.normal(jax.random.fold_in(ks[4], l),
                                     (ENC_PROMPT_LEN, ENC_DIM), jnp.float32)
            if l in ENC_SKIP_LAYERS else None)
        for l in range(ENC_LAYERS)
    }
    p_w1, p_b1 = _wb(ks[5], ENC_DIM, ENC_DIM)
    p_w2, p_b2 = _wb(ks[6], ENC_DIM, N_IMG_TOKENS * DEC_DIM)
    projector = {"w1": p_w1, "b1": p_b1, "w2": p_w2, "b2": p_b2}
    decoder = {
        "tok_emb": 0.02 * jax.random.normal(ks[7], (VOCAB, DEC_DIM), jnp.float32),
        "pos_emb": 0.02 * jax.random.normal(ks[8], (MAX_POS, DEC_DIM), jnp.float32),
        "layers": stacked_layers_init(ks[9], DEC_DIM, DEC_FFN, DEC_LAYERS),
        "ln_f_g": jnp.ones((1, DEC_DIM), jnp.float32),
        "ln_f_b": jnp.zeros((1, DEC_DIM), jnp.float32),
    }
    head_w, head_b = _wb(ks[10], DEC_DIM, VOCAB)
    params = {
        "encoder": encoder,
        "enc_prompt_dict": enc_prompt_dict,
        "projector": projector,
        "decoder": decoder,
        "decoder_head_w": head_w, "decoder_head_b": head_b,
    }
    for l, p in enc_prompt_dict.items():
        if p is not None:
            kk = jax.random.fold_in(ks[11], l)
            w1, b1 = _wb(jax.random.fold_in(kk, 0), ENC_DIM, DEC_DIM)
            w2, b2 = _wb(jax.random.fold_in(kk, 1), DEC_DIM, DEC_DIM)
            params[f"prompt_projector_{l}"] = {"w1": w1, "b1": b1, "w2": w2, "b2": b2}
    return params


# ----------------------------- main ----------------------------------------------------------
if __name__ == "__main__":
    params = init_params(jax.random.PRNGKey(0))
    k_img, k_ids = jax.random.split(jax.random.PRNGKey(0), 2)

    # Real module asserts (B, 3, 224, 224); scaled down to small spatial size per task spec.
    img = jax.random.normal(k_img, (B, IMG_C, IMG_HW, IMG_HW), jnp.float32)

    # TODO(synk): the real forward runs an HF AutoProcessor tokenizer on raw strings;
    # here token ids / padding mask are synthesized directly.
    input_ids = jax.random.randint(k_ids, (B, TEXT_LEN), 0, VOCAB, dtype=jnp.int32)
    attention_mask = jnp.array(
        [[1] * TEXT_LEN, [1] * (TEXT_LEN - 2) + [0, 0]], dtype=jnp.int32)

    fwd = jax.jit(prompt_model_forward)
    out = fwd(params, img, input_ids, attention_mask)
    jax.block_until_ready(out["last_layer_logits"])
    assert out["last_layer_logits"].shape == (B, TEXT_LEN, VOCAB)
    assert out["input_ids"].shape == (B, TEXT_LEN)
    print("KERNEL_OK")
</pallas_src>

<mosaic_0001>
module attributes {stable_mosaic.version = 11 : i64} {
  func.func @_linear_kernel(%arg0: i32, %arg1: memref<8x768xf32, #tpu.memory_space<vmem>>, %arg2: memref<768x64xbf16, #tpu.memory_space<vmem>>, %arg3: memref<1x64xf32, #tpu.memory_space<vmem>>, %arg4: memref<8x64xf32, #tpu.memory_space<vmem>>) attributes {dimension_semantics = [#tpu.dimension_semantics<parallel>], iteration_bounds = array<i64: 1>, scalar_prefetch = 0 : i64, scratch_operands = 0 : i64, tpu.core_type = #tpu.core_type<tc>, window_params = [{transform_indices = @transform_0, window_bounds = array<i64: 8, 768>}, {pipeline_mode = #tpu.pipeline_mode<synchronous>, transform_indices = @transform_1, window_bounds = array<i64: 768, 64>}, {pipeline_mode = #tpu.pipeline_mode<synchronous>, transform_indices = @transform_2, window_bounds = array<i64: 1, 64>}, {transform_indices = @transform_3, window_bounds = array<i64: 8, 64>}]} {
    %c0 = arith.constant 0 : index
    %c0_0 = arith.constant 0 : index
    %0 = vector.load %arg1[%c0, %c0_0] : memref<8x768xf32, #tpu.memory_space<vmem>>, vector<8x768xf32>
    %1 = arith.truncf %0 : vector<8x768xf32> to vector<8x768xbf16>
    %c0_1 = arith.constant 0 : index
    %c0_2 = arith.constant 0 : index
    %2 = vector.load %arg2[%c0_1, %c0_2] : memref<768x64xbf16, #tpu.memory_space<vmem>>, vector<768x64xbf16>
    %cst = arith.constant dense<0.000000e+00> : vector<8x64xf32>
    %3 = tpu.matmul %1, %2, %cst {dimension_numbers = #tpu.dot_dimension_numbers<[1], [0], [0], [1], [0, 0, 1, 1], [], []>} : vector<8x768xbf16>, vector<768x64xbf16>, vector<8x64xf32> -> vector<8x64xf32>
    %c0_3 = arith.constant 0 : index
    %c0_4 = arith.constant 0 : index
    %4 = vector.load %arg3[%c0_3, %c0_4] : memref<1x64xf32, #tpu.memory_space<vmem>>, vector<1x64xf32>
    %5 = vector.broadcast %4 : vector<1x64xf32> to vector<8x64xf32>
    %6 = arith.addf %3, %5 : vector<8x64xf32>
    %c0_5 = arith.constant 0 : index
    %c0_6 = arith.constant 0 : index
    %7 = vector.load %arg4[%c0_5, %c0_6] : memref<8x64xf32, #tpu.memory_space<vmem>>, vector<8x64xf32>
    tpu.vector_store %arg4[%c0_5, %c0_6], %6 {strides = array<i32>} : memref<8x64xf32, #tpu.memory_space<vmem>>, vector<8x64xf32>,
    return
  }
  func.func @transform_0(%arg0: i32) -> (i32, i32) {
    %c0_i32 = arith.constant 0 : i32
    %c0_i32_0 = arith.constant 0 : i32
    return %arg0, %c0_i32 : i32, i32
  }
  func.func @transform_1(%arg0: i32) -> (i32, i32) {
    %c0_i32 = arith.constant 0 : i32
    %c0_i32_0 = arith.constant 0 : i32
    %c0_i32_1 = arith.constant 0 : i32
    return %c0_i32, %c0_i32_0 : i32, i32
  }
  func.func @transform_2(%arg0: i32) -> (i32, i32) {
    %c0_i32 = arith.constant 0 : i32
    %c0_i32_0 = arith.constant 0 : i32
    %c0_i32_1 = arith.constant 0 : i32
    return %c0_i32, %c0_i32_0 : i32, i32
  }
  func.func @transform_3(%arg0: i32) -> (i32, i32) {
    %c0_i32 = arith.constant 0 : i32
    %c0_i32_0 = arith.constant 0 : i32
    return %arg0, %c0_i32 : i32, i32
  }
}

module attributes {stable_mosaic.version = 11 : i64} {
  func.func @_stacked_mlp2_kernel(%arg0: i32, %arg1: memref<1x4x64xf32, #tpu.memory_space<vmem>>, %arg2: memref<1x64x32xbf16, #tpu.memory_space<vmem>>, %arg3: memref<1x1x32xf32, #tpu.memory_space<vmem>>, %arg4: memref<1x32x32xbf16, #tpu.memory_space<vmem>>, %arg5: memref<1x1x32xf32, #tpu.memory_space<vmem>>, %arg6: memref<1x4x32xf32, #tpu.memory_space<vmem>>) attributes {dimension_semantics = [#tpu.dimension_semantics<parallel>], iteration_bounds = array<i64: 1>, scalar_prefetch = 0 : i64, scratch_operands = 0 : i64, tpu.core_type = #tpu.core_type<tc>, window_params = [{transform_indices = @transform_0, window_bounds = array<i64: 1, 4, 64>}, {transform_indices = @transform_1, window_bounds = array<i64: 1, 64, 32>}, {transform_indices = @transform_2, window_bounds = array<i64: 1, 1, 32>}, {transform_indices = @transform_3, window_bounds = array<i64: 1, 32, 32>}, {transform_indices = @transform_4, window_bounds = array<i64: 1, 1, 32>}, {transform_indices = @transform_5, window_bounds = array<i64: 1, 4, 32>}]} {
    %c0 = arith.constant 0 : index
    %c0_0 = arith.constant 0 : index
    %c0_1 = arith.constant 0 : index
    %0 = vector.load %arg1[%c0, %c0_0, %c0_1] : memref<1x4x64xf32, #tpu.memory_space<vmem>>, vector<1x4x64xf32>
    %1 = vector.shape_cast %0 : vector<1x4x64xf32> to vector<4x64xf32>
    %2 = arith.truncf %1 : vector<4x64xf32> to vector<4x64xbf16>
    %c0_2 = arith.constant 0 : index
    %c0_3 = arith.constant 0 : index
    %c0_4 = arith.constant 0 : index
    %3 = vector.load %arg2[%c0_2, %c0_3, %c0_4] : memref<1x64x32xbf16, #tpu.memory_space<vmem>>, vector<1x64x32xbf16>
    %4 = vector.shape_cast %3 : vector<1x64x32xbf16> to vector<64x32xbf16>
    %cst = arith.constant dense<0.000000e+00> : vector<4x32xf32>
    %5 = tpu.matmul %2, %4, %cst {dimension_numbers = #tpu.dot_dimension_numbers<[1], [0], [0], [1], [0, 0, 1, 1], [], []>} : vector<4x64xbf16>, vector<64x32xbf16>, vector<4x32xf32> -> vector<4x32xf32>
    %c0_5 = arith.constant 0 : index
    %c0_6 = arith.constant 0 : index
    %c0_7 = arith.constant 0 : index
    %6 = vector.load %arg3[%c0_5, %c0_6, %c0_7] : memref<1x1x32xf32, #tpu.memory_space<vmem>>, vector<1x1x32xf32>
    %7 = vector.shape_cast %6 : vector<1x1x32xf32> to vector<1x32xf32>
    %8 = vector.broadcast %7 : vector<1x32xf32> to vector<4x32xf32>
    %9 = arith.addf %5, %8 : vector<4x32xf32>
    %10 = arith.mulf %9, %9 : vector<4x32xf32>
    %11 = arith.mulf %9, %10 : vector<4x32xf32>
    %cst_8 = arith.constant 4.471500e-02 : f32
    %12 = vector.broadcast %cst_8 : f32 to vector<4x32xf32>
    %13 = arith.mulf %12, %11 : vector<4x32xf32>
    %14 = arith.addf %9, %13 : vector<4x32xf32>
    %cst_9 = arith.constant 0.797884583 : f32
    %15 = vector.broadcast %cst_9 : f32 to vector<4x32xf32>
    %16 = arith.mulf %15, %14 : vector<4x32xf32>
    %17 = math.tanh %16 : vector<4x32xf32>
    %cst_10 = arith.constant 1.000000e+00 : f32
    %18 = vector.broadcast %cst_10 : f32 to vector<4x32xf32>
    %19 = arith.addf %18, %17 : vector<4x32xf32>
    %cst_11 = arith.constant 5.000000e-01 : f32
    %20 = vector.broadcast %cst_11 : f32 to vector<4x32xf32>
    %21 = arith.mulf %20, %19 : vector<4x32xf32>
    %22 = arith.mulf %9, %21 : vector<4x32xf32>
    %23 = arith.truncf %22 : vector<4x32xf32> to vector<4x32xbf16>
    %c0_12 = arith.constant 0 : index
    %c0_13 = arith.constant 0 : index
    %c0_14 = arith.constant 0 : index
    %24 = vector.load %arg4[%c0_12, %c0_13, %c0_14] : memref<1x32x32xbf16, #tpu.memory_space<vmem>>, vector<1x32x32xbf16>
    %25 = vector.shape_cast %24 : vector<1x32x32xbf16> to vector<32x32xbf16>
    %cst_15 = arith.constant dense<0.000000e+00> : vector<4x32xf32>
    %26 = tpu.matmul %23, %25, %cst_15 {dimension_numbers = #tpu.dot_dimension_numbers<[1], [0], [0], [1], [0, 0, 1, 1], [], []>} : vector<4x32xbf16>, vector<32x32xbf16>, vector<4x32xf32> -> vector<4x32xf32>
    %c0_16 = arith.constant 0 : index
    %c0_17 = arith.constant 0 : index
    %c0_18 = arith.constant 0 : index
    %27 = vector.load %arg5[%c0_16, %c0_17, %c0_18] : memref<1x1x32xf32, #tpu.memory_space<vmem>>, vector<1x1x32xf32>
    %28 = vector.shape_cast %27 : vector<1x1x32xf32> to vector<1x32xf32>
    %29 = vector.broadcast %28 : vector<1x32xf32> to vector<4x32xf32>
    %30 = arith.addf %26, %29 : vector<4x32xf32>
    %c0_19 = arith.constant 0 : index
    %c0_20 = arith.constant 0 : index
    %c0_21 = arith.constant 0 : index
    %31 = vector.load %arg6[%c0_19, %c0_20, %c0_21] : memref<1x4x32xf32, #tpu.memory_space<vmem>>, vector<1x4x32xf32>
    %32 = vector.shape_cast %31 : vector<1x4x32xf32> to vector<4x32xf32>
    %33 = vector.shape_cast %30 : vector<4x32xf32> to vector<1x4x32xf32>
    tpu.vector_store %arg6[%c0_19, %c0_20, %c0_21], %33 {strides = array<i32>} : memref<1x4x32xf32, #tpu.memory_space<vmem>>, vector<1x4x32xf32>,
    return
  }
  func.func @transform_0(%arg0: i32) -> (i32, i32, i32) {
    %c0_i32 = arith.constant 0 : i32
    %c0_i32_0 = arith.constant 0 : i32
    %c0_i32_1 = arith.constant 0 : i32
    return %arg0, %c0_i32, %c0_i32_0 : i32, i32, i32
  }
  func.func @transform_1(%arg0: i32) -> (i32, i32, i32) {
    %c0_i32 = arith.constant 0 : i32
    %c0_i32_0 = arith.constant 0 : i32
    %c0_i32_1 = arith.constant 0 : i32
    return %arg0, %c0_i32, %c0_i32_0 : i32, i32, i32
  }
  func.func @transform_2(%arg0: i32) -> (i32, i32, i32) {
    %c0_i32 = arith.constant 0 : i32
    %c0_i32_0 = arith.constant 0 : i32
    %c0_i32_1 = arith.constant 0 : i32
    return %arg0, %c0_i32, %c0_i32_0 : i32, i32, i32
  }
  func.func @transform_3(%arg0: i32) -> (i32, i32, i32) {
    %c0_i32 = arith.constant 0 : i32
    %c0_i32_0 = arith.constant 0 : i32
    %c0_i32_1 = arith.constant 0 : i32
    return %arg0, %c0_i32, %c0_i32_0 : i32, i32, i32
  }
  func.func @transform_4(%arg0: i32) -> (i32, i32, i32) {
    %c0_i32 = arith.constant 0 : i32
    %c0_i32_0 = arith.constant 0 : i32
    %c0_i32_1 = arith.constant 0 : i32
    return %arg0, %c0_i32, %c0_i32_0 : i32, i32, i32
  }
  func.func @transform_5(%arg0: i32) -> (i32, i32, i32) {
    %c0_i32 = arith.constant 0 : i32
    %c0_i32_0 = arith.constant 0 : i32
    %c0_i32_1 = arith.constant 0 : i32
    return %arg0, %c0_i32, %c0_i32_0 : i32, i32, i32
  }
}

module attributes {stable_mosaic.version = 11 : i64} {
  func.func @_enc_stack_kernel(%arg0: i32, %arg1: i32, %arg2: memref<2x4xi32, #tpu.memory_space<smem>>, %arg3: memref<1x16x64xf32, #tpu.memory_space<vmem>>, %arg4: memref<1x16x64xf32, #tpu.memory_space<vmem>>, %arg5: memref<1x4x64xf32, #tpu.memory_space<vmem>>, %arg6: memref<1x64x192xbf16, #tpu.memory_space<vmem>>, %arg7: memref<1x1x192xf32, #tpu.memory_space<vmem>>, %arg8: memref<1x64x64xbf16, #tpu.memory_space<vmem>>, %arg9: memref<1x1x64xf32, #tpu.memory_space<vmem>>, %arg10: memref<1x64x128xbf16, #tpu.memory_space<vmem>>, %arg11: memref<1x1x128xf32, #tpu.memory_space<vmem>>, %arg12: memref<1x128x64xbf16, #tpu.memory_space<vmem>>, %arg13: memref<1x1x64xf32, #tpu.memory_space<vmem>>, %arg14: memref<1x1x64xf32, #tpu.memory_space<vmem>>, %arg15: memref<16x64xf32, #tpu.memory_space<vmem>>, %arg16: memref<16x64xf32, #tpu.memory_space<vmem>>) attributes {dimension_semantics = [#tpu.dimension_semantics<parallel>, #tpu.dimension_semantics<arbitrary>], iteration_bounds = array<i64: 2, 2>, scalar_prefetch = 1 : i64, scratch_operands = 2 : i64, tpu.core_type = #tpu.core_type<tc>, window_params = [{transform_indices = @transform_0, window_bounds = array<i64: 1, 16, 64>}, {transform_indices = @transform_1, window_bounds = array<i64: 1, 16, 64>}, {transform_indices = @transform_2, window_bounds = array<i64: 1, 4, 64>}, {transform_indices = @transform_3, window_bounds = array<i64: 1, 64, 192>}, {transform_indices = @transform_4, window_bounds = array<i64: 1, 1, 192>}, {transform_indices = @transform_5, window_bounds = array<i64: 1, 64, 64>}, {transform_indices = @transform_6, window_bounds = array<i64: 1, 1, 64>}, {transform_indices = @transform_7, window_bounds = array<i64: 1, 64, 128>}, {transform_indices = @transform_8, window_bounds = array<i64: 1, 1, 128>}, {transform_indices = @transform_9, window_bounds = array<i64: 1, 128, 64>}, {transform_indices = @transform_10, window_bounds = array<i64: 1, 1, 64>}, {transform_indices = @transform_11, window_bounds = array<i64: 1, 1, 64>}]} {
    %c0_i32 = arith.constant 0 : i32
    %0 = arith.cmpi eq, %arg1, %c0_i32 : i32
    %1 = arith.extui %0 : i1 to i32
    %c0_i32_0 = arith.constant 0 : i32
    %2 = arith.cmpi ne, %1, %c0_i32_0 : i32
    scf.if %2 {
      %c0_69 = arith.constant 0 : index
      %c0_70 = arith.constant 0 : index
      %c0_71 = arith.constant 0 : index
      %170 = vector.load %arg3[%c0_69, %c0_70, %c0_71] : memref<1x16x64xf32, #tpu.memory_space<vmem>>, vector<1x16x64xf32>
      %171 = vector.shape_cast %170 : vector<1x16x64xf32> to vector<16x64xf32>
      %c0_72 = arith.constant 0 : index
      %c0_73 = arith.constant 0 : index
      %172 = vector.load %arg15[%c0_72, %c0_73] : memref<16x64xf32, #tpu.memory_space<vmem>>, vector<16x64xf32>
      tpu.vector_store %arg15[%c0_72, %c0_73], %171 {strides = array<i32>} : memref<16x64xf32, #tpu.memory_space<vmem>>, vector<16x64xf32>,
    } else {
    }
    %3 = arith.index_cast %arg1 : i32 to index
    %c1 = arith.constant 1 : index
    %4 = memref.load %arg2[%3, %c1] : memref<2x4xi32, #tpu.memory_space<smem>>
    %c1_i32 = arith.constant 1 : i32
    %5 = arith.cmpi eq, %4, %c1_i32 : i32
    %6 = arith.extui %5 : i1 to i32
    %c0_i32_1 = arith.constant 0 : i32
    %7 = arith.cmpi ne, %6, %c0_i32_1 : i32
    scf.if %7 {
      %170 = arith.index_cast %arg1 : i32 to index
      %c2 = arith.constant 2 : index
      %171 = memref.load %arg2[%170, %c2] : memref<2x4xi32, #tpu.memory_space<smem>>
      %172 = arith.index_cast %arg1 : i32 to index
      %c3 = arith.constant 3 : index
      %173 = memref.load %arg2[%172, %c3] : memref<2x4xi32, #tpu.memory_space<smem>>
      %174 = tpu.iota {dimensions = array<i32: 0>} : vector<16x1xi32>
      %175 = vector.broadcast %171 : i32 to vector<16x1xi32>
      %176 = arith.cmpi sge, %174, %175 : vector<16x1xi32>
      %177 = arith.addi %171, %173 : i32
      %178 = vector.broadcast %177 : i32 to vector<16x1xi32>
      %179 = arith.cmpi slt, %174, %178 : vector<16x1xi32>
      %180 = arith.andi %176, %179 : vector<16x1xi1>
      %c0_69 = arith.constant 0 : index
      %c0_70 = arith.constant 0 : index
      %c0_71 = arith.constant 0 : index
      %181 = vector.load %arg4[%c0_69, %c0_70, %c0_71] : memref<1x16x64xf32, #tpu.memory_space<vmem>>, vector<1x16x64xf32>
      %182 = vector.shape_cast %181 : vector<1x16x64xf32> to vector<16x64xf32>
      %c0_72 = arith.constant 0 : index
      %c0_73 = arith.constant 0 : index
      %183 = vector.load %arg15[%c0_72, %c0_73] : memref<16x64xf32, #tpu.memory_space<vmem>>, vector<16x64xf32>
      %184 = vector.shape_cast %180 : vector<16x1xi1> to vector<16x1xi1>
      %185 = vector.broadcast %184 : vector<16x1xi1> to vector<16x64xi1>
      %186 = arith.select %185, %182, %183 : vector<16x64xi1>, vector<16x64xf32>
      %c0_74 = arith.constant 0 : index
      %c0_75 = arith.constant 0 : index
      %187 = vector.load %arg15[%c0_74, %c0_75] : memref<16x64xf32, #tpu.memory_space<vmem>>, vector<16x64xf32>
      tpu.vector_store %arg15[%c0_74, %c0_75], %186 {strides = array<i32>} : memref<16x64xf32, #tpu.memory_space<vmem>>, vector<16x64xf32>,
    } else {
    }
    %8 = arith.index_cast %arg1 : i32 to index
    %c0 = arith.constant 0 : index
    %9 = memref.load %arg2[%8, %c0] : memref<2x4xi32, #tpu.memory_space<smem>>
    %c0_2 = arith.constant 0 : index
    %c0_3 = arith.constant 0 : index
    %10 = vector.load %arg15[%c0_2, %c0_3] : memref<16x64xf32, #tpu.memory_space<vmem>>, vector<16x64xf32>
    %c0_4 = arith.constant 0 : index
    %c0_5 = arith.constant 0 : index
    %c0_6 = arith.constant 0 : index
    %11 = vector.load %arg5[%c0_4, %c0_5, %c0_6] : memref<1x4x64xf32, #tpu.memory_space<vmem>>, vector<1x4x64xf32>
    %12 = vector.shape_cast %11 : vector<1x4x64xf32> to vector<4x64xf32>
    %13 = vector.extract_strided_slice %12 {offsets = [0, 0], sizes = [1, 64], strides = [1, 1]} : vector<4x64xf32> to vector<1x64xf32>
    %14 = vector.extract_strided_slice %12 {offsets = [1, 0], sizes = [1, 64], strides = [1, 1]} : vector<4x64xf32> to vector<1x64xf32>
    %cst = arith.constant dense<0.000000e+00> : vector<16xf32>
    %15 = vector.multi_reduction <add>, %10, %cst [1] : vector<16x64xf32> to vector<16xf32>
    %16 = vector.shape_cast %15 : vector<16xf32> to vector<16x1xf32>
    %cst_7 = arith.constant 6.400000e+01 : f32
    %17 = vector.broadcast %cst_7 : f32 to vector<16x1xf32>
    %18 = arith.divf %16, %17 : vector<16x1xf32>
    %19 = vector.broadcast %18 : vector<16x1xf32> to vector<16x64xf32>
    %20 = arith.subf %10, %19 : vector<16x64xf32>
    %21 = arith.mulf %20, %20 : vector<16x64xf32>
    %cst_8 = arith.constant dense<0.000000e+00> : vector<16xf32>
    %22 = vector.multi_reduction <add>, %21, %cst_8 [1] : vector<16x64xf32> to vector<16xf32>
    %23 = vector.shape_cast %22 : vector<16xf32> to vector<16x1xf32>
    %cst_9 = arith.constant 6.400000e+01 : f32
    %24 = vector.broadcast %cst_9 : f32 to vector<16x1xf32>
    %25 = arith.divf %23, %24 : vector<16x1xf32>
    %26 = vector.broadcast %18 : vector<16x1xf32> to vector<16x64xf32>
    %27 = arith.subf %10, %26 : vector<16x64xf32>
    %cst_10 = arith.constant 9.99999974E-6 : f32
    %28 = vector.broadcast %cst_10 : f32 to vector<16x1xf32>
    %29 = arith.addf %25, %28 : vector<16x1xf32>
    %30 = math.rsqrt %29 : vector<16x1xf32>
    %31 = vector.broadcast %30 : vector<16x1xf32> to vector<16x64xf32>
    %32 = arith.mulf %27, %31 : vector<16x64xf32>
    %33 = vector.broadcast %13 : vector<1x64xf32> to vector<16x64xf32>
    %34 = arith.mulf %32, %33 : vector<16x64xf32>
    %35 = vector.broadcast %14 : vector<1x64xf32> to vector<16x64xf32>
    %36 = arith.addf %34, %35 : vector<16x64xf32>
    %37 = arith.truncf %36 : vector<16x64xf32> to vector<16x64xbf16>
    %c0_11 = arith.constant 0 : index
    %c0_12 = arith.constant 0 : index
    %c0_13 = arith.constant 0 : index
    %38 = vector.load %arg6[%c0_11, %c0_12, %c0_13] : memref<1x64x192xbf16, #tpu.memory_space<vmem>>, vector<1x64x192xbf16>
    %39 = vector.shape_cast %38 : vector<1x64x192xbf16> to vector<64x192xbf16>
    %cst_14 = arith.constant dense<0.000000e+00> : vector<16x192xf32>
    %40 = tpu.matmul %37, %39, %cst_14 {dimension_numbers = #tpu.dot_dimension_numbers<[1], [0], [0], [1], [0, 0, 1, 1], [], []>} : vector<16x64xbf16>, vector<64x192xbf16>, vector<16x192xf32> -> vector<16x192xf32>
    %c0_15 = arith.constant 0 : index
    %c0_16 = arith.constant 0 : index
    %c0_17 = arith.constant 0 : index
    %41 = vector.load %arg7[%c0_15, %c0_16, %c0_17] : memref<1x1x192xf32, #tpu.memory_space<vmem>>, vector<1x1x192xf32>
    %42 = vector.shape_cast %41 : vector<1x1x192xf32> to vector<1x192xf32>
    %43 = vector.broadcast %42 : vector<1x192xf32> to vector<16x192xf32>
    %44 = arith.addf %40, %43 : vector<16x192xf32>
    %45 = vector.extract_strided_slice %44 {offsets = [0, 0], sizes = [16, 64], strides = [1, 1]} : vector<16x192xf32> to vector<16x64xf32>
    %46 = vector.extract_strided_slice %44 {offsets = [0, 64], sizes = [16, 64], strides = [1, 1]} : vector<16x192xf32> to vector<16x64xf32>
    %47 = vector.extract_strided_slice %44 {offsets = [0, 128], sizes = [16, 64], strides = [1, 1]} : vector<16x192xf32> to vector<16x64xf32>
    %48 = tpu.iota {dimensions = array<i32: 1>} : vector<16x16xi32>
    %49 = vector.broadcast %9 : i32 to vector<16x16xi32>
    %50 = arith.cmpi slt, %48, %49 : vector<16x16xi32>
    %cst_18 = arith.constant 0.000000e+00 : f32
    %cst_19 = arith.constant -1.000000e+09 : f32
    %51 = vector.broadcast %cst_18 : f32 to vector<16x16xf32>
    %52 = vector.broadcast %cst_19 : f32 to vector<16x16xf32>
    %53 = arith.select %50, %51, %52 : vector<16x16xi1>, vector<16x16xf32>
    %54 = vector.extract_strided_slice %45 {offsets = [0, 0], sizes = [16, 32], strides = [1, 1]} : vector<16x64xf32> to vector<16x32xf32>
    %55 = arith.truncf %54 : vector<16x32xf32> to vector<16x32xbf16>
    %56 = vector.extract_strided_slice %46 {offsets = [0, 0], sizes = [16, 32], strides = [1, 1]} : vector<16x64xf32> to vector<16x32xf32>
    %57 = arith.truncf %56 : vector<16x32xf32> to vector<16x32xbf16>
    %58 = tpu.transpose %57, [1, 0] : vector<16x32xbf16> -> vector<32x16xbf16>
    %cst_20 = arith.constant dense<0.000000e+00> : vector<16x16xf32>
    %59 = tpu.matmul %55, %58, %cst_20 {dimension_numbers = #tpu.dot_dimension_numbers<[1], [0], [0], [1], [0, 0, 1, 1], [], []>} : vector<16x32xbf16>, vector<32x16xbf16>, vector<16x16xf32> -> vector<16x16xf32>
    %cst_21 = arith.constant 0.176776692 : f32
    %60 = vector.broadcast %cst_21 : f32 to vector<16x16xf32>
    %61 = arith.mulf %59, %60 : vector<16x16xf32>
    %62 = arith.addf %61, %53 : vector<16x16xf32>
    %cst_22 = arith.constant dense<0xFF800000> : vector<16xf32>
    %63 = vector.multi_reduction <maximumf>, %62, %cst_22 [1] : vector<16x16xf32> to vector<16xf32>
    %64 = vector.shape_cast %63 : vector<16xf32> to vector<16x1xf32>
    %65 = vector.broadcast %64 : vector<16x1xf32> to vector<16x16xf32>
    %66 = arith.subf %62, %65 : vector<16x16xf32>
    %67 = math.exp %66 : vector<16x16xf32>
    %cst_23 = arith.constant dense<0.000000e+00> : vector<16xf32>
    %68 = vector.multi_reduction <add>, %67, %cst_23 [1] : vector<16x16xf32> to vector<16xf32>
    %69 = vector.shape_cast %68 : vector<16xf32> to vector<16x1xf32>
    %70 = tpu.reciprocal %69 {approx = true} : vector<16x1xf32> -> vector<16x1xf32>
    %71 = vector.broadcast %70 : vector<16x1xf32> to vector<16x16xf32>
    %72 = arith.mulf %67, %71 : vector<16x16xf32>
    %73 = arith.truncf %72 : vector<16x16xf32> to vector<16x16xbf16>
    %74 = vector.extract_strided_slice %47 {offsets = [0, 0], sizes = [16, 32], strides = [1, 1]} : vector<16x64xf32> to vector<16x32xf32>
    %75 = arith.truncf %74 : vector<16x32xf32> to vector<16x32xbf16>
    %cst_24 = arith.constant dense<0.000000e+00> : vector<16x32xf32>
    %76 = tpu.matmul %73, %75, %cst_24 {dimension_numbers = #tpu.dot_dimension_numbers<[1], [0], [0], [1], [0, 0, 1, 1], [], []>} : vector<16x16xbf16>, vector<16x32xbf16>, vector<16x32xf32> -> vector<16x32xf32>
    %c0_25 = arith.constant 0 : index
    %c0_26 = arith.constant 0 : index
    %77 = vector.load %arg16[%c0_25, %c0_26] : memref<16x64xf32, #tpu.memory_space<vmem>>, vector<16x32xf32>
    tpu.vector_store %arg16[%c0_25, %c0_26], %76 {strides = array<i32>} : memref<16x64xf32, #tpu.memory_space<vmem>>, vector<16x32xf32>,
    %78 = vector.extract_strided_slice %45 {offsets = [0, 32], sizes = [16, 32], strides = [1, 1]} : vector<16x64xf32> to vector<16x32xf32>
    %79 = arith.truncf %78 : vector<16x32xf32> to vector<16x32xbf16>
    %80 = vector.extract_strided_slice %46 {offsets = [0, 32], sizes = [16, 32], strides = [1, 1]} : vector<16x64xf32> to vector<16x32xf32>
    %81 = arith.truncf %80 : vector<16x32xf32> to vector<16x32xbf16>
    %82 = tpu.transpose %81, [1, 0] : vector<16x32xbf16> -> vector<32x16xbf16>
    %cst_27 = arith.constant dense<0.000000e+00> : vector<16x16xf32>
    %83 = tpu.matmul %79, %82, %cst_27 {dimension_numbers = #tpu.dot_dimension_numbers<[1], [0], [0], [1], [0, 0, 1, 1], [], []>} : vector<16x32xbf16>, vector<32x16xbf16>, vector<16x16xf32> -> vector<16x16xf32>
    %cst_28 = arith.constant 0.176776692 : f32
    %84 = vector.broadcast %cst_28 : f32 to vector<16x16xf32>
    %85 = arith.mulf %83, %84 : vector<16x16xf32>
    %86 = arith.addf %85, %53 : vector<16x16xf32>
    %cst_29 = arith.constant dense<0xFF800000> : vector<16xf32>
    %87 = vector.multi_reduction <maximumf>, %86, %cst_29 [1] : vector<16x16xf32> to vector<16xf32>
    %88 = vector.shape_cast %87 : vector<16xf32> to vector<16x1xf32>
    %89 = vector.broadcast %88 : vector<16x1xf32> to vector<16x16xf32>
    %90 = arith.subf %86, %89 : vector<16x16xf32>
    %91 = math.exp %90 : vector<16x16xf32>
    %cst_30 = arith.constant dense<0.000000e+00> : vector<16xf32>
    %92 = vector.multi_reduction <add>, %91, %cst_30 [1] : vector<16x16xf32> to vector<16xf32>
    %93 = vector.shape_cast %92 : vector<16xf32> to vector<16x1xf32>
    %94 = tpu.reciprocal %93 {approx = true} : vector<16x1xf32> -> vector<16x1xf32>
    %95 = vector.broadcast %94 : vector<16x1xf32> to vector<16x16xf32>
    %96 = arith.mulf %91, %95 : vector<16x16xf32>
    %97 = arith.truncf %96 : vector<16x16xf32> to vector<16x16xbf16>
    %98 = vector.extract_strided_slice %47 {offsets = [0, 32], sizes = [16, 32], strides = [1, 1]} : vector<16x64xf32> to vector<16x32xf32>
    %99 = arith.truncf %98 : vector<16x32xf32> to vector<16x32xbf16>
    %cst_31 = arith.constant dense<0.000000e+00> : vector<16x32xf32>
    %100 = tpu.matmul %97, %99, %cst_31 {dimension_numbers = #tpu.dot_dimension_numbers<[1], [0], [0], [1], [0, 0, 1, 1], [], []>} : vector<16x16xbf16>, vector<16x32xbf16>, vector<16x32xf32> -> vector<16x32xf32>
    %c0_32 = arith.constant 0 : index
    %c32 = arith.constant 32 : index
    %101 = vector.load %arg16[%c0_32, %c32] : memref<16x64xf32, #tpu.memory_space<vmem>>, vector<16x32xf32>
    tpu.vector_store %arg16[%c0_32, %c32], %100 {strides = array<i32>} : memref<16x64xf32, #tpu.memory_space<vmem>>, vector<16x32xf32>,
    %c0_33 = arith.constant 0 : index
    %c0_34 = arith.constant 0 : index
    %102 = vector.load %arg16[%c0_33, %c0_34] : memref<16x64xf32, #tpu.memory_space<vmem>>, vector<16x64xf32>
    %103 = arith.truncf %102 : vector<16x64xf32> to vector<16x64xbf16>
    %c0_35 = arith.constant 0 : index
    %c0_36 = arith.constant 0 : index
    %c0_37 = arith.constant 0 : index
    %104 = vector.load %arg8[%c0_35, %c0_36, %c0_37] : memref<1x64x64xbf16, #tpu.memory_space<vmem>>, vector<1x64x64xbf16>
    %105 = vector.shape_cast %104 : vector<1x64x64xbf16> to vector<64x64xbf16>
    %cst_38 = arith.constant dense<0.000000e+00> : vector<16x64xf32>
    %106 = tpu.matmul %103, %105, %cst_38 {dimension_numbers = #tpu.dot_dimension_numbers<[1], [0], [0], [1], [0, 0, 1, 1], [], []>} : vector<16x64xbf16>, vector<64x64xbf16>, vector<16x64xf32> -> vector<16x64xf32>
    %c0_39 = arith.constant 0 : index
    %c0_40 = arith.constant 0 : index
    %c0_41 = arith.constant 0 : index
    %107 = vector.load %arg9[%c0_39, %c0_40, %c0_41] : memref<1x1x64xf32, #tpu.memory_space<vmem>>, vector<1x1x64xf32>
    %108 = vector.shape_cast %107 : vector<1x1x64xf32> to vector<1x64xf32>
    %109 = vector.broadcast %108 : vector<1x64xf32> to vector<16x64xf32>
    %110 = arith.addf %106, %109 : vector<16x64xf32>
    %111 = arith.addf %10, %110 : vector<16x64xf32>
    %112 = vector.extract_strided_slice %12 {offsets = [2, 0], sizes = [1, 64], strides = [1, 1]} : vector<4x64xf32> to vector<1x64xf32>
    %113 = vector.extract_strided_slice %12 {offsets = [3, 0], sizes = [1, 64], strides = [1, 1]} : vector<4x64xf32> to vector<1x64xf32>
    %cst_42 = arith.constant dense<0.000000e+00> : vector<16xf32>
    %114 = vector.multi_reduction <add>, %111, %cst_42 [1] : vector<16x64xf32> to vector<16xf32>
    %115 = vector.shape_cast %114 : vector<16xf32> to vector<16x1xf32>
    %cst_43 = arith.constant 6.400000e+01 : f32
    %116 = vector.broadcast %cst_43 : f32 to vector<16x1xf32>
    %117 = arith.divf %115, %116 : vector<16x1xf32>
    %118 = vector.broadcast %117 : vector<16x1xf32> to vector<16x64xf32>
    %119 = arith.subf %111, %118 : vector<16x64xf32>
    %120 = arith.mulf %119, %119 : vector<16x64xf32>
    %cst_44 = arith.constant dense<0.000000e+00> : vector<16xf32>
    %121 = vector.multi_reduction <add>, %120, %cst_44 [1] : vector<16x64xf32> to vector<16xf32>
    %122 = vector.shape_cast %121 : vector<16xf32> to vector<16x1xf32>
    %cst_45 = arith.constant 6.400000e+01 : f32
    %123 = vector.broadcast %cst_45 : f32 to vector<16x1xf32>
    %124 = arith.divf %122, %123 : vector<16x1xf32>
    %125 = vector.broadcast %117 : vector<16x1xf32> to vector<16x64xf32>
    %126 = arith.subf %111, %125 : vector<16x64xf32>
    %cst_46 = arith.constant 9.99999974E-6 : f32
    %127 = vector.broadcast %cst_46 : f32 to vector<16x1xf32>
    %128 = arith.addf %124, %127 : vector<16x1xf32>
    %129 = math.rsqrt %128 : vector<16x1xf32>
    %130 = vector.broadcast %129 : vector<16x1xf32> to vector<16x64xf32>
    %131 = arith.mulf %126, %130 : vector<16x64xf32>
    %132 = vector.broadcast %112 : vector<1x64xf32> to vector<16x64xf32>
    %133 = arith.mulf %131, %132 : vector<16x64xf32>
    %134 = vector.broadcast %113 : vector<1x64xf32> to vector<16x64xf32>
    %135 = arith.addf %133, %134 : vector<16x64xf32>
    %136 = arith.truncf %135 : vector<16x64xf32> to vector<16x64xbf16>
    %c0_47 = arith.constant 0 : index
    %c0_48 = arith.constant 0 : index
    %c0_49 = arith.constant 0 : index
    %137 = vector.load %arg10[%c0_47, %c0_48, %c0_49] : memref<1x64x128xbf16, #tpu.memory_space<vmem>>, vector<1x64x128xbf16>
    %138 = vector.shape_cast %137 : vector<1x64x128xbf16> to vector<64x128xbf16>
    %cst_50 = arith.constant dense<0.000000e+00> : vector<16x128xf32>
    %139 = tpu.matmul %136, %138, %cst_50 {dimension_numbers = #tpu.dot_dimension_numbers<[1], [0], [0], [1], [0, 0, 1, 1], [], []>} : vector<16x64xbf16>, vector<64x128xbf16>, vector<16x128xf32> -> vector<16x128xf32>
    %c0_51 = arith.constant 0 : index
    %c0_52 = arith.constant 0 : index
    %c0_53 = arith.constant 0 : index
    %140 = vector.load %arg11[%c0_51, %c0_52, %c0_53] : memref<1x1x128xf32, #tpu.memory_space<vmem>>, vector<1x1x128xf32>
    %141 = vector.shape_cast %140 : vector<1x1x128xf32> to vector<1x128xf32>
    %142 = vector.broadcast %141 : vector<1x128xf32> to vector<16x128xf32>
    %143 = arith.addf %139, %142 : vector<16x128xf32>
    %144 = arith.mulf %143, %143 : vector<16x128xf32>
    %145 = arith.mulf %143, %144 : vector<16x128xf32>
    %cst_54 = arith.constant 4.471500e-02 : f32
    %146 = vector.broadcast %cst_54 : f32 to vector<16x128xf32>
    %147 = arith.mulf %146, %145 : vector<16x128xf32>
    %148 = arith.addf %143, %147 : vector<16x128xf32>
    %cst_55 = arith.constant 0.797884583 : f32
    %149 = vector.broadcast %cst_55 : f32 to vector<16x128xf32>
    %150 = arith.mulf %149, %148 : vector<16x128xf32>
    %151 = math.tanh %150 : vector<16x128xf32>
    %cst_56 = arith.constant 1.000000e+00 : f32
    %152 = vector.broadcast %cst_56 : f32 to vector<16x128xf32>
    %153 = arith.addf %152, %151 : vector<16x128xf32>
    %cst_57 = arith.constant 5.000000e-01 : f32
    %154 = vector.broadcast %cst_57 : f32 to vector<16x128xf32>
    %155 = arith.mulf %154, %153 : vector<16x128xf32>
    %156 = arith.mulf %143, %155 : vector<16x128xf32>
    %157 = arith.truncf %156 : vector<16x128xf32> to vector<16x128xbf16>
    %c0_58 = arith.constant 0 : index
    %c0_59 = arith.constant 0 : index
    %c0_60 = arith.constant 0 : index
    %158 = vector.load %arg12[%c0_58, %c0_59, %c0_60] : memref<1x128x64xbf16, #tpu.memory_space<vmem>>, vector<1x128x64xbf16>
    %159 = vector.shape_cast %158 : vector<1x128x64xbf16> to vector<128x64xbf16>
    %cst_61 = arith.constant dense<0.000000e+00> : vector<16x64xf32>
    %160 = tpu.matmul %157, %159, %cst_61 {dimension_numbers = #tpu.dot_dimension_numbers<[1], [0], [0], [1], [0, 0, 1, 1], [], []>} : vector<16x128xbf16>, vector<128x64xbf16>, vector<16x64xf32> -> vector<16x64xf32>
    %c0_62 = arith.constant 0 : index
    %c0_63 = arith.constant 0 : index
    %c0_64 = arith.constant 0 : index
    %161 = vector.load %arg13[%c0_62, %c0_63, %c0_64] : memref<1x1x64xf32, #tpu.memory_space<vmem>>, vector<1x1x64xf32>
    %162 = vector.shape_cast %161 : vector<1x1x64xf32> to vector<1x64xf32>
    %163 = vector.broadcast %162 : vector<1x64xf32> to vector<16x64xf32>
    %164 = arith.addf %160, %163 : vector<16x64xf32>
    %165 = arith.addf %111, %164 : vector<16x64xf32>
    %c0_65 = arith.constant 0 : index
    %c0_66 = arith.constant 0 : index
    %166 = vector.load %arg15[%c0_65, %c0_66] : memref<16x64xf32, #tpu.memory_space<vmem>>, vector<16x64xf32>
    tpu.vector_store %arg15[%c0_65, %c0_66], %165 {strides = array<i32>} : memref<16x64xf32, #tpu.memory_space<vmem>>, vector<16x64xf32>,
    %c1_i32_67 = arith.constant 1 : i32
    %167 = arith.cmpi eq, %arg1, %c1_i32_67 : i32
    %168 = arith.extui %167 : i1 to i32
    %c0_i32_68 = arith.constant 0 : i32
    %169 = arith.cmpi ne, %168, %c0_i32_68 : i32
    scf.if %169 {
      %c0_69 = arith.constant 0 : index
      %c0_70 = arith.constant 0 : index
      %170 = vector.load %arg15[%c0_69, %c0_70] : memref<16x64xf32, #tpu.memory_space<vmem>>, vector<1x64xf32>
      %c0_71 = arith.constant 0 : index
      %c0_72 = arith.constant 0 : index
      %c0_73 = arith.constant 0 : index
      %171 = vector.load %arg14[%c0_71, %c0_72, %c0_73] : memref<1x1x64xf32, #tpu.memory_space<vmem>>, vector<1x1x64xf32>
      %172 = vector.shape_cast %171 : vector<1x1x64xf32> to vector<1x64xf32>
      %173 = vector.shape_cast %170 : vector<1x64xf32> to vector<1x1x64xf32>
      tpu.vector_store %arg14[%c0_71, %c0_72, %c0_73], %173 {strides = array<i32>} : memref<1x1x64xf32, #tpu.memory_space<vmem>>, vector<1x1x64xf32>,
    } else {
    }
    return
  }
  func.func @transform_0(%arg0: i32, %arg1: i32, %arg2: memref<2x4xi32, #tpu.memory_space<smem>>) -> (i32, i32, i32) {
    %c0_i32 = arith.constant 0 : i32
    %c0_i32_0 = arith.constant 0 : i32
    %c0_i32_1 = arith.constant 0 : i32
    return %arg0, %c0_i32, %c0_i32_0 : i32, i32, i32
  }
  func.func @transform_1(%arg0: i32, %arg1: i32, %arg2: memref<2x4xi32, #tpu.memory_space<smem>>) -> (i32, i32, i32) {
    %c0_i32 = arith.constant 0 : i32
    %c0_i32_0 = arith.constant 0 : i32
    %c0_i32_1 = arith.constant 0 : i32
    return %arg1, %c0_i32, %c0_i32_0 : i32, i32, i32
  }
  func.func @transform_2(%arg0: i32, %arg1: i32, %arg2: memref<2x4xi32, #tpu.memory_space<smem>>) -> (i32, i32, i32) {
    %c0_i32 = arith.constant 0 : i32
    %c0_i32_0 = arith.constant 0 : i32
    %c0_i32_1 = arith.constant 0 : i32
    return %arg1, %c0_i32, %c0_i32_0 : i32, i32, i32
  }
  func.func @transform_3(%arg0: i32, %arg1: i32, %arg2: memref<2x4xi32, #tpu.memory_space<smem>>) -> (i32, i32, i32) {
    %c0_i32 = arith.constant 0 : i32
    %c0_i32_0 = arith.constant 0 : i32
    %c0_i32_1 = arith.constant 0 : i32
    return %arg1, %c0_i32, %c0_i32_0 : i32, i32, i32
  }
  func.func @transform_4(%arg0: i32, %arg1: i32, %arg2: memref<2x4xi32, #tpu.memory_space<smem>>) -> (i32, i32, i32) {
    %c0_i32 = arith.constant 0 : i32
    %c0_i32_0 = arith.constant 0 : i32
    %c0_i32_1 = arith.constant 0 : i32
    return %arg1, %c0_i32, %c0_i32_0 : i32, i32, i32
  }
  func.func @transform_5(%arg0: i32, %arg1: i32, %arg2: memref<2x4xi32, #tpu.memory_space<smem>>) -> (i32, i32, i32) {
    %c0_i32 = arith.constant 0 : i32
    %c0_i32_0 = arith.constant 0 : i32
    %c0_i32_1 = arith.constant 0 : i32
    return %arg1, %c0_i32, %c0_i32_0 : i32, i32, i32
  }
  func.func @transform_6(%arg0: i32, %arg1: i32, %arg2: memref<2x4xi32, #tpu.memory_space<smem>>) -> (i32, i32, i32) {
    %c0_i32 = arith.constant 0 : i32
    %c0_i32_0 = arith.constant 0 : i32
    %c0_i32_1 = arith.constant 0 : i32
    return %arg1, %c0_i32, %c0_i32_0 : i32, i32, i32
  }
  func.func @transform_7(%arg0: i32, %arg1: i32, %arg2: memref<2x4xi32, #tpu.memory_space<smem>>) -> (i32, i32, i32) {
    %c0_i32 = arith.constant 0 : i32
    %c0_i32_0 = arith.constant 0 : i32
    %c0_i32_1 = arith.constant 0 : i32
    return %arg1, %c0_i32, %c0_i32_0 : i32, i32, i32
  }
  func.func @transform_8(%arg0: i32, %arg1: i32, %arg2: memref<2x4xi32, #tpu.memory_space<smem>>) -> (i32, i32, i32) {
    %c0_i32 = arith.constant 0 : i32
    %c0_i32_0 = arith.constant 0 : i32
    %c0_i32_1 = arith.constant 0 : i32
    return %arg1, %c0_i32, %c0_i32_0 : i32, i32, i32
  }
  func.func @transform_9(%arg0: i32, %arg1: i32, %arg2: memref<2x4xi32, #tpu.memory_space<smem>>) -> (i32, i32, i32) {
    %c0_i32 = arith.constant 0 : i32
    %c0_i32_0 = arith.constant 0 : i32
    %c0_i32_1 = arith.constant 0 : i32
    return %arg1, %c0_i32, %c0_i32_0 : i32, i32, i32
  }
  func.func @transform_10(%arg0: i32, %arg1: i32, %arg2: memref<2x4xi32, #tpu.memory_space<smem>>) -> (i32, i32, i32) {
    %c0_i32 = arith.constant 0 : i32
    %c0_i32_0 = arith.constant 0 : i32
    %c0_i32_1 = arith.constant 0 : i32
    return %arg1, %c0_i32, %c0_i32_0 : i32, i32, i32
  }
  func.func @transform_11(%arg0: i32, %arg1: i32, %arg2: memref<2x4xi32, #tpu.memory_space<smem>>) -> (i32, i32, i32) {
    %c0_i32 = arith.constant 0 : i32
    %c0_i32_0 = arith.constant 0 : i32
    %c0_i32_1 = arith.constant 0 : i32
    return %arg0, %c0_i32, %c0_i32_0 : i32, i32, i32
  }
}

module attributes {stable_mosaic.version = 11 : i64} {
  func.func @_mlp2_kernel(%arg0: i32, %arg1: memref<2x64xf32, #tpu.memory_space<vmem>>, %arg2: memref<64x64xbf16, #tpu.memory_space<vmem>>, %arg3: memref<1x64xf32, #tpu.memory_space<vmem>>, %arg4: memref<64x64xbf16, #tpu.memory_space<vmem>>, %arg5: memref<1x64xf32, #tpu.memory_space<vmem>>, %arg6: memref<2x64xf32, #tpu.memory_space<vmem>>) attributes {dimension_semantics = [#tpu.dimension_semantics<arbitrary>], iteration_bounds = array<i64: 1>, scalar_prefetch = 0 : i64, scratch_operands = 0 : i64, tpu.core_type = #tpu.core_type<tc>, window_params = [{pipeline_mode = #tpu.pipeline_mode<synchronous>, transform_indices = @transform_0, window_bounds = array<i64: 2, 64>}, {pipeline_mode = #tpu.pipeline_mode<synchronous>, transform_indices = @transform_1, window_bounds = array<i64: 64, 64>}, {pipeline_mode = #tpu.pipeline_mode<synchronous>, transform_indices = @transform_2, window_bounds = array<i64: 1, 64>}, {pipeline_mode = #tpu.pipeline_mode<synchronous>, transform_indices = @transform_3, window_bounds = array<i64: 64, 64>}, {pipeline_mode = #tpu.pipeline_mode<synchronous>, transform_indices = @transform_4, window_bounds = array<i64: 1, 64>}, {pipeline_mode = #tpu.pipeline_mode<synchronous>, transform_indices = @transform_5, window_bounds = array<i64: 2, 64>}]} {
    %c0 = arith.constant 0 : index
    %c0_0 = arith.constant 0 : index
    %0 = vector.load %arg1[%c0, %c0_0] : memref<2x64xf32, #tpu.memory_space<vmem>>, vector<2x64xf32>
    %1 = arith.truncf %0 : vector<2x64xf32> to vector<2x64xbf16>
    %c0_1 = arith.constant 0 : index
    %c0_2 = arith.constant 0 : index
    %2 = vector.load %arg2[%c0_1, %c0_2] : memref<64x64xbf16, #tpu.memory_space<vmem>>, vector<64x64xbf16>
    %cst = arith.constant dense<0.000000e+00> : vector<2x64xf32>
    %3 = tpu.matmul %1, %2, %cst {dimension_numbers = #tpu.dot_dimension_numbers<[1], [0], [0], [1], [0, 0, 1, 1], [], []>} : vector<2x64xbf16>, vector<64x64xbf16>, vector<2x64xf32> -> vector<2x64xf32>
    %c0_3 = arith.constant 0 : index
    %c0_4 = arith.constant 0 : index
    %4 = vector.load %arg3[%c0_3, %c0_4] : memref<1x64xf32, #tpu.memory_space<vmem>>, vector<1x64xf32>
    %5 = vector.broadcast %4 : vector<1x64xf32> to vector<2x64xf32>
    %6 = arith.addf %3, %5 : vector<2x64xf32>
    %7 = arith.mulf %6, %6 : vector<2x64xf32>
    %8 = arith.mulf %6, %7 : vector<2x64xf32>
    %cst_5 = arith.constant 4.471500e-02 : f32
    %9 = vector.broadcast %cst_5 : f32 to vector<2x64xf32>
    %10 = arith.mulf %9, %8 : vector<2x64xf32>
    %11 = arith.addf %6, %10 : vector<2x64xf32>
    %cst_6 = arith.constant 0.797884583 : f32
    %12 = vector.broadcast %cst_6 : f32 to vector<2x64xf32>
    %13 = arith.mulf %12, %11 : vector<2x64xf32>
    %14 = math.tanh %13 : vector<2x64xf32>
    %cst_7 = arith.constant 1.000000e+00 : f32
    %15 = vector.broadcast %cst_7 : f32 to vector<2x64xf32>
    %16 = arith.addf %15, %14 : vector<2x64xf32>
    %cst_8 = arith.constant 5.000000e-01 : f32
    %17 = vector.broadcast %cst_8 : f32 to vector<2x64xf32>
    %18 = arith.mulf %17, %16 : vector<2x64xf32>
    %19 = arith.mulf %6, %18 : vector<2x64xf32>
    %20 = arith.truncf %19 : vector<2x64xf32> to vector<2x64xbf16>
    %c0_9 = arith.constant 0 : index
    %c0_10 = arith.constant 0 : index
    %21 = vector.load %arg4[%c0_9, %c0_10] : memref<64x64xbf16, #tpu.memory_space<vmem>>, vector<64x64xbf16>
    %cst_11 = arith.constant dense<0.000000e+00> : vector<2x64xf32>
    %22 = tpu.matmul %20, %21, %cst_11 {dimension_numbers = #tpu.dot_dimension_numbers<[1], [0], [0], [1], [0, 0, 1, 1], [], []>} : vector<2x64xbf16>, vector<64x64xbf16>, vector<2x64xf32> -> vector<2x64xf32>
    %c0_12 = arith.constant 0 : index
    %c0_13 = arith.constant 0 : index
    %23 = vector.load %arg5[%c0_12, %c0_13] : memref<1x64xf32, #tpu.memory_space<vmem>>, vector<1x64xf32>
    %24 = vector.broadcast %23 : vector<1x64xf32> to vector<2x64xf32>
    %25 = arith.addf %22, %24 : vector<2x64xf32>
    %c0_14 = arith.constant 0 : index
    %c0_15 = arith.constant 0 : index
    %26 = vector.load %arg6[%c0_14, %c0_15] : memref<2x64xf32, #tpu.memory_space<vmem>>, vector<2x64xf32>
    tpu.vector_store %arg6[%c0_14, %c0_15], %25 {strides = array<i32>} : memref<2x64xf32, #tpu.memory_space<vmem>>, vector<2x64xf32>,
    return
  }
  func.func @transform_0(%arg0: i32) -> (i32, i32) {
    %c0_i32 = arith.constant 0 : i32
    %c0_i32_0 = arith.constant 0 : i32
    %c0_i32_1 = arith.constant 0 : i32
    return %c0_i32, %c0_i32_0 : i32, i32
  }
  func.func @transform_1(%arg0: i32) -> (i32, i32) {
    %c0_i32 = arith.constant 0 : i32
    %c0_i32_0 = arith.constant 0 : i32
    %c0_i32_1 = arith.constant 0 : i32
    return %c0_i32, %c0_i32_0 : i32, i32
  }
  func.func @transform_2(%arg0: i32) -> (i32, i32) {
    %c0_i32 = arith.constant 0 : i32
    %c0_i32_0 = arith.constant 0 : i32
    %c0_i32_1 = arith.constant 0 : i32
    return %c0_i32, %c0_i32_0 : i32, i32
  }
  func.func @transform_3(%arg0: i32) -> (i32, i32) {
    %c0_i32 = arith.constant 0 : i32
    %c0_i32_0 = arith.constant 0 : i32
    %c0_i32_1 = arith.constant 0 : i32
    return %c0_i32, %c0_i32_0 : i32, i32
  }
  func.func @transform_4(%arg0: i32) -> (i32, i32) {
    %c0_i32 = arith.constant 0 : i32
    %c0_i32_0 = arith.constant 0 : i32
    %c0_i32_1 = arith.constant 0 : i32
    return %c0_i32, %c0_i32_0 : i32, i32
  }
  func.func @transform_5(%arg0: i32) -> (i32, i32) {
    %c0_i32 = arith.constant 0 : i32
    %c0_i32_0 = arith.constant 0 : i32
    %c0_i32_1 = arith.constant 0 : i32
    return %c0_i32, %c0_i32_0 : i32, i32
  }
}

module attributes {stable_mosaic.version = 11 : i64} {
  func.func @_head_kernel(%arg0: i32, %arg1: memref<16x32xbf16, #tpu.memory_space<vmem>>, %arg2: memref<32x512xbf16, #tpu.memory_space<vmem>>, %arg3: memref<1x512xf32, #tpu.memory_space<vmem>>, %arg4: memref<16x512xf32, #tpu.memory_space<vmem>>) attributes {dimension_semantics = [#tpu.dimension_semantics<parallel>], iteration_bounds = array<i64: 1>, scalar_prefetch = 0 : i64, scratch_operands = 0 : i64, tpu.core_type = #tpu.core_type<tc>, window_params = [{pipeline_mode = #tpu.pipeline_mode<synchronous>, transform_indices = @transform_0, window_bounds = array<i64: 16, 32>}, {transform_indices = @transform_1, window_bounds = array<i64: 32, 512>}, {transform_indices = @transform_2, window_bounds = array<i64: 1, 512>}, {transform_indices = @transform_3, window_bounds = array<i64: 16, 512>}]} {
    %c0 = arith.constant 0 : index
    %c0_0 = arith.constant 0 : index
    %0 = vector.load %arg1[%c0, %c0_0] : memref<16x32xbf16, #tpu.memory_space<vmem>>, vector<16x32xbf16>
    %c0_1 = arith.constant 0 : index
    %c0_2 = arith.constant 0 : index
    %1 = vector.load %arg2[%c0_1, %c0_2] : memref<32x512xbf16, #tpu.memory_space<vmem>>, vector<32x512xbf16>
    %cst = arith.constant dense<0.000000e+00> : vector<16x512xf32>
    %2 = tpu.matmul %0, %1, %cst {dimension_numbers = #tpu.dot_dimension_numbers<[1], [0], [0], [1], [0, 0, 1, 1], [], []>} : vector<16x32xbf16>, vector<32x512xbf16>, vector<16x512xf32> -> vector<16x512xf32>
    %c0_3 = arith.constant 0 : index
    %c0_4 = arith.constant 0 : index
    %3 = vector.load %arg3[%c0_3, %c0_4] : memref<1x512xf32, #tpu.memory_space<vmem>>, vector<1x512xf32>
    %4 = vector.broadcast %3 : vector<1x512xf32> to vector<16x512xf32>
    %5 = arith.addf %2, %4 : vector<16x512xf32>
    %c0_5 = arith.constant 0 : index
    %c0_6 = arith.constant 0 : index
    %6 = vector.load %arg4[%c0_5, %c0_6] : memref<16x512xf32, #tpu.memory_space<vmem>>, vector<16x512xf32>
    tpu.vector_store %arg4[%c0_5, %c0_6], %5 {strides = array<i32>} : memref<16x512xf32, #tpu.memory_space<vmem>>, vector<16x512xf32>,
    return
  }
  func.func @transform_0(%arg0: i32) -> (i32, i32) {
    %c0_i32 = arith.constant 0 : i32
    %c0_i32_0 = arith.constant 0 : i32
    %c0_i32_1 = arith.constant 0 : i32
    return %c0_i32, %c0_i32_0 : i32, i32
  }
  func.func @transform_1(%arg0: i32) -> (i32, i32) {
    %c0_i32 = arith.constant 0 : i32
    %c0_i32_0 = arith.constant 0 : i32
    return %c0_i32, %arg0 : i32, i32
  }
  func.func @transform_2(%arg0: i32) -> (i32, i32) {
    %c0_i32 = arith.constant 0 : i32
    %c0_i32_0 = arith.constant 0 : i32
    return %c0_i32, %arg0 : i32, i32
  }
  func.func @transform_3(%arg0: i32) -> (i32, i32) {
    %c0_i32 = arith.constant 0 : i32
    %c0_i32_0 = arith.constant 0 : i32
    return %c0_i32, %arg0 : i32, i32
  }
}

module attributes {stable_mosaic.version = 11 : i64} {
  func.func @_dec_stack_kernel(%arg0: i32, %arg1: i32, %arg2: memref<2xi32, #tpu.memory_space<smem>>, %arg3: memref<1x8x32xf32, #tpu.memory_space<vmem>>, %arg4: memref<1x8x32xf32, #tpu.memory_space<vmem>>, %arg5: memref<1x1x8xf32, #tpu.memory_space<vmem>>, %arg6: memref<1x4x32xf32, #tpu.memory_space<vmem>>, %arg7: memref<1x32x96xbf16, #tpu.memory_space<vmem>>, %arg8: memref<1x1x96xf32, #tpu.memory_space<vmem>>, %arg9: memref<1x32x32xbf16, #tpu.memory_space<vmem>>, %arg10: memref<1x1x32xf32, #tpu.memory_space<vmem>>, %arg11: memref<1x32x64xbf16, #tpu.memory_space<vmem>>, %arg12: memref<1x1x64xf32, #tpu.memory_space<vmem>>, %arg13: memref<1x64x32xbf16, #tpu.memory_space<vmem>>, %arg14: memref<1x1x32xf32, #tpu.memory_space<vmem>>, %arg15: memref<2x32xf32, #tpu.memory_space<vmem>>, %arg16: memref<1x8x32xbf16, #tpu.memory_space<vmem>>, %arg17: memref<8x32xf32, #tpu.memory_space<vmem>>, %arg18: memref<8x32xf32, #tpu.memory_space<vmem>>) attributes {dimension_semantics = [#tpu.dimension_semantics<parallel>, #tpu.dimension_semantics<arbitrary>], iteration_bounds = array<i64: 2, 2>, scalar_prefetch = 1 : i64, scratch_operands = 2 : i64, tpu.core_type = #tpu.core_type<tc>, window_params = [{transform_indices = @transform_0, window_bounds = array<i64: 1, 8, 32>}, {transform_indices = @transform_1, window_bounds = array<i64: 1, 8, 32>}, {transform_indices = @transform_2, window_bounds = array<i64: 1, 1, 8>}, {transform_indices = @transform_3, window_bounds = array<i64: 1, 4, 32>}, {transform_indices = @transform_4, window_bounds = array<i64: 1, 32, 96>}, {transform_indices = @transform_5, window_bounds = array<i64: 1, 1, 96>}, {transform_indices = @transform_6, window_bounds = array<i64: 1, 32, 32>}, {transform_indices = @transform_7, window_bounds = array<i64: 1, 1, 32>}, {transform_indices = @transform_8, window_bounds = array<i64: 1, 32, 64>}, {transform_indices = @transform_9, window_bounds = array<i64: 1, 1, 64>}, {transform_indices = @transform_10, window_bounds = array<i64: 1, 64, 32>}, {transform_indices = @transform_11, window_bounds = array<i64: 1, 1, 32>}, {pipeline_mode = #tpu.pipeline_mode<synchronous>, transform_indices = @transform_12, window_bounds = array<i64: 2, 32>}, {transform_indices = @transform_13, window_bounds = array<i64: 1, 8, 32>}]} {
    %c0_i32 = arith.constant 0 : i32
    %0 = arith.cmpi eq, %arg1, %c0_i32 : i32
    %1 = arith.extui %0 : i1 to i32
    %c0_i32_0 = arith.constant 0 : i32
    %2 = arith.cmpi ne, %1, %c0_i32_0 : i32
    scf.if %2 {
      %c0_81 = arith.constant 0 : index
      %c0_82 = arith.constant 0 : index
      %c0_83 = arith.constant 0 : index
      %190 = vector.load %arg3[%c0_81, %c0_82, %c0_83] : memref<1x8x32xf32, #tpu.memory_space<vmem>>, vector<1x8x32xf32>
      %191 = vector.shape_cast %190 : vector<1x8x32xf32> to vector<8x32xf32>
      %c0_84 = arith.constant 0 : index
      %c0_85 = arith.constant 0 : index
      %192 = vector.load %arg17[%c0_84, %c0_85] : memref<8x32xf32, #tpu.memory_space<vmem>>, vector<8x32xf32>
      tpu.vector_store %arg17[%c0_84, %c0_85], %191 {strides = array<i32>} : memref<8x32xf32, #tpu.memory_space<vmem>>, vector<8x32xf32>,
    } else {
    }
    %3 = arith.index_cast %arg1 : i32 to index
    %4 = memref.load %arg2[%3] : memref<2xi32, #tpu.memory_space<smem>>
    %c0 = arith.constant 0 : index
    %c0_1 = arith.constant 0 : index
    %5 = vector.load %arg17[%c0, %c0_1] : memref<8x32xf32, #tpu.memory_space<vmem>>, vector<8x32xf32>
    %c0_2 = arith.constant 0 : index
    %c0_3 = arith.constant 0 : index
    %c0_4 = arith.constant 0 : index
    %6 = vector.load %arg4[%c0_2, %c0_3, %c0_4] : memref<1x8x32xf32, #tpu.memory_space<vmem>>, vector<1x8x32xf32>
    %7 = vector.shape_cast %6 : vector<1x8x32xf32> to vector<8x32xf32>
    %c0_5 = arith.constant 0 : index
    %c0_6 = arith.constant 0 : index
    %c0_7 = arith.constant 0 : index
    %8 = vector.load %arg6[%c0_5, %c0_6, %c0_7] : memref<1x4x32xf32, #tpu.memory_space<vmem>>, vector<1x4x32xf32>
    %9 = vector.shape_cast %8 : vector<1x4x32xf32> to vector<4x32xf32>
    %10 = vector.extract_strided_slice %9 {offsets = [0, 0], sizes = [1, 32], strides = [1, 1]} : vector<4x32xf32> to vector<1x32xf32>
    %11 = vector.extract_strided_slice %9 {offsets = [1, 0], sizes = [1, 32], strides = [1, 1]} : vector<4x32xf32> to vector<1x32xf32>
    %cst = arith.constant dense<0.000000e+00> : vector<8xf32>
    %12 = vector.multi_reduction <add>, %5, %cst [1] : vector<8x32xf32> to vector<8xf32>
    %13 = vector.shape_cast %12 : vector<8xf32> to vector<8x1xf32>
    %cst_8 = arith.constant 3.200000e+01 : f32
    %14 = vector.broadcast %cst_8 : f32 to vector<8x1xf32>
    %15 = arith.divf %13, %14 : vector<8x1xf32>
    %16 = vector.broadcast %15 : vector<8x1xf32> to vector<8x32xf32>
    %17 = arith.subf %5, %16 : vector<8x32xf32>
    %18 = arith.mulf %17, %17 : vector<8x32xf32>
    %cst_9 = arith.constant dense<0.000000e+00> : vector<8xf32>
    %19 = vector.multi_reduction <add>, %18, %cst_9 [1] : vector<8x32xf32> to vector<8xf32>
    %20 = vector.shape_cast %19 : vector<8xf32> to vector<8x1xf32>
    %cst_10 = arith.constant 3.200000e+01 : f32
    %21 = vector.broadcast %cst_10 : f32 to vector<8x1xf32>
    %22 = arith.divf %20, %21 : vector<8x1xf32>
    %23 = vector.broadcast %15 : vector<8x1xf32> to vector<8x32xf32>
    %24 = arith.subf %5, %23 : vector<8x32xf32>
    %cst_11 = arith.constant 9.99999974E-6 : f32
    %25 = vector.broadcast %cst_11 : f32 to vector<8x1xf32>
    %26 = arith.addf %22, %25 : vector<8x1xf32>
    %27 = math.rsqrt %26 : vector<8x1xf32>
    %28 = vector.broadcast %27 : vector<8x1xf32> to vector<8x32xf32>
    %29 = arith.mulf %24, %28 : vector<8x32xf32>
    %30 = vector.broadcast %10 : vector<1x32xf32> to vector<8x32xf32>
    %31 = arith.mulf %29, %30 : vector<8x32xf32>
    %32 = vector.broadcast %11 : vector<1x32xf32> to vector<8x32xf32>
    %33 = arith.addf %31, %32 : vector<8x32xf32>
    %34 = arith.truncf %33 : vector<8x32xf32> to vector<8x32xbf16>
    %c0_12 = arith.constant 0 : index
    %c0_13 = arith.constant 0 : index
    %c0_14 = arith.constant 0 : index
    %35 = vector.load %arg7[%c0_12, %c0_13, %c0_14] : memref<1x32x96xbf16, #tpu.memory_space<vmem>>, vector<1x32x96xbf16>
    %36 = vector.shape_cast %35 : vector<1x32x96xbf16> to vector<32x96xbf16>
    %cst_15 = arith.constant dense<0.000000e+00> : vector<8x96xf32>
    %37 = tpu.matmul %34, %36, %cst_15 {dimension_numbers = #tpu.dot_dimension_numbers<[1], [0], [0], [1], [0, 0, 1, 1], [], []>} : vector<8x32xbf16>, vector<32x96xbf16>, vector<8x96xf32> -> vector<8x96xf32>
    %c0_16 = arith.constant 0 : index
    %c0_17 = arith.constant 0 : index
    %c0_18 = arith.constant 0 : index
    %38 = vector.load %arg8[%c0_16, %c0_17, %c0_18] : memref<1x1x96xf32, #tpu.memory_space<vmem>>, vector<1x1x96xf32>
    %39 = vector.shape_cast %38 : vector<1x1x96xf32> to vector<1x96xf32>
    %40 = vector.broadcast %39 : vector<1x96xf32> to vector<8x96xf32>
    %41 = arith.addf %37, %40 : vector<8x96xf32>
    %42 = arith.truncf %7 : vector<8x32xf32> to vector<8x32xbf16>
    %c0_19 = arith.constant 0 : index
    %c0_20 = arith.constant 0 : index
    %c0_21 = arith.constant 0 : index
    %43 = vector.load %arg7[%c0_19, %c0_20, %c0_21] : memref<1x32x96xbf16, #tpu.memory_space<vmem>>, vector<1x32x96xbf16>
    %44 = vector.shape_cast %43 : vector<1x32x96xbf16> to vector<32x96xbf16>
    %cst_22 = arith.constant dense<0.000000e+00> : vector<8x96xf32>
    %45 = tpu.matmul %42, %44, %cst_22 {dimension_numbers = #tpu.dot_dimension_numbers<[1], [0], [0], [1], [0, 0, 1, 1], [], []>} : vector<8x32xbf16>, vector<32x96xbf16>, vector<8x96xf32> -> vector<8x96xf32>
    %c0_23 = arith.constant 0 : index
    %c0_24 = arith.constant 0 : index
    %c0_25 = arith.constant 0 : index
    %46 = vector.load %arg8[%c0_23, %c0_24, %c0_25] : memref<1x1x96xf32, #tpu.memory_space<vmem>>, vector<1x1x96xf32>
    %47 = vector.shape_cast %46 : vector<1x1x96xf32> to vector<1x96xf32>
    %48 = vector.broadcast %47 : vector<1x96xf32> to vector<8x96xf32>
    %49 = arith.addf %45, %48 : vector<8x96xf32>
    %50 = vector.extract_strided_slice %41 {offsets = [0, 0], sizes = [8, 32], strides = [1, 1]} : vector<8x96xf32> to vector<8x32xf32>
    %51 = vector.extract_strided_slice %49 {offsets = [0, 32], sizes = [8, 32], strides = [1, 1]} : vector<8x96xf32> to vector<8x32xf32>
    %52 = vector.extract_strided_slice %41 {offsets = [0, 32], sizes = [8, 32], strides = [1, 1]} : vector<8x96xf32> to vector<8x32xf32>
    %53 = tpu.concatenate %51, %52 in 0 : vector<8x32xf32>, vector<8x32xf32> -> vector<16x32xf32>
    %54 = vector.extract_strided_slice %49 {offsets = [0, 64], sizes = [8, 32], strides = [1, 1]} : vector<8x96xf32> to vector<8x32xf32>
    %55 = vector.extract_strided_slice %41 {offsets = [0, 64], sizes = [8, 32], strides = [1, 1]} : vector<8x96xf32> to vector<8x32xf32>
    %56 = tpu.concatenate %54, %55 in 0 : vector<8x32xf32>, vector<8x32xf32> -> vector<16x32xf32>
    %57 = tpu.iota {dimensions = array<i32: 1>} : vector<8x8xi32>
    %58 = vector.broadcast %4 : i32 to vector<8x8xi32>
    %59 = arith.cmpi slt, %57, %58 : vector<8x8xi32>
    %cst_26 = arith.constant 0.000000e+00 : f32
    %cst_27 = arith.constant -1.000000e+09 : f32
    %60 = vector.broadcast %cst_26 : f32 to vector<8x8xf32>
    %61 = vector.broadcast %cst_27 : f32 to vector<8x8xf32>
    %62 = arith.select %59, %60, %61 : vector<8x8xi1>, vector<8x8xf32>
    %63 = tpu.iota {dimensions = array<i32: 0>} : vector<8x8xi32>
    %64 = tpu.iota {dimensions = array<i32: 1>} : vector<8x8xi32>
    %65 = arith.cmpi sle, %64, %63 : vector<8x8xi32>
    %cst_28 = arith.constant 0.000000e+00 : f32
    %cst_29 = arith.constant -1.000000e+09 : f32
    %66 = vector.broadcast %cst_28 : f32 to vector<8x8xf32>
    %67 = vector.broadcast %cst_29 : f32 to vector<8x8xf32>
    %68 = arith.select %65, %66, %67 : vector<8x8xi1>, vector<8x8xf32>
    %c0_30 = arith.constant 0 : index
    %c0_31 = arith.constant 0 : index
    %c0_32 = arith.constant 0 : index
    %69 = vector.load %arg5[%c0_30, %c0_31, %c0_32] : memref<1x1x8xf32, #tpu.memory_space<vmem>>, vector<1x1x8xf32>
    %70 = vector.shape_cast %69 : vector<1x1x8xf32> to vector<1x8xf32>
    %71 = vector.broadcast %70 : vector<1x8xf32> to vector<8x8xf32>
    %72 = arith.addf %68, %71 : vector<8x8xf32>
    %73 = tpu.concatenate %62, %72 in 1 : vector<8x8xf32>, vector<8x8xf32> -> vector<8x16xf32>
    %74 = vector.extract_strided_slice %50 {offsets = [0, 0], sizes = [8, 16], strides = [1, 1]} : vector<8x32xf32> to vector<8x16xf32>
    %75 = arith.truncf %74 : vector<8x16xf32> to vector<8x16xbf16>
    %76 = vector.extract_strided_slice %53 {offsets = [0, 0], sizes = [16, 16], strides = [1, 1]} : vector<16x32xf32> to vector<16x16xf32>
    %77 = arith.truncf %76 : vector<16x16xf32> to vector<16x16xbf16>
    %78 = tpu.transpose %77, [1, 0] : vector<16x16xbf16> -> vector<16x16xbf16>
    %cst_33 = arith.constant dense<0.000000e+00> : vector<8x16xf32>
    %79 = tpu.matmul %75, %78, %cst_33 {dimension_numbers = #tpu.dot_dimension_numbers<[1], [0], [0], [1], [0, 0, 1, 1], [], []>} : vector<8x16xbf16>, vector<16x16xbf16>, vector<8x16xf32> -> vector<8x16xf32>
    %cst_34 = arith.constant 2.500000e-01 : f32
    %80 = vector.broadcast %cst_34 : f32 to vector<8x16xf32>
    %81 = arith.mulf %79, %80 : vector<8x16xf32>
    %82 = arith.addf %81, %73 : vector<8x16xf32>
    %cst_35 = arith.constant dense<0xFF800000> : vector<8xf32>
    %83 = vector.multi_reduction <maximumf>, %82, %cst_35 [1] : vector<8x16xf32> to vector<8xf32>
    %84 = vector.shape_cast %83 : vector<8xf32> to vector<8x1xf32>
    %85 = vector.broadcast %84 : vector<8x1xf32> to vector<8x16xf32>
    %86 = arith.subf %82, %85 : vector<8x16xf32>
    %87 = math.exp %86 : vector<8x16xf32>
    %cst_36 = arith.constant dense<0.000000e+00> : vector<8xf32>
    %88 = vector.multi_reduction <add>, %87, %cst_36 [1] : vector<8x16xf32> to vector<8xf32>
    %89 = vector.shape_cast %88 : vector<8xf32> to vector<8x1xf32>
    %90 = tpu.reciprocal %89 {approx = true} : vector<8x1xf32> -> vector<8x1xf32>
    %91 = vector.broadcast %90 : vector<8x1xf32> to vector<8x16xf32>
    %92 = arith.mulf %87, %91 : vector<8x16xf32>
    %93 = arith.truncf %92 : vector<8x16xf32> to vector<8x16xbf16>
    %94 = vector.extract_strided_slice %56 {offsets = [0, 0], sizes = [16, 16], strides = [1, 1]} : vector<16x32xf32> to vector<16x16xf32>
    %95 = arith.truncf %94 : vector<16x16xf32> to vector<16x16xbf16>
    %cst_37 = arith.constant dense<0.000000e+00> : vector<8x16xf32>
    %96 = tpu.matmul %93, %95, %cst_37 {dimension_numbers = #tpu.dot_dimension_numbers<[1], [0], [0], [1], [0, 0, 1, 1], [], []>} : vector<8x16xbf16>, vector<16x16xbf16>, vector<8x16xf32> -> vector<8x16xf32>
    %c0_38 = arith.constant 0 : index
    %c0_39 = arith.constant 0 : index
    %97 = vector.load %arg18[%c0_38, %c0_39] : memref<8x32xf32, #tpu.memory_space<vmem>>, vector<8x16xf32>
    tpu.vector_store %arg18[%c0_38, %c0_39], %96 {strides = array<i32>} : memref<8x32xf32, #tpu.memory_space<vmem>>, vector<8x16xf32>,
    %98 = vector.extract_strided_slice %50 {offsets = [0, 16], sizes = [8, 16], strides = [1, 1]} : vector<8x32xf32> to vector<8x16xf32>
    %99 = arith.truncf %98 : vector<8x16xf32> to vector<8x16xbf16>
    %100 = vector.extract_strided_slice %53 {offsets = [0, 16], sizes = [16, 16], strides = [1, 1]} : vector<16x32xf32> to vector<16x16xf32>
    %101 = arith.truncf %100 : vector<16x16xf32> to vector<16x16xbf16>
    %102 = tpu.transpose %101, [1, 0] : vector<16x16xbf16> -> vector<16x16xbf16>
    %cst_40 = arith.constant dense<0.000000e+00> : vector<8x16xf32>
    %103 = tpu.matmul %99, %102, %cst_40 {dimension_numbers = #tpu.dot_dimension_numbers<[1], [0], [0], [1], [0, 0, 1, 1], [], []>} : vector<8x16xbf16>, vector<16x16xbf16>, vector<8x16xf32> -> vector<8x16xf32>
    %cst_41 = arith.constant 2.500000e-01 : f32
    %104 = vector.broadcast %cst_41 : f32 to vector<8x16xf32>
    %105 = arith.mulf %103, %104 : vector<8x16xf32>
    %106 = arith.addf %105, %73 : vector<8x16xf32>
    %cst_42 = arith.constant dense<0xFF800000> : vector<8xf32>
    %107 = vector.multi_reduction <maximumf>, %106, %cst_42 [1] : vector<8x16xf32> to vector<8xf32>
    %108 = vector.shape_cast %107 : vector<8xf32> to vector<8x1xf32>
    %109 = vector.broadcast %108 : vector<8x1xf32> to vector<8x16xf32>
    %110 = arith.subf %106, %109 : vector<8x16xf32>
    %111 = math.exp %110 : vector<8x16xf32>
    %cst_43 = arith.constant dense<0.000000e+00> : vector<8xf32>
    %112 = vector.multi_reduction <add>, %111, %cst_43 [1] : vector<8x16xf32> to vector<8xf32>
    %113 = vector.shape_cast %112 : vector<8xf32> to vector<8x1xf32>
    %114 = tpu.reciprocal %113 {approx = true} : vector<8x1xf32> -> vector<8x1xf32>
    %115 = vector.broadcast %114 : vector<8x1xf32> to vector<8x16xf32>
    %116 = arith.mulf %111, %115 : vector<8x16xf32>
    %117 = arith.truncf %116 : vector<8x16xf32> to vector<8x16xbf16>
    %118 = vector.extract_strided_slice %56 {offsets = [0, 16], sizes = [16, 16], strides = [1, 1]} : vector<16x32xf32> to vector<16x16xf32>
    %119 = arith.truncf %118 : vector<16x16xf32> to vector<16x16xbf16>
    %cst_44 = arith.constant dense<0.000000e+00> : vector<8x16xf32>
    %120 = tpu.matmul %117, %119, %cst_44 {dimension_numbers = #tpu.dot_dimension_numbers<[1], [0], [0], [1], [0, 0, 1, 1], [], []>} : vector<8x16xbf16>, vector<16x16xbf16>, vector<8x16xf32> -> vector<8x16xf32>
    %c0_45 = arith.constant 0 : index
    %c16 = arith.constant 16 : index
    %121 = vector.load %arg18[%c0_45, %c16] : memref<8x32xf32, #tpu.memory_space<vmem>>, vector<8x16xf32>
    tpu.vector_store %arg18[%c0_45, %c16], %120 {strides = array<i32>} : memref<8x32xf32, #tpu.memory_space<vmem>>, vector<8x16xf32>,
    %c0_46 = arith.constant 0 : index
    %c0_47 = arith.constant 0 : index
    %122 = vector.load %arg18[%c0_46, %c0_47] : memref<8x32xf32, #tpu.memory_space<vmem>>, vector<8x32xf32>
    %123 = arith.truncf %122 : vector<8x32xf32> to vector<8x32xbf16>
    %c0_48 = arith.constant 0 : index
    %c0_49 = arith.constant 0 : index
    %c0_50 = arith.constant 0 : index
    %124 = vector.load %arg9[%c0_48, %c0_49, %c0_50] : memref<1x32x32xbf16, #tpu.memory_space<vmem>>, vector<1x32x32xbf16>
    %125 = vector.shape_cast %124 : vector<1x32x32xbf16> to vector<32x32xbf16>
    %cst_51 = arith.constant dense<0.000000e+00> : vector<8x32xf32>
    %126 = tpu.matmul %123, %125, %cst_51 {dimension_numbers = #tpu.dot_dimension_numbers<[1], [0], [0], [1], [0, 0, 1, 1], [], []>} : vector<8x32xbf16>, vector<32x32xbf16>, vector<8x32xf32> -> vector<8x32xf32>
    %c0_52 = arith.constant 0 : index
    %c0_53 = arith.constant 0 : index
    %c0_54 = arith.constant 0 : index
    %127 = vector.load %arg10[%c0_52, %c0_53, %c0_54] : memref<1x1x32xf32, #tpu.memory_space<vmem>>, vector<1x1x32xf32>
    %128 = vector.shape_cast %127 : vector<1x1x32xf32> to vector<1x32xf32>
    %129 = vector.broadcast %128 : vector<1x32xf32> to vector<8x32xf32>
    %130 = arith.addf %126, %129 : vector<8x32xf32>
    %131 = arith.addf %5, %130 : vector<8x32xf32>
    %132 = vector.extract_strided_slice %9 {offsets = [2, 0], sizes = [1, 32], strides = [1, 1]} : vector<4x32xf32> to vector<1x32xf32>
    %133 = vector.extract_strided_slice %9 {offsets = [3, 0], sizes = [1, 32], strides = [1, 1]} : vector<4x32xf32> to vector<1x32xf32>
    %cst_55 = arith.constant dense<0.000000e+00> : vector<8xf32>
    %134 = vector.multi_reduction <add>, %131, %cst_55 [1] : vector<8x32xf32> to vector<8xf32>
    %135 = vector.shape_cast %134 : vector<8xf32> to vector<8x1xf32>
    %cst_56 = arith.constant 3.200000e+01 : f32
    %136 = vector.broadcast %cst_56 : f32 to vector<8x1xf32>
    %137 = arith.divf %135, %136 : vector<8x1xf32>
    %138 = vector.broadcast %137 : vector<8x1xf32> to vector<8x32xf32>
    %139 = arith.subf %131, %138 : vector<8x32xf32>
    %140 = arith.mulf %139, %139 : vector<8x32xf32>
    %cst_57 = arith.constant dense<0.000000e+00> : vector<8xf32>
    %141 = vector.multi_reduction <add>, %140, %cst_57 [1] : vector<8x32xf32> to vector<8xf32>
    %142 = vector.shape_cast %141 : vector<8xf32> to vector<8x1xf32>
    %cst_58 = arith.constant 3.200000e+01 : f32
    %143 = vector.broadcast %cst_58 : f32 to vector<8x1xf32>
    %144 = arith.divf %142, %143 : vector<8x1xf32>
    %145 = vector.broadcast %137 : vector<8x1xf32> to vector<8x32xf32>
    %146 = arith.subf %131, %145 : vector<8x32xf32>
    %cst_59 = arith.constant 9.99999974E-6 : f32
    %147 = vector.broadcast %cst_59 : f32 to vector<8x1xf32>
    %148 = arith.addf %144, %147 : vector<8x1xf32>
    %149 = math.rsqrt %148 : vector<8x1xf32>
    %150 = vector.broadcast %149 : vector<8x1xf32> to vector<8x32xf32>
    %151 = arith.mulf %146, %150 : vector<8x32xf32>
    %152 = vector.broadcast %132 : vector<1x32xf32> to vector<8x32xf32>
    %153 = arith.mulf %151, %152 : vector<8x32xf32>
    %154 = vector.broadcast %133 : vector<1x32xf32> to vector<8x32xf32>
    %155 = arith.addf %153, %154 : vector<8x32xf32>
    %156 = arith.truncf %155 : vector<8x32xf32> to vector<8x32xbf16>
    %c0_60 = arith.constant 0 : index
    %c0_61 = arith.constant 0 : index
    %c0_62 = arith.constant 0 : index
    %157 = vector.load %arg11[%c0_60, %c0_61, %c0_62] : memref<1x32x64xbf16, #tpu.memory_space<vmem>>, vector<1x32x64xbf16>
    %158 = vector.shape_cast %157 : vector<1x32x64xbf16> to vector<32x64xbf16>
    %cst_63 = arith.constant dense<0.000000e+00> : vector<8x64xf32>
    %159 = tpu.matmul %156, %158, %cst_63 {dimension_numbers = #tpu.dot_dimension_numbers<[1], [0], [0], [1], [0, 0, 1, 1], [], []>} : vector<8x32xbf16>, vector<32x64xbf16>, vector<8x64xf32> -> vector<8x64xf32>
    %c0_64 = arith.constant 0 : index
    %c0_65 = arith.constant 0 : index
    %c0_66 = arith.constant 0 : index
    %160 = vector.load %arg12[%c0_64, %c0_65, %c0_66] : memref<1x1x64xf32, #tpu.memory_space<vmem>>, vector<1x1x64xf32>
    %161 = vector.shape_cast %160 : vector<1x1x64xf32> to vector<1x64xf32>
    %162 = vector.broadcast %161 : vector<1x64xf32> to vector<8x64xf32>
    %163 = arith.addf %159, %162 : vector<8x64xf32>
    %164 = arith.mulf %163, %163 : vector<8x64xf32>
    %165 = arith.mulf %163, %164 : vector<8x64xf32>
    %cst_67 = arith.constant 4.471500e-02 : f32
    %166 = vector.broadcast %cst_67 : f32 to vector<8x64xf32>
    %167 = arith.mulf %166, %165 : vector<8x64xf32>
    %168 = arith.addf %163, %167 : vector<8x64xf32>
    %cst_68 = arith.constant 0.797884583 : f32
    %169 = vector.broadcast %cst_68 : f32 to vector<8x64xf32>
    %170 = arith.mulf %169, %168 : vector<8x64xf32>
    %171 = math.tanh %170 : vector<8x64xf32>
    %cst_69 = arith.constant 1.000000e+00 : f32
    %172 = vector.broadcast %cst_69 : f32 to vector<8x64xf32>
    %173 = arith.addf %172, %171 : vector<8x64xf32>
    %cst_70 = arith.constant 5.000000e-01 : f32
    %174 = vector.broadcast %cst_70 : f32 to vector<8x64xf32>
    %175 = arith.mulf %174, %173 : vector<8x64xf32>
    %176 = arith.mulf %163, %175 : vector<8x64xf32>
    %177 = arith.truncf %176 : vector<8x64xf32> to vector<8x64xbf16>
    %c0_71 = arith.constant 0 : index
    %c0_72 = arith.constant 0 : index
    %c0_73 = arith.constant 0 : index
    %178 = vector.load %arg13[%c0_71, %c0_72, %c0_73] : memref<1x64x32xbf16, #tpu.memory_space<vmem>>, vector<1x64x32xbf16>
    %179 = vector.shape_cast %178 : vector<1x64x32xbf16> to vector<64x32xbf16>
    %cst_74 = arith.constant dense<0.000000e+00> : vector<8x32xf32>
    %180 = tpu.matmul %177, %179, %cst_74 {dimension_numbers = #tpu.dot_dimension_numbers<[1], [0], [0], [1], [0, 0, 1, 1], [], []>} : vector<8x64xbf16>, vector<64x32xbf16>, vector<8x32xf32> -> vector<8x32xf32>
    %c0_75 = arith.constant 0 : index
    %c0_76 = arith.constant 0 : index
    %c0_77 = arith.constant 0 : index
    %181 = vector.load %arg14[%c0_75, %c0_76, %c0_77] : memref<1x1x32xf32, #tpu.memory_space<vmem>>, vector<1x1x32xf32>
    %182 = vector.shape_cast %181 : vector<1x1x32xf32> to vector<1x32xf32>
    %183 = vector.broadcast %182 : vector<1x32xf32> to vector<8x32xf32>
    %184 = arith.addf %180, %183 : vector<8x32xf32>
    %185 = arith.addf %131, %184 : vector<8x32xf32>
    %c0_78 = arith.constant 0 : index
    %c0_79 = arith.constant 0 : index
    %186 = vector.load %arg17[%c0_78, %c0_79] : memref<8x32xf32, #tpu.memory_space<vmem>>, vector<8x32xf32>
    tpu.vector_store %arg17[%c0_78, %c0_79], %185 {strides = array<i32>} : memref<8x32xf32, #tpu.memory_space<vmem>>, vector<8x32xf32>,
    %c1_i32 = arith.constant 1 : i32
    %187 = arith.cmpi eq, %arg1, %c1_i32 : i32
    %188 = arith.extui %187 : i1 to i32
    %c0_i32_80 = arith.constant 0 : i32
    %189 = arith.cmpi ne, %188, %c0_i32_80 : i32
    scf.if %189 {
      %c0_81 = arith.constant 0 : index
      %c0_82 = arith.constant 0 : index
      %190 = vector.load %arg17[%c0_81, %c0_82] : memref<8x32xf32, #tpu.memory_space<vmem>>, vector<8x32xf32>
      %c0_83 = arith.constant 0 : index
      %c0_84 = arith.constant 0 : index
      %191 = vector.load %arg15[%c0_83, %c0_84] : memref<2x32xf32, #tpu.memory_space<vmem>>, vector<1x32xf32>
      %c1 = arith.constant 1 : index
      %c0_85 = arith.constant 0 : index
      %192 = vector.load %arg15[%c1, %c0_85] : memref<2x32xf32, #tpu.memory_space<vmem>>, vector<1x32xf32>
      %cst_86 = arith.constant dense<0.000000e+00> : vector<8xf32>
      %193 = vector.multi_reduction <add>, %190, %cst_86 [1] : vector<8x32xf32> to vector<8xf32>
      %194 = vector.shape_cast %193 : vector<8xf32> to vector<8x1xf32>
      %cst_87 = arith.constant 3.200000e+01 : f32
      %195 = vector.broadcast %cst_87 : f32 to vector<8x1xf32>
      %196 = arith.divf %194, %195 : vector<8x1xf32>
      %197 = vector.broadcast %196 : vector<8x1xf32> to vector<8x32xf32>
      %198 = arith.subf %190, %197 : vector<8x32xf32>
      %199 = arith.mulf %198, %198 : vector<8x32xf32>
      %cst_88 = arith.constant dense<0.000000e+00> : vector<8xf32>
      %200 = vector.multi_reduction <add>, %199, %cst_88 [1] : vector<8x32xf32> to vector<8xf32>
      %201 = vector.shape_cast %200 : vector<8xf32> to vector<8x1xf32>
      %cst_89 = arith.constant 3.200000e+01 : f32
      %202 = vector.broadcast %cst_89 : f32 to vector<8x1xf32>
      %203 = arith.divf %201, %202 : vector<8x1xf32>
      %204 = vector.broadcast %196 : vector<8x1xf32> to vector<8x32xf32>
      %205 = arith.subf %190, %204 : vector<8x32xf32>
      %cst_90 = arith.constant 9.99999974E-6 : f32
      %206 = vector.broadcast %cst_90 : f32 to vector<8x1xf32>
      %207 = arith.addf %203, %206 : vector<8x1xf32>
      %208 = math.rsqrt %207 : vector<8x1xf32>
      %209 = vector.broadcast %208 : vector<8x1xf32> to vector<8x32xf32>
      %210 = arith.mulf %205, %209 : vector<8x32xf32>
      %211 = vector.broadcast %191 : vector<1x32xf32> to vector<8x32xf32>
      %212 = arith.mulf %210, %211 : vector<8x32xf32>
      %213 = vector.broadcast %192 : vector<1x32xf32> to vector<8x32xf32>
      %214 = arith.addf %212, %213 : vector<8x32xf32>
      %215 = arith.truncf %214 : vector<8x32xf32> to vector<8x32xbf16>
      %c0_91 = arith.constant 0 : index
      %c0_92 = arith.constant 0 : index
      %c0_93 = arith.constant 0 : index
      %216 = vector.load %arg16[%c0_91, %c0_92, %c0_93] : memref<1x8x32xbf16, #tpu.memory_space<vmem>>, vector<1x8x32xbf16>
      %217 = vector.shape_cast %216 : vector<1x8x32xbf16> to vector<8x32xbf16>
      %218 = vector.shape_cast %215 : vector<8x32xbf16> to vector<1x8x32xbf16>
      tpu.vector_store %arg16[%c0_91, %c0_92, %c0_93], %218 {strides = array<i32>} : memref<1x8x32xbf16, #tpu.memory_space<vmem>>, vector<1x8x32xbf16>,
    } else {
    }
    return
  }
  func.func @transform_0(%arg0: i32, %arg1: i32, %arg2: memref<2xi32, #tpu.memory_space<smem>>) -> (i32, i32, i32) {
    %c0_i32 = arith.constant 0 : i32
    %c0_i32_0 = arith.constant 0 : i32
    %c0_i32_1 = arith.constant 0 : i32
    return %arg0, %c0_i32, %c0_i32_0 : i32, i32, i32
  }
  func.func @transform_1(%arg0: i32, %arg1: i32, %arg2: memref<2xi32, #tpu.memory_space<smem>>) -> (i32, i32, i32) {
    %c2_i32 = arith.constant 2 : i32
    %0 = arith.muli %arg0, %c2_i32 : i32
    %1 = arith.addi %0, %arg1 : i32
    %c0_i32 = arith.constant 0 : i32
    %c0_i32_0 = arith.constant 0 : i32
    %c0_i32_1 = arith.constant 0 : i32
    return %1, %c0_i32, %c0_i32_0 : i32, i32, i32
  }
  func.func @transform_2(%arg0: i32, %arg1: i32, %arg2: memref<2xi32, #tpu.memory_space<smem>>) -> (i32, i32, i32) {
    %c0_i32 = arith.constant 0 : i32
    %c0_i32_0 = arith.constant 0 : i32
    %c0_i32_1 = arith.constant 0 : i32
    return %arg0, %c0_i32, %c0_i32_0 : i32, i32, i32
  }
  func.func @transform_3(%arg0: i32, %arg1: i32, %arg2: memref<2xi32, #tpu.memory_space<smem>>) -> (i32, i32, i32) {
    %c0_i32 = arith.constant 0 : i32
    %c0_i32_0 = arith.constant 0 : i32
    %c0_i32_1 = arith.constant 0 : i32
    return %arg1, %c0_i32, %c0_i32_0 : i32, i32, i32
  }
  func.func @transform_4(%arg0: i32, %arg1: i32, %arg2: memref<2xi32, #tpu.memory_space<smem>>) -> (i32, i32, i32) {
    %c0_i32 = arith.constant 0 : i32
    %c0_i32_0 = arith.constant 0 : i32
    %c0_i32_1 = arith.constant 0 : i32
    return %arg1, %c0_i32, %c0_i32_0 : i32, i32, i32
  }
  func.func @transform_5(%arg0: i32, %arg1: i32, %arg2: memref<2xi32, #tpu.memory_space<smem>>) -> (i32, i32, i32) {
    %c0_i32 = arith.constant 0 : i32
    %c0_i32_0 = arith.constant 0 : i32
    %c0_i32_1 = arith.constant 0 : i32
    return %arg1, %c0_i32, %c0_i32_0 : i32, i32, i32
  }
  func.func @transform_6(%arg0: i32, %arg1: i32, %arg2: memref<2xi32, #tpu.memory_space<smem>>) -> (i32, i32, i32) {
    %c0_i32 = arith.constant 0 : i32
    %c0_i32_0 = arith.constant 0 : i32
    %c0_i32_1 = arith.constant 0 : i32
    return %arg1, %c0_i32, %c0_i32_0 : i32, i32, i32
  }
  func.func @transform_7(%arg0: i32, %arg1: i32, %arg2: memref<2xi32, #tpu.memory_space<smem>>) -> (i32, i32, i32) {
    %c0_i32 = arith.constant 0 : i32
    %c0_i32_0 = arith.constant 0 : i32
    %c0_i32_1 = arith.constant 0 : i32
    return %arg1, %c0_i32, %c0_i32_0 : i32, i32, i32
  }
  func.func @transform_8(%arg0: i32, %arg1: i32, %arg2: memref<2xi32, #tpu.memory_space<smem>>) -> (i32, i32, i32) {
    %c0_i32 = arith.constant 0 : i32
    %c0_i32_0 = arith.constant 0 : i32
    %c0_i32_1 = arith.constant 0 : i32
    return %arg1, %c0_i32, %c0_i32_0 : i32, i32, i32
  }
  func.func @transform_9(%arg0: i32, %arg1: i32, %arg2: memref<2xi32, #tpu.memory_space<smem>>) -> (i32, i32, i32) {
    %c0_i32 = arith.constant 0 : i32
    %c0_i32_0 = arith.constant 0 : i32
    %c0_i32_1 = arith.constant 0 : i32
    return %arg1, %c0_i32, %c0_i32_0 : i32, i32, i32
  }
  func.func @transform_10(%arg0: i32, %arg1: i32, %arg2: memref<2xi32, #tpu.memory_space<smem>>) -> (i32, i32, i32) {
    %c0_i32 = arith.constant 0 : i32
    %c0_i32_0 = arith.constant 0 : i32
    %c0_i32_1 = arith.constant 0 : i32
    return %arg1, %c0_i32, %c0_i32_0 : i32, i32, i32
  }
  func.func @transform_11(%arg0: i32, %arg1: i32, %arg2: memref<2xi32, #tpu.memory_space<smem>>) -> (i32, i32, i32) {
    %c0_i32 = arith.constant 0 : i32
    %c0_i32_0 = arith.constant 0 : i32
    %c0_i32_1 = arith.constant 0 : i32
    return %arg1, %c0_i32, %c0_i32_0 : i32, i32, i32
  }
  func.func @transform_12(%arg0: i32, %arg1: i32, %arg2: memref<2xi32, #tpu.memory_space<smem>>) -> (i32, i32) {
    %c0_i32 = arith.constant 0 : i32
    %c0_i32_0 = arith.constant 0 : i32
    %c0_i32_1 = arith.constant 0 : i32
    return %c0_i32, %c0_i32_0 : i32, i32
  }
  func.func @transform_13(%arg0: i32, %arg1: i32, %arg2: memref<2xi32, #tpu.memory_space<smem>>) -> (i32, i32, i32) {
    %c0_i32 = arith.constant 0 : i32
    %c0_i32_0 = arith.constant 0 : i32
    %c0_i32_1 = arith.constant 0 : i32
    return %arg0, %c0_i32, %c0_i32_0 : i32, i32, i32
  }
}

</mosaic_0001>

<bundles_post_ra>
// kernel: prompt_model_forward.9
= control target key start
LH: loop header
LB: loop body
LE: loop exit
PB: predicated region body
PF: predicated region fallthrough
CT: control target
= control target key end

     0   :  { %v237_v0 = vmov 0.0   ;;  %vm238_vm0 = vmmov 0   ;;  %vm62_vm1 = vcmask 523264   ;;  %vm139_vm2 = vcmask 261120   ;;  %s299_s1 = inlined_call_operand.vmem [shape: bf16[1,64,32], index: 1, kind: input, shape index: {}]   ;;  %s300_s0 = inlined_call_operand.vmem [shape: f32[1,4,64], index: 0, kind: input, shape index: {}]   ;;  %s301_s3 = inlined_call_operand.vmem [shape: bf16[1,32,32], index: 3, kind: input, shape index: {}]   ;;  %s302_s2 = inlined_call_operand.vmem [shape: f32[1,1,32], index: 2, kind: input, shape index: {}]   ;;  %s303_s4 = inlined_call_operand.vmem [shape: f32[1,1,32], index: 4, kind: input, shape index: {}]   ;;  %s304_s5 = inlined_call_operand.vmem [shape: f32[1,4,32], index: 5, kind: output, shape index: {}]  }
   0x1   :  { %207 = vmatprep.subr.bf16.mxu0 %v237_v0  ;;  %v229_v1 = vld [vmem:[%s299_s1] sm:$0xff]   ;;  %215 = vmatprep.mubr.msk.bf16.mxu0 %vm238_vm0, %v237_v0  ;;  %v230_v2 = vld [vmem:[%s299_s1 + $0x8] sm:$0xff]   ;;  %v231_v3 = vld [vmem:[%s299_s1 + $0x10] sm:$0xff]   ;;  %vm183_vm3 = vcmask 257024  }
   0x2   :  { %219 = vmatprep.subr.bf16.mxu1 %v237_v0  ;;  %223 = vmatprep.mubr.msk.bf16.mxu1 %vm238_vm0, %v237_v0  ;;  %v232_v4 = vld [vmem:[%s299_s1 + $0x18] sm:$0xff]   ;;  %v21_v5 = vld [vmem:[%s300_s0] sm:$0xf]  ;;  %v234_v8 = vld [vmem:[%s301_s3 + $0x8] sm:$0xff]  }
   0x3   :  { %208 = vmatpush3.bf16.msra.mxu0 %v229_v1  ;;  %v22_v6 = vpack.c.bf16 %v21_v5, %v21_v5  ;;  %v233_v7 = vld [vmem:[%s301_s3] sm:$0xff]  }
   0x4   :  { %209 = vmatprep.subr.bf16.mxu0 %v237_v0  ;;  %220 = vmatpush3.bf16.msra.mxu1 %v233_v7  ;;  %v189_v9 = vld [vmem:[%s302_s2] ss:$0 sm:$0xff] }
   0x5   :  { %221 = vmatprep.subr.bf16.mxu1 %v237_v0  ;;  %v195_v25 = vld [vmem:[%s303_s4] ss:$0 sm:$0xff] }
   0x7   :  { %210 = vmatpush3.bf16.msra.mxu0 %v230_v2 }
   0x8   :  { %211 = vmatprep.subr.bf16.mxu0 %v237_v0  ;;  %222 = vmatpush3.bf16.msra.mxu1 %v234_v8 }
   0xb   :  { %212 = vmatpush3.bf16.msra.mxu0 %v231_v3 }
   0xc   :  { %213 = vmatprep.subr.bf16.mxu0 %v237_v0 }
   0xf   :  { %214 = vmatpush3.bf16.msra.mxu0 %v232_v4 }
  0x12   :  { %216 = vmatmul.mubr.msk.bf16.vlgmr.msra.gmra.mrb[0].mxu0 %vm62_vm1, %v22_v6 }
  0xe5   :  { %v100_v10 = vpop.f32.mrb[0].mxu0 }
  0xe6   :  { %v101_v11 = vadd.f32 %v189_v9, %v100_v10  ;;  %v217_v12 = vpop.f32.mrb[1].mxu0 }
  0xe7   :  { %v103_v13 = vpop.f32.mrb[2].mxu0 }
  0xe8   :  { %v106_v14 = vmul.f32 %v101_v11, %v101_v11  ;;  %v218_v15 = vpop.f32.mrb[3].mxu0 }
  0xea   :  { %v107_v16 = vmul.f32 %v106_v14, %v101_v11 }
  0xec   :  { %v108_v17 = vmul.f32 0.044715, %v107_v16 }
  0xee   :  { %v109_v18 = vadd.f32 %v108_v17, %v101_v11 }
  0xf0   :  { %v110_v19 = vmul.f32 0.7978846, %v109_v18 }
  0xf2   :  { %235 = vtanh.f32 %v110_v19 }
  0xfc   :  { %v236_v20 = vpop.eup %235 }
  0xfd   :  { %v112_v21 = vadd.f32 1.0, %v236_v20 }
  0xff   :  { %v113_v22 = vmul.f32 0.5, %v112_v21 }
 0x101   :  { %v114_v23 = vmul.f32 %v113_v22, %v101_v11 }
 0x103   :  { %v115_v24 = vpack.c.bf16 %v114_v23, %v114_v23 }
 0x105   :  { %224 = vmatmul.mubr.msk.bf16.vlgmr.msra.gmra.mrb[0].mxu1 %vm139_vm2, %v115_v24 }
 0x1d8   :  { %v177_v26 = vpop.f32.mrb[0].mxu1 }
 0x1d9   :  { %v178_v27 = vadd.f32 %v195_v25, %v177_v26  ;;  %v225_v28 = vpop.f32.mrb[1].mxu1 }
 0x1da   :  { %v180_v29 = vpop.f32.mrb[2].mxu1 }
 0x1db   :  { %184 = vst.msk [vmem:[%s304_s5] sm:$0xf] %vm183_vm3, %v178_v27  ;;  %v226_v30 = vpop.f32.mrb[3].mxu1 }

// kernel: prompt_model_forward.6
= control target key start
LH: loop header
LB: loop body
LE: loop exit
PB: predicated region body
PF: predicated region fallthrough
CT: control target
= control target key end

     0   :  { %vm538_vm0 = vcmask 523264   ;;  %s895_s1 = inlined_call_operand.vmem [shape: bf16[768,64], index: 1, kind: input, shape index: {}]   ;;  %s896_s0 = inlined_call_operand.vmem [shape: f32[8,768], index: 0, kind: input, shape index: {}]   ;;  %s897_s2 = inlined_call_operand.vmem [shape: f32[1,64], index: 2, kind: input, shape index: {}]   ;;  %s898_s3 = inlined_call_operand.vmem [shape: f32[8,64], index: 3, kind: output, shape index: {}]  }
   0x1   :  { %v659_v0 = vld [vmem:[%s895_s1 + $0x40] sm:$0xff]   ;;  %v663_v4 = vld [vmem:[%s895_s1 + $0x48] sm:$0xff]   ;;  %v667_v8 = vld [vmem:[%s895_s1 + $0x50] sm:$0xff]  }
   0x2   :  { %v660_v1 = vld [vmem:[%s895_s1] sm:$0xff]   ;;  %593 = vmatprep.subr.bf16.mxu0 %v659_v0  ;;  %v664_v5 = vld [vmem:[%s895_s1 + $0x8] sm:$0xff]   ;;  %v668_v9 = vld [vmem:[%s895_s1 + $0x10] sm:$0xff]  }
   0x3   :  { %v661_v2 = vld [vmem:[%s895_s1 + $0xc0] sm:$0xff]   ;;  %594 = vmatpush3.bf16.msra.mxu0 %v660_v1  ;;  %v665_v6 = vld [vmem:[%s895_s1 + $0xc8] sm:$0xff]   ;;  %v669_v10 = vld [vmem:[%s895_s1 + $0xd0] sm:$0xff]  }
   0x4   :  { %v662_v3 = vld [vmem:[%s895_s1 + $0x80] sm:$0xff]   ;;  %615 = vmatprep.subr.bf16.mxu1 %v661_v2  ;;  %595 = vmatprep.subr.bf16.mxu0 %v663_v4  ;;  %v666_v7 = vld [vmem:[%s895_s1 + $0x88] sm:$0xff]   ;;  %v670_v11 = vld [vmem:[%s895_s1 + $0x90] sm:$0xff]  }
   0x5   :  { %616 = vmatpush3.bf16.msra.mxu1 %v662_v3  ;;  %v671_v12 = vld [vmem:[%s895_s1 + $0x58] sm:$0xff]   ;;  %v675_v16 = vld [vmem:[%s895_s1 + $0x60] sm:$0xff]   ;;  %v679_v20 = vld [vmem:[%s895_s1 + $0x68] sm:$0xff]  }
   0x6   :  { %617 = vmatprep.subr.bf16.mxu1 %v665_v6  ;;  %v672_v13 = vld [vmem:[%s895_s1 + $0x18] sm:$0xff]   ;;  %v676_v17 = vld [vmem:[%s895_s1 + $0x20] sm:$0xff]   ;;  %v680_v21 = vld [vmem:[%s895_s1 + $0x28] sm:$0xff]  }
   0x7   :  { %596 = vmatpush3.bf16.msra.mxu0 %v664_v5  ;;  %v673_v14 = vld [vmem:[%s895_s1 + $0xd8] sm:$0xff]   ;;  %v677_v18 = vld [vmem:[%s895_s1 + $0xe0] sm:$0xff]   ;;  %v681_v22 = vld [vmem:[%s895_s1 + $0xe8] sm:$0xff]  }
   0x8   :  { %597 = vmatprep.subr.bf16.mxu0 %v667_v8  ;;  %v674_v15 = vld [vmem:[%s895_s1 + $0x98] sm:$0xff]   ;;  %v678_v19 = vld [vmem:[%s895_s1 + $0xa0] sm:$0xff]   ;;  %v682_v23 = vld [vmem:[%s895_s1 + $0xa8] sm:$0xff]  }
   0x9   :  { %618 = vmatpush3.bf16.msra.mxu1 %v666_v7  ;;  %v683_v24 = vld [vmem:[%s895_s1 + $0x70] sm:$0xff]   ;;  %v687_v28 = vld [vmem:[%s895_s1 + $0x78] sm:$0xff]   ;;  %v16_v31 = vld [vmem:[%s896_s0 + $0x8] sm:$0xff] }
   0xa   :  { %619 = vmatprep.subr.bf16.mxu1 %v669_v10  ;;  %v684_v25 = vld [vmem:[%s895_s1 + $0x30] sm:$0xff]   ;;  %v688_v29 = vld [vmem:[%s895_s1 + $0x38] sm:$0xff]   ;;  %v22_v32 = vpack.c.bf16 %v16_v31, %v16_v31  ;;  %v15_v34 = vld [vmem:[%s896_s0] sm:$0xff] }
   0xb   :  { %598 = vmatpush3.bf16.msra.mxu0 %v668_v9  ;;  %v685_v26 = vld [vmem:[%s895_s1 + $0xf0] sm:$0xff]   ;;  %v689_v30 = vld [vmem:[%s895_s1 + $0xf8] sm:$0xff]   ;;  %v21_v35 = vpack.c.bf16 %v15_v34, %v15_v34  ;;  %v691_v36 = vld [vmem:[%s895_s1 + $0x140] sm:$0xff]  }
   0xc   :  { %599 = vmatprep.subr.bf16.mxu0 %v671_v12  ;;  %v686_v27 = vld [vmem:[%s895_s1 + $0xb0] sm:$0xff]   ;;  %v690_v33 = vld [vmem:[%s895_s1 + $0xb8] sm:$0xff]   ;;  %450 = vmatprep.mubr.bf16.mxu0 %v22_v32  ;;  %v692_v39 = vld [vmem:[%s895_s1 + $0x100] sm:$0xff]  }
   0xd   :  { %620 = vmatpush3.bf16.msra.mxu1 %v670_v11  ;;  %v18_v37 = vld [vmem:[%s896_s0 + $0x18] sm:$0xff]  ;;  %v17_v40 = vld [vmem:[%s896_s0 + $0x10] sm:$0xff]  ;;  %v693_v42 = vld [vmem:[%s895_s1 + $0x148] sm:$0xff]  }
   0xe   :  { %621 = vmatprep.subr.bf16.mxu1 %v673_v14  ;;  %v24_v38 = vpack.c.bf16 %v18_v37, %v18_v37  ;;  %v23_v41 = vpack.c.bf16 %v17_v40, %v17_v40  ;;  %v694_v43 = vld [vmem:[%s895_s1 + $0x108] sm:$0xff]   ;;  %v695_v44 = vld [vmem:[%s895_s1 + $0x150] sm:$0xff]   ;;  %v697_v46 = vld [vmem:[%s895_s1 + $0x158] sm:$0xff]  }
   0xf   :  { %600 = vmatpush3.bf16.msra.mxu0 %v672_v13  ;;  %v696_v45 = vld [vmem:[%s895_s1 + $0x110] sm:$0xff]   ;;  %v698_v47 = vld [vmem:[%s895_s1 + $0x118] sm:$0xff]   ;;  %v699_v48 = vld [vmem:[%s895_s1 + $0x160] sm:$0xff]  }
  0x10   :  { %601 = vmatprep.subr.bf16.mxu0 %v675_v16  ;;  %490 = vmatprep.mubr.bf16.mxu1 %v24_v38  ;;  %v700_v49 = vld [vmem:[%s895_s1 + $0x120] sm:$0xff]   ;;  %v701_v50 = vld [vmem:[%s895_s1 + $0x168] sm:$0xff]   ;;  %v703_v54 = vld [vmem:[%s895_s1 + $0x170] sm:$0xff]  }
  0x11   :  { %622 = vmatpush3.bf16.msra.mxu1 %v674_v15  ;;  %v20_v51 = vld [vmem:[%s896_s0 + $0x28] sm:$0xff]  ;;  %v704_v55 = vld [vmem:[%s895_s1 + $0x130] sm:$0xff]   ;;  %v705_v56 = vld [vmem:[%s895_s1 + $0x178] sm:$0xff]  }
  0x12   :  { %623 = vmatprep.subr.bf16.mxu1 %v677_v18  ;;  %v26_v52 = vpack.c.bf16 %v20_v51, %v20_v51  ;;  %v702_v53 = vld [vmem:[%s895_s1 + $0x128] sm:$0xff]   ;;  %v706_v57 = vld [vmem:[%s895_s1 + $0x138] sm:$0xff]   ;;  %v19_v58 = vld [vmem:[%s896_s0 + $0x20] sm:$0xff] }
  0x13   :  { %602 = vmatpush3.bf16.msra.mxu0 %v676_v17  ;;  %v25_v59 = vpack.c.bf16 %v19_v58, %v19_v58  ;;  %v544_v61 = vld [vmem:[%s897_s2] ss:$0 sm:$0xff] }
  0x14   :  { %603 = vmatprep.subr.bf16.mxu0 %v679_v20 }
  0x15   :  { %624 = vmatpush3.bf16.msra.mxu1 %v678_v19 }
  0x16   :  { %625 = vmatprep.subr.bf16.mxu1 %v681_v22 }
  0x17   :  { %604 = vmatpush3.bf16.msra.mxu0 %v680_v21 }
  0x18   :  { %605 = vmatprep.subr.bf16.mxu0 %v683_v24 }
  0x19   :  { %626 = vmatpush3.bf16.msra.mxu1 %v682_v23 }
  0x1a   :  { %627 = vmatprep.subr.bf16.mxu1 %v685_v26 }
  0x1b   :  { %606 = vmatpush3.bf16.msra.mxu0 %v684_v25 }
  0x1c   :  { %607 = vmatprep.subr.bf16.mxu0 %v687_v28 }
  0x1d   :  { %628 = vmatpush3.bf16.msra.mxu1 %v686_v27 }
  0x1e   :  { %629 = vmatprep.subr.bf16.mxu1 %v689_v30 }
  0x1f   :  { %608 = vmatpush3.bf16.msra.mxu0 %v688_v29 }
  0x20   :  { %637 = vmatprep.subr.bf16.mxu0 %v691_v36 }
  0x21   :  { %630 = vmatpush3.bf16.msra.mxu1 %v690_v33 }
  0x22   :  { %451 = vmatmul.mubr.bf16.vlgmr.msra.gmra.mrb[0].mxu0 %v21_v35 }
  0x23   :  { %638 = vmatpush3.bf16.msra.mxu0 %v692_v39  ;;  %530 = vmatprep.mubr.bf16.mxu0 %v26_v52 }
  0x24   :  { %491 = vmatmul.mubr.bf16.vlgmr.msra.gmra.mrb[0].mxu1 %v23_v41  ;;  %639 = vmatprep.subr.bf16.mxu0 %v693_v42 }
  0x27   :  { %640 = vmatpush3.bf16.msra.mxu0 %v694_v43 }
  0x28   :  { %641 = vmatprep.subr.bf16.mxu0 %v695_v44 }
  0x2b   :  { %642 = vmatpush3.bf16.msra.mxu0 %v696_v45 }
  0x2c   :  { %643 = vmatprep.subr.bf16.mxu0 %v697_v46 }
  0x2f   :  { %644 = vmatpush3.bf16.msra.mxu0 %v698_v47 }
  0x30   :  { %645 = vmatprep.subr.bf16.mxu0 %v699_v48 }
  0x33   :  { %646 = vmatpush3.bf16.msra.mxu0 %v700_v49 }
  0x34   :  { %647 = vmatprep.subr.bf16.mxu0 %v701_v50 }
  0x37   :  { %648 = vmatpush3.bf16.msra.mxu0 %v702_v53 }
  0x38   :  { %649 = vmatprep.subr.bf16.mxu0 %v703_v54 }
  0x3b   :  { %650 = vmatpush3.bf16.msra.mxu0 %v704_v55 }
  0x3c   :  { %651 = vmatprep.subr.bf16.mxu0 %v705_v56 }
  0x3f   :  { %652 = vmatpush3.bf16.msra.mxu0 %v706_v57 }
  0x42   :  { %531 = vmatmul.mubr.bf16.vlgmr.msra.gmra.mrb[4].mxu0 %v25_v59 }
  0xf5   :  { %v609_v60 = vpop.f32.mrb[0].mxu0 }
  0xf6   :  { %v610_v62 = vpop.f32.mrb[1].mxu0 }
  0xf7   :  { %v611_v63 = vadd.f32 %v610_v62, %v609_v60  ;;  %v612_v0 = vpop.f32.mrb[2].mxu0  ;;  %v631_v1 = vpop.f32.mrb[0].mxu1 }
  0xf8   :  { %v613_v2 = vpop.f32.mrb[3].mxu0  ;;  %v632_v4 = vpop.f32.mrb[1].mxu1 }
  0xf9   :  { %v453_v3 = vadd.f32 %v611_v63, %v544_v61  ;;  %v633_v5 = vadd.f32 %v632_v4, %v631_v1  ;;  %v634_v6 = vpop.f32.mrb[2].mxu1 }
  0xfa   :  { %v635_v7 = vpop.f32.mrb[3].mxu1 }
  0xfb   :  { %v493_v8 = vadd.f32 %v633_v5, %v453_v3 }
 0x115   :  { %v653_v9 = vpop.f32.mrb[4].mxu0 }
 0x116   :  { %v654_v10 = vpop.f32.mrb[5].mxu0 }
 0x117   :  { %v655_v11 = vadd.f32 %v654_v10, %v653_v9  ;;  %v656_v12 = vpop.f32.mrb[6].mxu0 }
 0x118   :  { %v657_v13 = vpop.f32.mrb[7].mxu0 }
 0x119   :  { %v533_v14 = vadd.f32 %v655_v11, %v493_v8 }
 0x11b   :  { %539 = vst.msk [vmem:[%s898_s3] sm:$0xff] %vm538_vm0, %v533_v14 }

// kernel: prompt_model_forward.8
= control target key start
LH: loop header
LB: loop body
LE: loop exit
PB: predicated region body
PF: predicated region fallthrough
CT: control target
= control target key end

     0   :  { %v262_v0 = vmov 0.0   ;;  %vm263_vm0 = vmmov 0   ;;  %vm62_vm1 = vcmask 523264   ;;  %vm198_vm2 = vcmask 517120   ;;  %s332_s1 = inlined_call_operand.vmem [shape: bf16[64,64], index: 1, kind: input, shape index: {}]   ;;  %s333_s0 = inlined_call_operand.vmem [shape: f32[2,64], index: 0, kind: input, shape index: {}]   ;;  %s334_s3 = inlined_call_operand.vmem [shape: bf16[64,64], index: 3, kind: input, shape index: {}]   ;;  %s335_s2 = inlined_call_operand.vmem [shape: f32[1,64], index: 2, kind: input, shape index: {}]   ;;  %s336_s4 = inlined_call_operand.vmem [shape: f32[1,64], index: 4, kind: input, shape index: {}]   ;;  %s337_s5 = inlined_call_operand.vmem [shape: f32[2,64], index: 5, kind: output, shape index: {}]  }
   0x1   :  { %226 = vmatprep.subr.bf16.mxu0 %v262_v0  ;;  %v252_v1 = vld [vmem:[%s332_s1] sm:$0xff]   ;;  %234 = vmatprep.mubr.msk.bf16.mxu0 %vm263_vm0, %v262_v0  ;;  %v253_v2 = vld [vmem:[%s332_s1 + $0x8] sm:$0xff]   ;;  %v254_v3 = vld [vmem:[%s332_s1 + $0x10] sm:$0xff]  }
   0x2   :  { %238 = vmatprep.subr.bf16.mxu1 %v262_v0  ;;  %246 = vmatprep.mubr.msk.bf16.mxu1 %vm263_vm0, %v262_v0  ;;  %v255_v4 = vld [vmem:[%s332_s1 + $0x18] sm:$0xff]   ;;  %v21_v5 = vld [vmem:[%s333_s0] sm:$0x3]  ;;  %v257_v8 = vld [vmem:[%s334_s3 + $0x8] sm:$0xff]  }
   0x3   :  { %227 = vmatpush3.bf16.msra.mxu0 %v252_v1  ;;  %v22_v6 = vpack.c.bf16 %v21_v5, %v21_v5  ;;  %v256_v7 = vld [vmem:[%s334_s3] sm:$0xff]   ;;  %v258_v9 = vld [vmem:[%s334_s3 + $0x10] sm:$0xff]   ;;  %v259_v10 = vld [vmem:[%s334_s3 + $0x18] sm:$0xff]  }
   0x4   :  { %228 = vmatprep.subr.bf16.mxu0 %v262_v0  ;;  %239 = vmatpush3.bf16.msra.mxu1 %v256_v7  ;;  %v204_v11 = vld [vmem:[%s335_s2] ss:$0 sm:$0xff] }
   0x5   :  { %240 = vmatprep.subr.bf16.mxu1 %v262_v0  ;;  %v210_v27 = vld [vmem:[%s336_s4] ss:$0 sm:$0xff] }
   0x7   :  { %229 = vmatpush3.bf16.msra.mxu0 %v253_v2 }
   0x8   :  { %230 = vmatprep.subr.bf16.mxu0 %v262_v0  ;;  %241 = vmatpush3.bf16.msra.mxu1 %v257_v8 }
   0x9   :  { %242 = vmatprep.subr.bf16.mxu1 %v262_v0 }
   0xb   :  { %231 = vmatpush3.bf16.msra.mxu0 %v254_v3 }
   0xc   :  { %232 = vmatprep.subr.bf16.mxu0 %v262_v0  ;;  %243 = vmatpush3.bf16.msra.mxu1 %v258_v9 }
   0xd   :  { %244 = vmatprep.subr.bf16.mxu1 %v262_v0 }
   0xf   :  { %233 = vmatpush3.bf16.msra.mxu0 %v255_v4 }
  0x10   :  { %245 = vmatpush3.bf16.msra.mxu1 %v259_v10 }
  0x12   :  { %235 = vmatmul.mubr.msk.bf16.vlgmr.msra.gmra.mrb[0].mxu0 %vm62_vm1, %v22_v6 }
  0xe5   :  { %v100_v12 = vpop.f32.mrb[0].mxu0 }
  0xe6   :  { %v101_v13 = vadd.f32 %v204_v11, %v100_v12  ;;  %v236_v14 = vpop.f32.mrb[1].mxu0 }
  0xe7   :  { %v103_v15 = vpop.f32.mrb[2].mxu0 }
  0xe8   :  { %v106_v16 = vmul.f32 %v101_v13, %v101_v13  ;;  %v237_v17 = vpop.f32.mrb[3].mxu0 }
  0xea   :  { %v107_v18 = vmul.f32 %v106_v16, %v101_v13 }
  0xec   :  { %v108_v19 = vmul.f32 0.044715, %v107_v18 }
  0xee   :  { %v109_v20 = vadd.f32 %v108_v19, %v101_v13 }
  0xf0   :  { %v110_v21 = vmul.f32 0.7978846, %v109_v20 }
  0xf2   :  { %260 = vtanh.f32 %v110_v21 }
  0xfc   :  { %v261_v22 = vpop.eup %260 }
  0xfd   :  { %v112_v23 = vadd.f32 1.0, %v261_v22 }
  0xff   :  { %v113_v24 = vmul.f32 0.5, %v112_v23 }
 0x101   :  { %v114_v25 = vmul.f32 %v113_v24, %v101_v13 }
 0x103   :  { %v115_v26 = vpack.c.bf16 %v114_v25, %v114_v25 }
 0x105   :  { %247 = vmatmul.mubr.msk.bf16.vlgmr.msra.gmra.mrb[0].mxu1 %vm62_vm1, %v115_v26 }
 0x1d8   :  { %v192_v28 = vpop.f32.mrb[0].mxu1 }
 0x1d9   :  { %v193_v29 = vadd.f32 %v210_v27, %v192_v28  ;;  %v248_v30 = vpop.f32.mrb[1].mxu1 }
 0x1da   :  { %v195_v31 = vpop.f32.mrb[2].mxu1 }
 0x1db   :  { %199 = vst.msk [vmem:[%s337_s5] sm:$0x3] %vm198_vm2, %v193_v29  ;;  %v249_v32 = vpop.f32.mrb[3].mxu1 }

// kernel: prompt_model_forward.11
= control target key start
LH: loop header
LB: loop body
LE: loop exit
PB: predicated region body
PF: predicated region fallthrough
CT: control target
= control target key end

     0   :  { %v219_v1 = vmov 0   ;;  %vm92_vm0 = vcmask 261120   ;;  %v27_v10 = vlaneseq  ;;  %s294_s1 = inlined_call_operand.vmem [shape: bf16[32,512], index: 1, kind: input, shape index: {}]   ;;  %s295_s0 = inlined_call_operand.vmem [shape: bf16[16,32], index: 0, kind: input, shape index: {}]   ;;  %s296_s2 = inlined_call_operand.vmem [shape: f32[1,512], index: 2, kind: input, shape index: {}]   ;;  %s297_s3 = inlined_call_operand.vmem [shape: f32[16,512], index: 3, kind: output, shape index: {}]  }
   0x1   :  { %v206_v0 = vld [vmem:[%s294_s1 + $0x4] ss:$16 sps:$4 sm:$0xff]   ;;  %128 = vmatprep.mubr.bf16.mxu0 %v219_v1  ;;  %171 = vmatprep.mubr.bf16.mxu1 %v219_v1  ;;  %v208_v2 = vld [vmem:[%s294_s1 + $0xc] ss:$16 sps:$4 sm:$0xff]   ;;  %v210_v3 = vld [vmem:[%s294_s1] ss:$16 sps:$4 sm:$0xff]  }
   0x2   :  { %96 = vmatprep.subr.bf16.mxu0 %v206_v0  ;;  %v211_v4 = vld [vmem:[%s294_s1 + $0x8] ss:$16 sps:$4 sm:$0xff]   ;;  %139 = vmatprep.subr.bf16.mxu1 %v208_v2  ;;  %v212_v5 = vld [vmem:[%s294_s1 + $0x24] ss:$16 sps:$4 sm:$0xff]   ;;  %v214_v6 = vld [vmem:[%s294_s1 + $0x2c] ss:$16 sps:$4 sm:$0xff]  }
   0x3   :  { %97 = vmatpush1.bf16.msra.mxu0 %v210_v3  ;;  %140 = vmatpush1.bf16.msra.mxu1 %v211_v4  ;;  %v216_v7 = vld [vmem:[%s294_s1 + $0x20] ss:$16 sps:$4 sm:$0xff]   ;;  %v217_v8 = vld [vmem:[%s294_s1 + $0x28] ss:$16 sps:$4 sm:$0xff]   ;;  %v28_v11 = vshrl.u32 %v27_v10, 7 }
   0x4   :  { %98 = vmatprep.subr.bf16.mxu0 %v212_v5  ;;  %141 = vmatprep.subr.bf16.mxu1 %v214_v6  ;;  %v218_v9 = vld [vmem:[%s295_s0] sm:$0xff]  }
   0x5   :  { %v29_v12 = vsub.s32 0, %v28_v11  ;;  %v37_v13 = vsub.s32 2, %v28_v11  ;;  %v25_v14 = vld [vmem:[%s296_s2] sm:$0xf]  ;;  %v33_v15 = vsub.s32 1, %v28_v11  ;;  %v41_v16 = vsub.s32 3, %v28_v11 }
   0x7   :  { %99 = vmatpush1.bf16.msra.mxu0 %v216_v7  ;;  %142 = vmatpush1.bf16.msra.mxu1 %v217_v8  ;;  %v30_v17 = vrot.slane %v25_v14, %v29_v12  ;;  %v38_v18 = vrot.slane %v25_v14, %v37_v13  ;;  %v34_v19 = vrot.slane %v25_v14, %v33_v15 }
   0x8   :  { %v42_v20 = vrot.slane %v25_v14, %v41_v16 }
   0xa   :  { %203 = vmatmul.mubr.msk.bf16.vlgmr.msra.gmra.mrb[0].mxu0 %vm92_vm0, %v218_v9  ;;  %204 = vmatmul.mubr.msk.bf16.vlgmr.msra.gmra.mrb[0].mxu1 %vm92_vm0, %v218_v9 }
  0xdd   :  { %v130_v21 = vpop.f32.mrb[0].mxu0  ;;  %v173_v22 = vpop.f32.mrb[0].mxu1 }
  0xde   :  { %v131_v23 = vadd.f32 %v130_v21, %v30_v17  ;;  %v174_v24 = vadd.f32 %v173_v22, %v38_v18  ;;  %v132_v25 = vpop.f32.mrb[1].mxu0  ;;  %v175_v26 = vpop.f32.mrb[1].mxu1 }
  0xdf   :  { %v133_v27 = vadd.f32 %v132_v25, %v34_v19  ;;  %v176_v28 = vadd.f32 %v175_v26, %v42_v20  ;;  %v134_v29 = vpop.f32.mrb[2].mxu0  ;;  %v177_v30 = vpop.f32.mrb[2].mxu1 }
  0xe0   :  { %182 = vst [vmem:[%s297_s3] sm:$0xff] %v131_v23  ;;  %184 = vst [vmem:[%s297_s3 + $0x10] sm:$0xff] %v174_v24  ;;  %v135_v31 = vadd.f32 %v134_v29, %v30_v17  ;;  %v178_v32 = vadd.f32 %v177_v30, %v38_v18  ;;  %v136_v33 = vpop.f32.mrb[3].mxu0  ;;  %v179_v34 = vpop.f32.mrb[3].mxu1 }
  0xe1   :  { %183 = vst [vmem:[%s297_s3 + $0x8] sm:$0xff] %v133_v27  ;;  %185 = vst [vmem:[%s297_s3 + $0x18] sm:$0xff] %v176_v28  ;;  %v137_v35 = vadd.f32 %v136_v33, %v34_v19  ;;  %v180_v36 = vadd.f32 %v179_v34, %v42_v20 }
  0xe2   :  { %186 = vst [vmem:[%s297_s3 + $0x20] sm:$0xff] %v135_v31  ;;  %188 = vst [vmem:[%s297_s3 + $0x30] sm:$0xff] %v178_v32 }
  0xe3   :  { %187 = vst [vmem:[%s297_s3 + $0x28] sm:$0xff] %v137_v35  ;;  %189 = vst [vmem:[%s297_s3 + $0x38] sm:$0xff] %v180_v36 }

// kernel: prompt_model_forward.7
= control target key start
LH: loop header
LB: loop body
LE: loop exit
PB: predicated region body
PF: predicated region fallthrough
CT: control target
= control target key end

     0   :  { %s2233_s0 = inlined_call_operand.vmem [shape: s32[2,4], index: 0, kind: input, shape index: {}]   ;;  %s2234_s1 = inlined_call_operand.vmem [shape: f32[2,16,64], index: 1, kind: input, shape index: {}]   ;;  %s2235_s2 = inlined_call_operand.vmem [shape: f32[2,16,64], index: 2, kind: input, shape index: {}]   ;;  %s2236_s3 = inlined_call_operand.vmem [shape: f32[2,4,64], index: 3, kind: input, shape index: {}]   ;;  %s2237_s4 = inlined_call_operand.vmem [shape: bf16[2,64,192], index: 4, kind: input, shape index: {}]   ;;  %s2238_s5 = inlined_call_operand.vmem [shape: f32[2,1,192], index: 5, kind: input, shape index: {}]   ;;  %s2239_s6 = inlined_call_operand.vmem [shape: bf16[2,64,64], index: 6, kind: input, shape index: {}]   ;;  %s2240_s7 = inlined_call_operand.vmem [shape: f32[2,1,64], index: 7, kind: input, shape index: {}]   ;;  %s2241_s8 = inlined_call_operand.vmem [shape: bf16[2,64,128], index: 8, kind: input, shape index: {}]   ;;  %s2242_s9 = inlined_call_operand.vmem [shape: f32[2,1,128], index: 9, kind: input, shape index: {}]   ;;  %s2243_s10 = inlined_call_operand.vmem [shape: bf16[2,128,64], index: 10, kind: input, shape index: {}]   ;;  %s2244_s11 = inlined_call_operand.vmem [shape: f32[2,1,64], index: 11, kind: input, shape index: {}]   ;;  %s2245_s12 = inlined_call_operand.vmem [shape: f32[2,1,64], index: 12, kind: output, shape index: {}]  }
   0x1   :  { %2249 = sst [smem:[#allocation12_spill]] %s2234_s1  ;;  %s17_s23 = sshll.u32 %s2233_s0, 4  ;;  %s18_s23 = int_to_ptr.vmem [resolvable:$true] %s17_s23 }
   0x2   :  { %2250 = sst [smem:[#allocation13_spill]] %s2235_s2  ;;  %s1829_s24 = scalar_lea.vmem %s18_s23, 32 }
   0x3   :  { %2251 = sst [smem:[#allocation14_spill]] %s2236_s3  ;;  %p1830_p0 = scmp.ne.s32.totalorder %s18_s23, %s1829_s24 }
   0x4   :  { %2252 = sst [smem:[#allocation15_spill]] %s2237_s4  ;;  %p1834_p1 = scmp.lt.s32.totalorder %s18_s23, %s18_s23 }
   0x5   :  { %2253 = sst [smem:[#allocation16_spill]] %s2238_s5  ;;  %p1835_p2 = scmp.lt.s32.totalorder %s1829_s24, %s1829_s24 }
   0x6   :  { %2254 = sst [smem:[#allocation17_spill]] %s2239_s6 }
   0x7   :  { %2255 = sst [smem:[#allocation18_spill]] %s2245_s12  ;;  %p1836_p3 = por %p1835_p2, %p1834_p1 }
   0x9   :  { %p1837_p4 = pnand %p1836_p3, %p1830_p0 }
   0xb   :  { %1840 = shalt.err (!%p1837_p4)  }
   0xc   :  { %s1883_s25 = smov [#allocation5]  }
   0xd   :  { %20 = dma.vmem_to_smem %s18_s23, 32, %s1883_s25, [#allocation4] }
   0xe   :  { %1861 = dma.done.wait [#allocation4], 32 }
   0xf   :  { %1862 = vsyncadd [#allocation4], 4294967264 }
  0x10   :  { %22 = sfence }
  0x11   :  { %s1959_s26 = smov 0   ;;  %s1961_s27 = smov 0  }
  0x12   :  { %s1963_s28 = smov 0   ;;  %s1965_s0 = smov 0  }
  0x13   :  { %s1967_s29 = smov 0  }
  0x14 LB: > { %2256 = sst [smem:[#allocation7_spill]] %s1873_s28  ;;  %s37_s30 = sadd.s32 1, %s1873_s28  ;;  %s1881_s29 = sphi %s1967_s29, %s28_s29   ;;  %s1877_s0 = sphi %s1965_s0, %s2274_s0   ;;  %s1873_s28 = sphi %s1963_s28, %s2273_s28   ;;  %s1869_s27 = sphi %s1961_s27, %s2272_s27   ;;  %s1865_s26 = sphi %s1959_s26, %s2271_s26  }
  0x15   : > { %2257 = sst [smem:[#allocation8_spill]] %s1877_s0  ;;  %s40_s13 = sadd.s32 1, %s1877_s0 }
  0x16   : > { %2258 = sst [smem:[#allocation9_spill]] %s1881_s29  ;;  %p38_p5 = scmp.ge.s32.totalorder %s37_s30, 2 }
  0x17   : > { %p1569_p6 = scmp.ge.s32.totalorder %s1881_s29, 1  ;;  %p448_p7 = scmp.lt.s32.totalorder %s1881_s29, 5 }
  0x18   : > { %s2276_s30 = smov (%p38_p5, %s37_s30), 0  ;;  %s2278_s13 = smov (!%p38_p5, %s40_s13), %s1877_s0 }
  0x19   : > { %2259 = sst [smem:[#allocation10_spill]] %s2276_s30  ;;  %p449_p8 = pnand %p1569_p6, %p448_p7 }
  0x1a   : > { %p42_p9 = scmp.ge.s32.totalorder %s2278_s13, 2  ;;  %p528_p10 = scmp.lt.s32.totalorder (!%p449_p8), %s1869_s27, 1 }
  0x1b   : > { %452 = sbr.rel (%p449_p8) target bundleno = 2626 (0xa42), region = 64  ;;  %p533_p11 = scmp.lt.s32.totalorder (!%p449_p8), %s1865_s26, 1 }
  0x1c   : > { %s2280_s13 = smov (%p42_p9, %s2278_s13), 0  ;;  %s2262_s1 = sld [smem:[#allocation12_spill]] (!%p449_p8) }
  0x1d   : > { %2260 = sst [smem:[#allocation11_spill]] %s2280_s13  ;;  %s2263_s2 = sld [smem:[#allocation13_spill]] (!%p449_p8) }
  0x1e   : > { %s2264_s3 = sld [smem:[#allocation14_spill]] (!%p449_p8)  ;;  %s2265_s4 = sld [smem:[#allocation15_spill]] (!%p449_p8) }
  0x1f   : > { %s2266_s5 = sld [smem:[#allocation16_spill]] (!%p449_p8)  ;;  %s2267_s6 = sld [smem:[#allocation17_spill]] (!%p449_p8) }
  0x20   : > { %p1584_p12 = scmp.ne.s32.totalorder (!%p449_p8), %s1865_s26, 0 }
  0x22   : > { %s2282_s27 = smov (!%p528_p10, %s1869_s27), 1  ;;  %vm585_vm0 = vcmask (!%p1584_p12), 523264  }
  0x23   : > { %s1995_s14 = scalar_select %p533_p11, %s1865_s26, 1 }
  0x24   : > { %s1624_s15 = sshll.u32 %s2282_s27, 4 }
  0x25   : > { %s532_s21 = scalar_lea.vmem %s2262_s1, %s1624_s15  ;;  %s1625_s22 = sshll.u32 %s1995_s14, 4 }
  0x26   : > { %s2009_s25 = scalar_lea.vmem %s2263_s2, %s1625_s22  ;;  %s1574_s13 = sshll.u32 %s1995_s14, 2  ;;  %v583_v0 = vld [vmem:[%s532_s21] sm:$0xff] (!%p1584_p12)  ;;  %v584_v1 = vld [vmem:[%s532_s21 + $0x8] sm:$0xff] (!%p1584_p12) }
  0x27   : > { %s2015_s28 = scalar_lea.vmem %s2264_s3, %s1574_s13  ;;  %s1626_s29 = sshll.u32 %s1995_s14, 6  ;;  %586 = vst.msk [vmem:[#allocation2] sm:$0xff] (!%p1584_p12), %vm585_vm0, %v583_v0  ;;  %587 = vst.msk [vmem:[#allocation2 + $0x8] sm:$0xff] (!%p1584_p12), %vm585_vm0, %v584_v1 }
  0x28   : > { %s2021_s18 = scalar_lea.vmem %s2265_s4, %s1626_s29  ;;  %s1577_s19 = sshll.u32 %s1995_s14, 1 }
  0x29   : > { %s2027_s1 = scalar_lea.vmem %s2266_s5, %s1577_s19  ;;  %s1627_s22 = sshll.u32 %s1995_s14, 5 }
  0x2a   : > { %s2033_s2 = scalar_lea.vmem %s2267_s6, %s1627_s22  ;;  %s558_s13 = scalar_lea.vmem %s2240_s7, %s1995_s14 }
  0x2b   : > { %s2042_s17 = scalar_lea.vmem %s2241_s8, %s1627_s22  ;;  %s566_s19 = scalar_lea.vmem %s2242_s9, %s1995_s14 }
  0x2c   : > { %s2051_s5 = scalar_lea.vmem %s2243_s10, %s1626_s29  ;;  %s574_s6 = scalar_lea.vmem %s2244_s11, %s1995_s14 }
  0x2d   : > { %582 = sbr.rel (%p1584_p12) target bundleno = 52 (0x34), region = 68 }
  0x34 PF: > { %s2059_s3 = sshll.u32 %s1865_s26, 7 }
  0x35   : > { %s589_s4 = sadd.s32 1, %s2059_s3 }
  0x36   : > { %s590_s12 = sld [smem:[#allocation5 + %s589_s4]] }
  0x3c   : > { %p1586_p13 = scmp.ne.s32.totalorder %s590_s12, 1 }
  0x3d   : > { %s595_s29 = sadd.s32 (!%p1586_p13), 2, %s2059_s3  ;;  %s597_s22 = sadd.s32 (!%p1586_p13), 3, %s2059_s3  ;;  %v599_v2 = vlaneseq (!%p1586_p13)  ;;  %v611_v7 = vld [vmem:[%s2009_s25] sm:$0xff] (!%p1586_p13)  ;;  %vm621_vm4 = vcmask (!%p1586_p13), 523264   ;;  %v612_v9 = vld [vmem:[%s2009_s25 + $0x8] sm:$0xff] (!%p1586_p13) }
  0x3e   : > { %594 = sbr.rel (%p1586_p13) target bundleno = 76 (0x4c), region = 72  ;;  %s596_s0 = sld [smem:[#allocation5 + %s595_s29]] (!%p1586_p13)  ;;  %v613_v8 = vld [vmem:[#allocation2] sm:$0xff] (!%p1586_p13)  ;;  %v614_v10 = vld [vmem:[#allocation2 + $0x8] sm:$0xff] (!%p1586_p13) }
  0x3f   : > { %s598_s21 = sld [smem:[#allocation5 + %s597_s22]] (!%p1586_p13)  ;;  %v600_v3 = vshrl.u32 (!%p1586_p13), %v599_v2, 7 }
  0x41   : > { %v601_v4 = vadd.s32 (!%p1586_p13), 8, %v600_v3 }
  0x44   : > { %v602_v5 = vstv (!%p1586_p13), %s596_s0 }
  0x45   : > { %s605_s30 = sadd.s32 %s598_s21, %s596_s0  ;;  %vm603_vm1 = vcmp.ge.s32.totalorder %v600_v3, %v602_v5  ;;  %vm604_vm2 = vcmp.ge.s32.totalorder %v601_v4, %v602_v5 }
  0x46   : > { %v606_v6 = vstv %s605_s30 }
  0x47   : > { %vm607_vm3 = vcmp.lt.s32.totalorder %v600_v3, %v606_v6  ;;  %vm608_vm5 = vcmp.lt.s32.totalorder %v601_v4, %v606_v6 }
  0x48   : > { %vm609_vm6 = vmand %vm603_vm1, %vm607_vm3 }
  0x49   : > { %v619_v11 = vsel %vm609_vm6, %v611_v7, %v613_v8  ;;  %vm610_vm7 = vmand %vm604_vm2, %vm608_vm5 }
  0x4a   : > { %622 = vst.msk [vmem:[#allocation2] sm:$0xff] %vm621_vm4, %v619_v11  ;;  %v620_v12 = vsel %vm610_vm7, %v612_v9, %v614_v10 }
  0x4b   : > { %623 = vst.msk [vmem:[#allocation2 + $0x8] sm:$0xff] %vm621_vm4, %v620_v12 }
  0x4c PF: > { %vm628_vm8 = vcmask 523264   ;;  %v1773_v27 = vld [vmem:[%s2021_s18 + $0x4] ss:$8 sps:$4 sm:$0xff]   ;;  %v1775_v28 = vld [vmem:[%s2021_s18] ss:$8 sps:$4 sm:$0xff]   ;;  %v1884_v35 = vmov 0   ;;  %v656_v40 = vlaneseq }
  0x4d   : > { %732 = vmatprep.subr.bf16.mxu1 %v1773_v27  ;;  %v1776_v29 = vld [vmem:[%s2021_s18 + $0x14] ss:$8 sps:$4 sm:$0xff]   ;;  %v1778_v30 = vld [vmem:[%s2021_s18 + $0x10] ss:$8 sps:$4 sm:$0xff]   ;;  %v1779_v31 = vld [vmem:[%s2021_s18 + $0x24] ss:$8 sps:$4 sm:$0xff]   ;;  %764 = vmatprep.mubr.bf16.mxu1 %v1884_v35 }
  0x4e   : > { %733 = vmatpush1.bf16.msra.mxu1 %v1775_v28  ;;  %v1781_v32 = vld [vmem:[%s2021_s18 + $0x20] ss:$8 sps:$4 sm:$0xff]   ;;  %v1782_v33 = vld [vmem:[%s2021_s18 + $0x34] ss:$8 sps:$4 sm:$0xff]   ;;  %v1784_v34 = vld [vmem:[%s2021_s18 + $0x30] ss:$8 sps:$4 sm:$0xff]  }
  0x4f   : > { %734 = vmatprep.subr.bf16.mxu1 %v1776_v29  ;;  %v2086_v43 = vshrl.u32 %v656_v40, 7  ;;  %v2090_v45 = vld [vmem:[%s2015_s28] sm:$0xf]  ;;  %v1885_v59 = vmov 0.0   ;;  %vm1886_vm9 = vmmov 0   ;;  %s1888_s28 = smov 64  }
  0x50   : > { %v677_v58 = vld [vmem:[%s2027_s1] sm:$0x3]  ;;  %1669 = vmatprep.subr.bf16.mxu0 %v1885_v59  ;;  %1671 = vmatprep.mubr.msk.bf16.mxu0 %vm1886_vm9, %v1885_v59  ;;  %s1887_s1 = smov 32   ;;  %s1889_s18 = smov 96   ;;  %vm784_vm10 = vcmask 261120   ;;  %vm836_vm12 = vcmask 130048  }
  0x51   : > { %v2066_v13 = vld [vmem:[#allocation2] sm:$0xff]  ;;  %v658_v44 = vsub.s32 0, %v2086_v43  ;;  %v664_v49 = vsub.s32 1, %v2086_v43  ;;  %s624_s25 = sld [smem:[#allocation5 + %s2059_s3]]  ;;  %vm1041_vm13 = vcmask 523520   ;;  %p1621_p0 = scmp.ne.s32.totalorder %s1865_s26, 1 }
  0x52   : > { %v2068_v14 = vld [vmem:[#allocation2 + $0x8] sm:$0xff]  ;;  %v629_v15 = vsel %vm628_vm8, %v2066_v13, 0.0  ;;  %735 = vmatpush1.bf16.msra.mxu1 %v1778_v30  ;;  %vm1394_vm14 = vcmask (!%p1621_p0), 516096   ;;  %s2268_s15 = sld [smem:[#allocation18_spill]] (!%p1621_p0) }
  0x53   : > { %630 = vadd.xlane.f32.xlu0 %v629_v15  ;;  %v632_v16 = vsel %vm628_vm8, %v2068_v14, 0.0  ;;  %736 = vmatprep.subr.bf16.mxu1 %v1779_v31  ;;  %v659_v48 = vrot.slane %v2090_v45, %v658_v44  ;;  %v665_v53 = vrot.slane %v2090_v45, %v664_v49  ;;  %v682_v60 = vrot.slane %v677_v58, %v658_v44 }
  0x54   : > { %v686_v62 = vrot.slane %v677_v58, %v664_v49  ;;  %v776_v15 = vand.u32 127, %v656_v40 }
  0x56   : > { %737 = vmatpush1.bf16.msra.mxu1 %v1781_v32 }
  0x57   : > { %633 = vadd.xlane.f32.xlu0 %v632_v16  ;;  %738 = vmatprep.subr.bf16.mxu1 %v1782_v33  ;;  %v777_v16 = vstv %s624_s25 }
  0x58   : > { %vm778_vm11 = vcmp.lt.s32.totalorder %v776_v15, %v777_v16  ;;  %v1785_v15 = vld [vmem:[%s2033_s2] sm:$0xff]   ;;  %v1786_v16 = vld [vmem:[%s2033_s2 + $0x8] sm:$0xff]   ;;  %s2269_s20 = scalar_lea.vmem (!%p1621_p0), %s2268_s15, %s2282_s27 }
  0x5a   : > { %739 = vmatpush1.bf16.msra.mxu1 %v1784_v34 }
  0x5b   : > { %1657 = vmatprep.subr.bf16.mxu1 %v1885_v59 }
  0xe0   : > { %v631_v17 = vpop.xlane.xlu0 %630 }
  0xe1   : > { %v636_v18 = vmul.f32 0.015625, %v631_v17 }
  0xe3   : > { %v638_v19 = vsub.f32 %v2066_v13, %v636_v18 }
  0xe4   : > { %v634_v20 = vpop.xlane.xlu0 %633 }
  0xe5   : > { %v637_v21 = vmul.f32 0.015625, %v634_v20  ;;  %v640_v22 = vmul.f32 %v638_v19, %v638_v19 }
  0xe7   : > { %v639_v23 = vsub.f32 %v2068_v14, %v637_v21  ;;  %v642_v24 = vsel %vm628_vm8, %v640_v22, 0.0 }
  0xe8   : > { %643 = vadd.xlane.f32.xlu1 %v642_v24 }
  0xe9   : > { %v641_v25 = vmul.f32 %v639_v23, %v639_v23 }
  0xeb   : > { %v645_v26 = vsel %vm628_vm8, %v641_v25, 0.0 }
  0xec   : > { %646 = vadd.xlane.f32.xlu1 %v645_v26 }
 0x175   : > { %v644_v36 = vpop.xlane.xlu1 %643 }
 0x176   : > { %v648_v37 = vmul.f32 0.015625, %v644_v36 }
 0x178   : > { %v650_v38 = vadd.f32 1e-05, %v648_v37 }
 0x179   : > { %v647_v39 = vpop.xlane.xlu1 %646 }
 0x17a   : > { %1801 = vrsqrt.f32 %v650_v38  ;;  %v649_v41 = vmul.f32 0.015625, %v647_v39 }
 0x17c   : > { %v651_v42 = vadd.f32 1e-05, %v649_v41 }
 0x17e   : > { %1803 = vrsqrt.f32 %v651_v42 }
 0x184   : > { %v1802_v46 = vpop.eup %1801 }
 0x185   : > { %v654_v47 = vmul.f32 %v1802_v46, %v638_v19  ;;  %v1890_v19 = vmov -1e+09  }
 0x186   : > { %v779_v20 = vsel %vm778_vm11, 0.0, %v1890_v19 }
 0x187   : > { %v660_v52 = vmul.f32 %v659_v48, %v654_v47 }
 0x188   : > { %v1804_v50 = vpop.eup %1803 }
 0x189   : > { %v655_v51 = vmul.f32 %v1804_v50, %v639_v23  ;;  %v666_v55 = vadd.f32 %v665_v53, %v660_v52 }
 0x18b   : > { %v661_v54 = vmul.f32 %v659_v48, %v655_v51 }
 0x18d   : > { %v667_v56 = vadd.f32 %v665_v53, %v661_v54 }
 0x18f   : > { %v668_v57 = vpack.c.bf16 %v667_v56, %v666_v55 }
 0x191   : > { %1595 = vmatmul.mubr.msk.bf16.vlgmr.msra.gmra.mrb[0].mxu1 %vm628_vm8, %v668_v57 }
 0x192   : > { %1659 = vmatprep.mubr.msk.bf16.mxu1 %vm1886_vm9, %v1885_v59 }
 0x264   : > { %v766_v61 = vpop.f32.mrb[0].mxu1 }
 0x265   : > { %v767_v63 = vadd.f32 %v766_v61, %v682_v60  ;;  %v768_v0 = vpop.f32.mrb[1].mxu1 }
 0x266   : > { %v770_v1 = vpop.f32.mrb[2].mxu1  ;;  %v769_v4 = vadd.f32 %v768_v0, %v686_v62 }
 0x267   : > { %v771_v2 = vadd.f32 %v770_v1, %v682_v60  ;;  %v772_v3 = vpop.f32.mrb[3].mxu1 }
 0x268   : > { %v773_v5 = vadd.f32 %v772_v3, %v686_v62 }
 0x269   : > { %v780_v6 = vpack.c.bf16 %v771_v2, %v767_v63 }
 0x26a   : > { %v2103_v7 = vpack.c.bf16 %v773_v5, %v769_v4 }
 0x26b   : > { %909 = vrot.lane.b32.xlu1 %v780_v6, %s1887_s1  ;;  %782 = vrot.lane.b32.xlu0 %v780_v6, %s1888_s28 }
 0x26f   : > { %907 = vrot.lane.b32.xlu1 %v780_v6, %s1889_s18 }
 0x2dd   : > { %v910_v8 = vpop.permute.xlu1 %909  ;;  %v783_v9 = vpop.permute.xlu0 %782 }
 0x2de   : > { %v789_v10 = vsel %vm784_vm10, %v783_v9, 0  ;;  %v915_v11 = vsel %vm784_vm10, %v910_v8, 0 }
 0x2df   : > { %1658 = vmatpush3.bf16.xpose.msra.mxu1 %v789_v10  ;;  %1670 = vmatpush3.bf16.xpose.msra.mxu0 %v915_v11 }
 0x2e0   : > { %1663 = vmatprep.subr.bf16.mxu1 %v1885_v59  ;;  %1681 = vmatprep.subr.bf16.mxu0 %v1885_v59 }
 0x2e1   : > { %v908_v12 = vpop.permute.xlu1 %907 }
 0x2e6   : > { %1660 = vmatmul.mubr.msk.bf16.vlgmr.msra.gmra.mrb[4].mxu1 %vm784_vm10, %v780_v6  ;;  %1672 = vmatmul.mubr.msk.bf16.vlgmr.msra.gmra.mrb[0].mxu0 %vm784_vm10, %v908_v12 }
 0x2e7   : > { %1664 = vmatpush3.bf16.msra.mxu1 %v2103_v7  ;;  %1665 = vmatprep.mubr.msk.bf16.mxu1 %vm1886_vm9, %v1885_v59 }
 0x2e8   : > { %1675 = vmatprep.subr.bf16.mxu1 %v1885_v59  ;;  %1689 = vmatprep.mubr.msk.bf16.mxu0 %vm1886_vm9, %v1885_v59 }
 0x2e9   : > { %1682 = vmatpush3.bf16.msra.mxu0 %v1785_v15  ;;  %v1793_v15 = vld [vmem:[%s2051_s5] sm:$0xff]  }
 0x2ea   : > { %1683 = vmatprep.subr.bf16.mxu0 %v1885_v59 }
 0x2ed   : > { %1684 = vmatpush3.bf16.msra.mxu0 %v1786_v16  ;;  %v1795_v16 = vld [vmem:[%s2051_s5 + $0x10] sm:$0xff]  }
 0x2ee   : > { %1685 = vmatprep.subr.bf16.mxu0 %v1885_v59 }
 0x3b9   : > { %v825_v17 = vpop.f32.mrb[4].mxu1  ;;  %v951_v18 = vpop.f32.mrb[0].mxu0 }
 0x3ba   : > { %v832_v21 = vmul.f32 0.17677669, %v825_v17  ;;  %v1661_v22 = vpop.f32.mrb[5].mxu1  ;;  %v1673_v23 = vpop.f32.mrb[1].mxu0  ;;  %v958_v26 = vmul.f32 0.17677669, %v951_v18 }
 0x3bb   : > { %v828_v24 = vpop.f32.mrb[6].mxu1  ;;  %v954_v25 = vpop.f32.mrb[2].mxu0  ;;  %v1787_v17 = vld [vmem:[%s2033_s2 + $0x10] sm:$0xff]  }
 0x3bc   : > { %v833_v27 = vmul.f32 0.17677669, %v828_v24  ;;  %v1662_v28 = vpop.f32.mrb[7].mxu1  ;;  %v1674_v29 = vpop.f32.mrb[3].mxu0  ;;  %v834_v30 = vadd.f32 %v832_v21, %v779_v20  ;;  %v959_v33 = vmul.f32 0.17677669, %v954_v25  ;;  %v960_v35 = vadd.f32 %v958_v26, %v779_v20  ;;  %1686 = vmatpush3.bf16.msra.mxu0 %v1787_v17 }
 0x3bd   : > { %v1788_v21 = vld [vmem:[%s2033_s2 + $0x18] sm:$0xff]   ;;  %1687 = vmatprep.subr.bf16.mxu0 %v1885_v59  ;;  %v1797_v17 = vld [vmem:[%s2051_s5 + $0x20] sm:$0xff]  }
 0x3be   : > { %v837_v31 = vsel %vm836_vm12, %v834_v30, -inf  ;;  %v835_v32 = vadd.f32 %v833_v27, %v779_v20  ;;  %v962_v36 = vsel %vm836_vm12, %v960_v35, -inf  ;;  %v961_v37 = vadd.f32 %v959_v33, %v779_v20 }
 0x3bf   : > { %838 = vmax.xlane.f32.xlu1 %v837_v31 }
 0x3c0   : > { %v840_v34 = vsel %vm836_vm12, %v835_v32, -inf  ;;  %v965_v38 = vsel %vm836_vm12, %v961_v37, -inf  ;;  %1688 = vmatpush3.bf16.msra.mxu0 %v1788_v21  ;;  %v1606_v21 = vld [vmem:[%s566_s19] ss:$0 sm:$0xff] }
 0x3c1   : > { %841 = vmax.xlane.f32.xlu0 %v840_v34  ;;  %1705 = vmatprep.subr.bf16.mxu0 %v1885_v59 }
 0x3c5   : > { %963 = vmax.xlane.f32.xlu0 %v962_v36 }
 0x3c9   : > { %966 = vmax.xlane.f32.xlu0 %v965_v38 }
 0x44c   : > { %v839_v39 = vpop.xlane.xlu1 %838 }
 0x44d   : > { %v843_v40 = vsub.f32 %v834_v30, %v839_v39 }
 0x44e   : > { %v842_v41 = vpop.xlane.xlu0 %841 }
 0x44f   : > { %v845_v42 = vmul.f32 1.442695, %v843_v40  ;;  %v844_v44 = vsub.f32 %v835_v32, %v842_v41  ;;  %v1600_v32 = vld [vmem:[%s558_s13] ss:$0 sm:$0xff] }
 0x451   : > { %1805 = vpow2.f32 %v845_v42  ;;  %v847_v46 = vmul.f32 1.442695, %v844_v44 }
 0x452   : > { %v964_v47 = vpop.xlane.xlu0 %963 }
 0x453   : > { %1807 = vpow2.f32 %v847_v46  ;;  %v968_v48 = vsub.f32 %v960_v35, %v964_v47 }
 0x455   : > { %v970_v49 = vmul.f32 1.442695, %v968_v48 }
 0x456   : > { %v967_v50 = vpop.xlane.xlu0 %966 }
 0x457   : > { %1809 = vpow2.f32 %v970_v49  ;;  %v969_v51 = vsub.f32 %v961_v37, %v967_v50 }
 0x459   : > { %v972_v52 = vmul.f32 1.442695, %v969_v51 }
 0x45b   : > { %v1806_v53 = vpop.eup %1805  ;;  %1811 = vpow2.f32 %v972_v52 }
 0x45c   : > { %v849_v54 = vsel %vm836_vm12, %v1806_v53, 0.0 }
 0x45d   : > { %v1808_v55 = vpop.eup %1807  ;;  %850 = vadd.xlane.f32.xlu1 %v849_v54  ;;  %v1790_v54 = vld [vmem:[%s2042_s17 + $0x8] sm:$0xff]  }
 0x45e   : > { %v852_v56 = vsel %vm836_vm12, %v1808_v55, 0.0 }
 0x45f   : > { %853 = vadd.xlane.f32.xlu0 %v852_v56  ;;  %v1792_v56 = vld [vmem:[%s2042_s17 + $0x18] sm:$0xff]  }
 0x461   : > { %v1810_v57 = vpop.eup %1809 }
 0x462   : > { %v974_v58 = vsel %vm836_vm12, %v1810_v57, 0.0 }
 0x463   : > { %975 = vadd.xlane.f32.xlu1 %v974_v58 }
 0x465   : > { %v1812_v60 = vpop.eup %1811 }
 0x466   : > { %v977_v61 = vsel %vm836_vm12, %v1812_v60, 0.0 }
 0x467   : > { %978 = vadd.xlane.f32.xlu0 %v977_v61 }
 0x474   : > { %986 = vrot.lane.b32.xlu1 %v2103_v7, %s1889_s18 }
 0x4ea   : > { %v851_v62 = vpop.xlane.xlu1 %850 }
 0x4eb   : > { %1813 = vrcp.f32 %v851_v62 }
 0x4ec   : > { %v854_v63 = vpop.xlane.xlu0 %853 }
 0x4ed   : > { %1815 = vrcp.f32 %v854_v63 }
 0x4f0   : > { %v976_v0 = vpop.xlane.xlu1 %975 }
 0x4f1   : > { %1817 = vrcp.f32 %v976_v0  ;;  %v1160_v0 = vsub.s32 2, %v2086_v43 }
 0x4f4   : > { %v979_v1 = vpop.xlane.xlu0 %978  ;;  %v987_v8 = vpop.permute.xlu1 %986 }
 0x4f5   : > { %v1814_v2 = vpop.eup %1813  ;;  %1819 = vrcp.f32 %v979_v1  ;;  %v1161_v1 = vrot.slane %v2090_v45, %v1160_v0 }
 0x4f6   : > { %v857_v4 = vmul.f32 %v1814_v2, %v1806_v53  ;;  %v1789_v53 = vld [vmem:[%s2042_s17] sm:$0xff]   ;;  %v1166_v2 = vsub.s32 3, %v2086_v43  ;;  %v1794_v43 = vld [vmem:[%s2051_s5 + $0x8] sm:$0xff]  }
 0x4f7   : > { %v1816_v3 = vpop.eup %1815 }
 0x4f8   : > { %v858_v5 = vmul.f32 %v1816_v3, %v1808_v55  ;;  %v1791_v55 = vld [vmem:[%s2042_s17 + $0x10] sm:$0xff]  }
 0x4fa   : > { %v859_v6 = vpack.c.bf16 %v858_v5, %v857_v4 }
 0x4fb   : > { %v1818_v7 = vpop.eup %1817 }
 0x4fc   : > { %1666 = vmatmul.mubr.msk.bf16.vlgmr.msra.gmra.mrb[8].mxu1 %vm836_vm12, %v859_v6  ;;  %v982_v10 = vmul.f32 %v1818_v7, %v1810_v57  ;;  %v1167_v7 = vrot.slane %v2090_v45, %v1166_v2  ;;  %v1796_v45 = vld [vmem:[%s2051_s5 + $0x18] sm:$0xff]  }
 0x4fd   : > { %1676 = vmatpush3.bf16.msra.mxu1 %v987_v8  ;;  %1677 = vmatprep.mubr.msk.bf16.mxu1 %vm1886_vm9, %v1885_v59 }
 0x4fe   : > { %1693 = vmatprep.subr.bf16.mxu1 %v1885_v59 }
 0x4ff   : > { %v1820_v9 = vpop.eup %1819 }
 0x500   : > { %v983_v11 = vmul.f32 %v1820_v9, %v1812_v60 }
 0x502   : > { %v984_v12 = vpack.c.bf16 %v983_v11, %v982_v10 }
 0x504   : > { %1678 = vmatmul.mubr.msk.bf16.vlgmr.msra.gmra.mrb[12].mxu1 %vm836_vm12, %v984_v12 }
 0x505   : > { %1701 = vmatprep.mubr.msk.bf16.mxu1 %vm1886_vm9, %v1885_v59  ;;  %1694 = vmatpush3.bf16.msra.mxu1 %v1789_v53 }
 0x506   : > { %1695 = vmatprep.subr.bf16.mxu1 %v1885_v59 }
 0x509   : > { %1696 = vmatpush3.bf16.msra.mxu1 %v1790_v54 }
 0x50a   : > { %1697 = vmatprep.subr.bf16.mxu1 %v1885_v59 }
 0x50d   : > { %1698 = vmatpush3.bf16.msra.mxu1 %v1791_v55 }
 0x50e   : > { %1699 = vmatprep.subr.bf16.mxu1 %v1885_v59 }
 0x511   : > { %1700 = vmatpush3.bf16.msra.mxu1 %v1792_v56 }
 0x5cf   : > { %v898_v18 = vpop.f32.mrb[8].mxu1 }
 0x5d0   : > { %905 = vst.msk [vmem:[#allocation3] sm:$0xff] %vm784_vm10, %v898_v18  ;;  %v1667_v19 = vpop.f32.mrb[9].mxu1  ;;  %v1798_v18 = vld [vmem:[%s2051_s5 + $0x28] sm:$0xff]  }
 0x5d1   : > { %v901_v20 = vpop.f32.mrb[10].mxu1  ;;  %v1799_v19 = vld [vmem:[%s2051_s5 + $0x30] sm:$0xff]  }
 0x5d2   : > { %906 = vst.msk [vmem:[#allocation3 + $0x8] sm:$0xff] %vm784_vm10, %v901_v20  ;;  %v1668_v22 = vpop.f32.mrb[11].mxu1  ;;  %v1800_v20 = vld [vmem:[%s2051_s5 + $0x38] sm:$0xff]  }
 0x5d7   : > { %v1026_v23 = vpop.f32.mrb[12].mxu1 }
 0x5d8   : > { %1035 = vrot.lane.b32.xlu0 %v1026_v23, %s1887_s1  ;;  %v1679_v24 = vpop.f32.mrb[13].mxu1 }
 0x5d9   : > { %v1029_v25 = vpop.f32.mrb[14].mxu1 }
 0x5da   : > { %1037 = vrot.lane.b32.xlu1 %v1029_v25, %s1887_s1  ;;  %v1680_v26 = vpop.f32.mrb[15].mxu1 }
 0x64a   : > { %v1036_v27 = vpop.permute.xlu0 %1035 }
 0x64b   : > { %1042 = vst.msk [vmem:[#allocation3] sm:$0xff] %vm1041_vm13, %v1036_v27 }
 0x64c   : > { %v1038_v28 = vpop.permute.xlu1 %1037 }
 0x64d   : > { %1043 = vst.msk [vmem:[#allocation3 + $0x8] sm:$0xff] %vm1041_vm13, %v1038_v28 }
 0x652   : > { %v1044_v29 = vld [vmem:[#allocation3] sm:$0xff] }
 0x654   : > { %v1045_v30 = vld [vmem:[#allocation3 + $0x8] sm:$0xff] }
 0x655   : > { %v1046_v31 = vpack.c.bf16 %v1045_v30, %v1044_v29 }
 0x657   : > { %1690 = vmatmul.mubr.msk.bf16.vlgmr.msra.gmra.mrb[4].mxu0 %vm628_vm8, %v1046_v31 }
 0x658   : > { %1721 = vmatprep.mubr.msk.bf16.mxu0 %vm1886_vm9, %v1885_v59  ;;  %1706 = vmatpush3.bf16.msra.mxu0 %v1793_v15 }
 0x659   : > { %1707 = vmatprep.subr.bf16.mxu0 %v1885_v59 }
 0x65c   : > { %1708 = vmatpush3.bf16.msra.mxu0 %v1794_v43 }
 0x65d   : > { %1709 = vmatprep.subr.bf16.mxu0 %v1885_v59 }
 0x660   : > { %1710 = vmatpush3.bf16.msra.mxu0 %v1795_v16 }
 0x661   : > { %1711 = vmatprep.subr.bf16.mxu0 %v1885_v59 }
 0x664   : > { %1712 = vmatpush3.bf16.msra.mxu0 %v1796_v45 }
 0x665   : > { %1713 = vmatprep.subr.bf16.mxu0 %v1885_v59 }
 0x668   : > { %1714 = vmatpush3.bf16.msra.mxu0 %v1797_v17 }
 0x669   : > { %1715 = vmatprep.subr.bf16.mxu0 %v1885_v59 }
 0x66c   : > { %1716 = vmatpush3.bf16.msra.mxu0 %v1798_v18 }
 0x66d   : > { %1717 = vmatprep.subr.bf16.mxu0 %v1885_v59 }
 0x670   : > { %1718 = vmatpush3.bf16.msra.mxu0 %v1799_v19 }
 0x671   : > { %1719 = vmatprep.subr.bf16.mxu0 %v1885_v59 }
 0x674   : > { %1720 = vmatpush3.bf16.msra.mxu0 %v1800_v20 }
 0x72a   : > { %v1123_v33 = vpop.f32.mrb[4].mxu0 }
 0x72b   : > { %v1124_v34 = vadd.f32 %v1600_v32, %v1123_v33  ;;  %v1691_v35 = vpop.f32.mrb[5].mxu0 }
 0x72c   : > { %v1126_v36 = vpop.f32.mrb[6].mxu0 }
 0x72d   : > { %v2158_v37 = vadd.f32 %v1124_v34, %v2066_v13  ;;  %v1127_v38 = vadd.f32 %v1600_v32, %v1126_v36  ;;  %v1692_v39 = vpop.f32.mrb[7].mxu0 }
 0x72f   : > { %v2161_v40 = vadd.f32 %v1127_v38, %v2068_v14  ;;  %v1132_v41 = vsel %vm628_vm8, %v2158_v37, 0.0 }
 0x730   : > { %1133 = vadd.xlane.f32.xlu1 %v1132_v41 }
 0x731   : > { %v1135_v42 = vsel %vm628_vm8, %v2161_v40, 0.0 }
 0x732   : > { %1136 = vadd.xlane.f32.xlu0 %v1135_v42 }
 0x7bd   : > { %v1134_v44 = vpop.xlane.xlu1 %1133 }
 0x7be   : > { %v1138_v46 = vmul.f32 0.015625, %v1134_v44 }
 0x7bf   : > { %v1137_v47 = vpop.xlane.xlu0 %1136 }
 0x7c0   : > { %v1140_v13 = vsub.f32 %v2158_v37, %v1138_v46  ;;  %v1139_v48 = vmul.f32 0.015625, %v1137_v47 }
 0x7c2   : > { %v1141_v14 = vsub.f32 %v2161_v40, %v1139_v48  ;;  %v1142_v49 = vmul.f32 %v1140_v13, %v1140_v13 }
 0x7c4   : > { %v1144_v50 = vsel %vm628_vm8, %v1142_v49, 0.0  ;;  %v1143_v51 = vmul.f32 %v1141_v14, %v1141_v14 }
 0x7c5   : > { %1145 = vadd.xlane.f32.xlu0 %v1144_v50 }
 0x7c6   : > { %v1147_v52 = vsel %vm628_vm8, %v1143_v51, 0.0 }
 0x7c7   : > { %1148 = vadd.xlane.f32.xlu1 %v1147_v52 }
 0x852   : > { %v1146_v57 = vpop.xlane.xlu0 %1145 }
 0x853   : > { %v1150_v58 = vmul.f32 0.015625, %v1146_v57 }
 0x854   : > { %v1149_v60 = vpop.xlane.xlu1 %1148 }
 0x855   : > { %v1152_v61 = vadd.f32 1e-05, %v1150_v58  ;;  %v1151_v62 = vmul.f32 0.015625, %v1149_v60 }
 0x857   : > { %1821 = vrsqrt.f32 %v1152_v61  ;;  %v1153_v63 = vadd.f32 1e-05, %v1151_v62 }
 0x859   : > { %1823 = vrsqrt.f32 %v1153_v63 }
 0x861   : > { %v1822_v3 = vpop.eup %1821 }
 0x862   : > { %v1156_v4 = vmul.f32 %v1822_v3, %v1140_v13 }
 0x863   : > { %v1824_v5 = vpop.eup %1823 }
 0x864   : > { %v1162_v6 = vmul.f32 %v1161_v1, %v1156_v4  ;;  %v1157_v8 = vmul.f32 %v1824_v5, %v1141_v14  ;;  %v1612_v14 = vld [vmem:[%s574_s6] ss:$0 sm:$0xff] }
 0x866   : > { %v1163_v9 = vmul.f32 %v1161_v1, %v1157_v8  ;;  %v1168_v10 = vadd.f32 %v1167_v7, %v1162_v6 }
 0x868   : > { %v1169_v11 = vadd.f32 %v1167_v7, %v1163_v9 }
 0x86a   : > { %v1170_v12 = vpack.c.bf16 %v1169_v11, %v1168_v10 }
 0x86c   : > { %1702 = vmatmul.mubr.msk.bf16.vlgmr.msra.gmra.mrb[16].mxu1 %vm628_vm8, %v1170_v12 }
 0x93f   : > { %v1247_v22 = vpop.f32.mrb[16].mxu1 }
 0x940   : > { %v1248_v23 = vadd.f32 %v1606_v21, %v1247_v22  ;;  %v1703_v24 = vpop.f32.mrb[17].mxu1 }
 0x941   : > { %v1250_v25 = vpop.f32.mrb[18].mxu1 }
 0x942   : > { %v1254_v26 = vmul.f32 %v1248_v23, %v1248_v23  ;;  %v1251_v27 = vadd.f32 %v1606_v21, %v1250_v25  ;;  %v1704_v28 = vpop.f32.mrb[19].mxu1 }
 0x944   : > { %v1256_v29 = vmul.f32 %v1254_v26, %v1248_v23  ;;  %v1255_v30 = vmul.f32 %v1251_v27, %v1251_v27 }
 0x946   : > { %v1258_v31 = vmul.f32 0.044715, %v1256_v29  ;;  %v1257_v32 = vmul.f32 %v1255_v30, %v1251_v27 }
 0x948   : > { %v1260_v33 = vadd.f32 %v1258_v31, %v1248_v23  ;;  %v1259_v59 = vmul.f32 0.044715, %v1257_v32 }
 0x94a   : > { %v1262_v34 = vmul.f32 0.7978846, %v1260_v33  ;;  %v1261_v35 = vadd.f32 %v1259_v59, %v1251_v27 }
 0x94c   : > { %1825 = vtanh.f32 %v1262_v34  ;;  %v1263_v36 = vmul.f32 0.7978846, %v1261_v35 }
 0x94e   : > { %1827 = vtanh.f32 %v1263_v36 }
 0x956   : > { %v1826_v38 = vpop.eup %1825 }
 0x957   : > { %v1266_v39 = vadd.f32 1.0, %v1826_v38 }
 0x958   : > { %v1828_v41 = vpop.eup %1827 }
 0x959   : > { %v1268_v42 = vmul.f32 0.5, %v1266_v39  ;;  %v1267_v44 = vadd.f32 1.0, %v1828_v41 }
 0x95b   : > { %v1269_v46 = vmul.f32 0.5, %v1267_v44  ;;  %v1270_v47 = vmul.f32 %v1268_v42, %v1248_v23 }
 0x95d   : > { %v1271_v13 = vmul.f32 %v1269_v46, %v1251_v27 }
 0x95f   : > { %v1272_v48 = vpack.c.bf16 %v1271_v13, %v1270_v47 }
 0x961   : > { %1722 = vmatmul.mubr.bf16.vlgmr.msra.gmra.mrb[8].mxu0 %v1272_v48 }
 0xa34   : > { %v1378_v49 = vpop.f32.mrb[8].mxu0 }
 0xa35   : > { %v1379_v50 = vadd.f32 %v1612_v14, %v1378_v49  ;;  %v1723_v51 = vpop.f32.mrb[9].mxu0  ;;  %1392 = sbr.rel (%p1621_p0) target bundleno = 2626 (0xa42), region = 76 }
 0xa36   : > { %v1381_v52 = vpop.f32.mrb[10].mxu0 }
 0xa37   : > { %v1385_v53 = vadd.f32 %v1379_v50, %v2158_v37  ;;  %v1382_v54 = vadd.f32 %v1612_v14, %v1381_v52  ;;  %v1724_v55 = vpop.f32.mrb[11].mxu0 }
 0xa39   : > { %1387 = vst.msk [vmem:[#allocation2] sm:$0xff] %vm628_vm8, %v1385_v53  ;;  %v1386_v56 = vadd.f32 %v1382_v54, %v2161_v40 }
 0xa3b   : > { %1388 = vst.msk [vmem:[#allocation2 + $0x8] sm:$0xff] %vm628_vm8, %v1386_v56 }
 0xa40   : > { %v1393_v57 = vld [vmem:[#allocation2] sm:$0x1] }
 0xa41   : > { %1395 = vst.msk [vmem:[%s2269_s20] sm:$0x1] %vm1394_vm14, %v1393_v57 }
 0xa42 PF: > { %s2270_s23 = sld [smem:[#allocation9_spill]]  ;;  %s2271_s26 = sld [smem:[#allocation7_spill]] }
 0xa43   : > { %s2272_s27 = sld [smem:[#allocation8_spill]]  ;;  %s2273_s28 = sld [smem:[#allocation10_spill]] }
 0xa44   : > { %s2274_s0 = sld [smem:[#allocation11_spill]] }
 0xa48   : > { %s28_s29 = sadd.s32 1, %s2270_s23  }
 0xa49   : > { %p25_p1 = scmp.ge.s32.totalorder %s28_s29, 6  }
 0xa4b   :  { %27 = sbr.rel (!%p25_p1) target bundleno = 20 (0x14), region = 136 }

// kernel: prompt_model_forward.10
= control target key start
LH: loop header
LB: loop body
LE: loop exit
PB: predicated region body
PF: predicated region fallthrough
CT: control target
= control target key end

     0   :  { %s2138_s0 = inlined_call_operand.vmem [shape: s32[2], index: 0, kind: input, shape index: {}]   ;;  %s2139_s1 = inlined_call_operand.vmem [shape: f32[2,8,32], index: 1, kind: input, shape index: {}]   ;;  %s2140_s2 = inlined_call_operand.vmem [shape: f32[4,8,32], index: 2, kind: input, shape index: {}]   ;;  %s2141_s3 = inlined_call_operand.vmem [shape: f32[2,1,8], index: 3, kind: input, shape index: {}]   ;;  %s2142_s4 = inlined_call_operand.vmem [shape: f32[2,4,32], index: 4, kind: input, shape index: {}]   ;;  %s2143_s5 = inlined_call_operand.vmem [shape: bf16[2,32,96], index: 5, kind: input, shape index: {}]   ;;  %s2144_s6 = inlined_call_operand.vmem [shape: f32[2,1,96], index: 6, kind: input, shape index: {}]   ;;  %s2145_s7 = inlined_call_operand.vmem [shape: bf16[2,32,32], index: 7, kind: input, shape index: {}]   ;;  %s2146_s8 = inlined_call_operand.vmem [shape: f32[2,1,32], index: 8, kind: input, shape index: {}]   ;;  %s2147_s9 = inlined_call_operand.vmem [shape: bf16[2,32,64], index: 9, kind: input, shape index: {}]   ;;  %s2148_s10 = inlined_call_operand.vmem [shape: f32[2,1,64], index: 10, kind: input, shape index: {}]   ;;  %s2149_s11 = inlined_call_operand.vmem [shape: bf16[2,64,32], index: 11, kind: input, shape index: {}]   ;;  %s2150_s12 = inlined_call_operand.vmem [shape: f32[2,1,32], index: 12, kind: input, shape index: {}]   ;;  %s2151_s13 = inlined_call_operand.vmem [shape: f32[2,32], index: 13, kind: input, shape index: {}]   ;;  %s2152_s14 = inlined_call_operand.vmem [shape: bf16[2,8,32], index: 14, kind: output, shape index: {}]  }
   0x1   :  { %2157 = sst [smem:[#allocation13_spill]] %s2139_s1  ;;  %s19_s15 = sshll.u32 %s2138_s0, 4  ;;  %s20_s15 = int_to_ptr.vmem [resolvable:$true] %s19_s15 }
   0x2   :  { %2158 = sst [smem:[#allocation14_spill]] %s2140_s2  ;;  %s1746_s16 = scalar_lea.vmem %s20_s15, 16 }
   0x3   :  { %2159 = sst [smem:[#allocation15_spill]] %s2141_s3  ;;  %p1747_p0 = scmp.ne.s32.totalorder %s20_s15, %s1746_s16 }
   0x4   :  { %2160 = sst [smem:[#allocation16_spill]] %s2142_s4  ;;  %p1751_p1 = scmp.lt.s32.totalorder %s20_s15, %s20_s15 }
   0x5   :  { %2161 = sst [smem:[#allocation17_spill]] %s2143_s5  ;;  %p1752_p2 = scmp.lt.s32.totalorder %s1746_s16, %s1746_s16 }
   0x6   :  { %2162 = sst [smem:[#allocation18_spill]] %s2145_s7 }
   0x7   :  { %2163 = sst [smem:[#allocation19_spill]] %s2151_s13  ;;  %p1753_p3 = por %p1752_p2, %p1751_p1 }
   0x8   :  { %2164 = sst [smem:[#allocation20_spill]] %s2152_s14 }
   0x9   :  { %p1754_p4 = pnand %p1753_p3, %p1747_p0 }
   0xb   :  { %1757 = shalt.err (!%p1754_p4)  }
   0xc   :  { %s1800_s17 = smov [#allocation5]  }
   0xd   :  { %22 = dma.vmem_to_smem %s20_s15, 16, %s1800_s17, [#allocation4] }
   0xe   :  { %1778 = dma.done.wait [#allocation4], 16 }
   0xf   :  { %1779 = vsyncadd [#allocation4], 4294967280 }
  0x10   :  { %24 = sfence }
  0x11   :  { %s1889_s18 = smov 0   ;;  %s1891_s19 = smov 0  }
  0x12   :  { %s1893_s20 = smov 0   ;;  %s1895_s0 = smov 0  }
  0x13   :  { %s1897_s21 = smov 0  }
  0x14 LB: > { %2165 = sst [smem:[#allocation7_spill]] %s1790_s20  ;;  %s39_s22 = sadd.s32 1, %s1790_s20  ;;  %s1798_s21 = sphi %s1897_s21, %s30_s21   ;;  %s1794_s0 = sphi %s1895_s0, %s2187_s0   ;;  %s1790_s20 = sphi %s1893_s20, %s2186_s20   ;;  %s1786_s19 = sphi %s1891_s19, %s2185_s19   ;;  %s1782_s18 = sphi %s1889_s18, %s2184_s18  }
  0x15   : > { %2166 = sst [smem:[#allocation8_spill]] %s1794_s0  ;;  %s42_s23 = sadd.s32 1, %s1794_s0 }
  0x16   : > { %2167 = sst [smem:[#allocation9_spill]] %s1798_s21  ;;  %p40_p5 = scmp.ge.s32.totalorder %s39_s22, 2 }
  0x17   : > { %p1528_p6 = scmp.ge.s32.totalorder %s1798_s21, 1  ;;  %p511_p7 = scmp.lt.s32.totalorder %s1798_s21, 5 }
  0x18   : > { %s2189_s22 = smov (%p40_p5, %s39_s22), 0  ;;  %s2191_s23 = smov (!%p40_p5, %s42_s23), %s1794_s0 }
  0x19   : > { %2168 = sst [smem:[#allocation10_spill]] %s2189_s22  ;;  %p512_p8 = pnand %p1528_p6, %p511_p7 }
  0x1a   : > { %p44_p9 = scmp.ge.s32.totalorder %s2191_s23, 2 }
  0x1b   : > { %515 = sbr.rel (%p512_p8) target bundleno = 2912 (0xb60), region = 72 }
  0x1c   : > { %s2193_s23 = smov (%p44_p9, %s2191_s23), 0 }
  0x1d   : > { %2169 = sst [smem:[#allocation11_spill]] %s2193_s23 }
  0x22   : > { %p598_p10 = scmp.lt.s32.totalorder %s1786_s19, 1  ;;  %s1530_s24 = sshll.u32 %s1786_s19, 1 }
  0x23   : > { %s603_s25 = sadd.s32 %s1782_s18, %s1530_s24  ;;  %p613_p12 = scmp.lt.s32.totalorder %s1782_s18, 1 }
  0x24   : > { %s2195_s19 = smov (!%p598_p10, %s1786_s19), 1  ;;  %p604_p11 = scmp.lt.s32.totalorder %s603_s25, 3 }
  0x25   : > { %s1529_s26 = sshll.u32 %s2195_s19, 3  ;;  %s2171_s1 = sld [smem:[#allocation13_spill]] }
  0x26   : > { %s1541_s17 = sshll.u32 %s2195_s19, 2  ;;  %s2197_s25 = smov (!%p604_p11, %s603_s25), 3 }
  0x27   : > { %s1935_s23 = scalar_select %p613_p12, %s1782_s18, 1 }
  0x28   : > { %s1531_s24 = sshll.u32 %s2197_s25, 3  ;;  %s2172_s14 = sld [smem:[#allocation20_spill]] }
  0x29   : > { %s2174_s2 = sld [smem:[#allocation14_spill]]  ;;  %s1532_s15 = sshll.u32 %s1935_s23, 2 }
  0x2a   : > { %s2175_s4 = sld [smem:[#allocation16_spill]]  ;;  %s1572_s21 = sshll.u32 %s1935_s23, 4 }
  0x2b   : > { %s601_s16 = scalar_lea.vmem %s2171_s1, %s1529_s26  ;;  %s2176_s5 = sld [smem:[#allocation17_spill]] }
  0x2c   : > { %s2177_s7 = sld [smem:[#allocation18_spill]]  ;;  %s632_s1 = scalar_lea.vmem %s2146_s8, %s1935_s23 }
  0x2d   : > { %s1575_s0 = sshll.u32 %s1935_s23, 5  ;;  %p1542_p13 = scmp.ne.s32.totalorder %s1782_s18, 0 }
  0x2e   : > { %s1940_s27 = scalar_lea.vmem %s2172_s14, %s1541_s17  ;;  %s648_s14 = scalar_lea.vmem %s2150_s12, %s1935_s23  ;;  %v658_v0 = vld [vmem:[%s601_s16] sm:$0xff] (!%p1542_p13)  ;;  %vm659_vm0 = vcmask (!%p1542_p13), 261120  }
  0x2f   : > { %2173 = sst [smem:[#allocation12_spill]] %s1940_s27  ;;  %s1945_s26 = scalar_lea.vmem %s2174_s2, %s1531_s24  ;;  %660 = vst.msk [vmem:[#allocation2] sm:$0xff] (!%p1542_p13), %vm659_vm0, %v658_v0 }
  0x30   : > { %s1951_s20 = scalar_lea.vmem %s2175_s4, %s1532_s15  ;;  %s1975_s4 = scalar_lea.vmem %s2147_s9, %s1572_s21 }
  0x31   : > { %s1957_s25 = scalar_lea.vmem %s2176_s5, %s1572_s21  ;;  %s640_s5 = scalar_lea.vmem %s2148_s10, %s1935_s23 }
  0x32   : > { %s1966_s24 = scalar_lea.vmem %s2177_s7, %s1572_s21  ;;  %s1989_s27 = scalar_lea.vmem %s2149_s11, %s1575_s0 }
  0x33   : > { %657 = sbr.rel (%p1542_p13) target bundleno = 58 (0x3a), region = 76 }
  0x3a PF: > { %v1992_v1 = vld [vmem:[#allocation2] sm:$0xff]  ;;  %vm665_vm1 = vcmask 261120   ;;  %v1801_v9 = vmov 0.0   ;;  %vm1802_vm2 = vmmov 0   ;;  %v1721_v10 = vld [vmem:[%s1957_s25 + $0x8] sm:$0xff]   ;;  %v680_v13 = vlaneseq  ;;  %s1803_s21 = smov 112  }
  0x3b   : > { %v666_v2 = vsel %vm665_vm1, %v1992_v1, 0.0  ;;  %v1720_v8 = vld [vmem:[%s1957_s25] sm:$0xff]   ;;  %1601 = vmatprep.subr.bf16.mxu1 %v1801_v9  ;;  %1605 = vmatprep.mubr.msk.bf16.mxu1 %vm1802_vm2, %v1801_v9  ;;  %s1804_s16 = smov 96   ;;  %s2179_s30 = sld [smem:[#allocation15_spill]]  ;;  %v1806_v43 = vmov -1e+09  }
  0x3c   : > { %667 = vadd.xlane.f32.xlu0 %v666_v2  ;;  %1602 = vmatpush3.bf16.msra.mxu1 %v1720_v8  ;;  %v2008_v15 = vshrl.u32 %v680_v13, 7  ;;  %v2012_v17 = vld [vmem:[%s1951_s20] sm:$0xf]  ;;  %s2178_s20 = scalar_lea.vmem %s2144_s6, %s1935_s23  ;;  %v802_v41 = vand.u32 127, %v680_v13  ;;  %s1807_s15 = smov 8   ;;  %vm829_vm4 = vcmask 130048  }
  0x3d   : > { %1617 = vmatprep.subr.bf16.mxu0 %v1801_v9  ;;  %1603 = vmatprep.subr.bf16.mxu1 %v1801_v9  ;;  %v663_v26 = vld [vmem:[%s1945_s26] sm:$0xff]  ;;  %s1805_s26 = smov 80   ;;  %vm822_vm6 = vcmask 64512   ;;  %s1808_s3 = smov 48   ;;  %vm1052_vm7 = vcmask 261248   ;;  %vm1262_vm8 = vcmask 523264  }
  0x3e   : > { %1619 = vmatprep.mubr.msk.bf16.mxu0 %vm1802_vm2, %v1801_v9  ;;  %v682_v16 = vsub.s32 0, %v2008_v15  ;;  %v687_v18 = vsub.s32 1, %v2008_v15  ;;  %v757_v27 = vpack.c.bf16 %v663_v26, %v663_v26  ;;  %v1543_v28 = vld [vmem:[%s2178_s20] ss:$0 sm:$0xff]  ;;  %vm808_vm3 = vcmp.le.s32.totalorder %v802_v41, %v2008_v15  ;;  %s1809_s13 = smov 64   ;;  %s1810_s0 = smov 16  }
  0x3f   : > { %v809_v44 = vsel %vm808_vm3, 0.0, %v1806_v43  ;;  %p1567_p0 = scmp.ne.s32.totalorder %s1782_s18, 1 }
  0x40   : > { %1604 = vmatpush3.bf16.msra.mxu1 %v1721_v10  ;;  %v683_v19 = vrot.slane %v2012_v17, %v682_v16  ;;  %v688_v22 = vrot.slane %v2012_v17, %v687_v18  ;;  %s2181_s23 = sld [smem:[#allocation12_spill]] (!%p1567_p0)  ;;  %s2182_s28 = sld [smem:[#allocation19_spill]] (!%p1567_p0)  ;;  %vm1339_vm9 = vcmask (!%p1567_p0), 257024  }
  0x41   : > { %1609 = vmatprep.subr.bf16.mxu1 %v1801_v9  ;;  %s2180_s29 = scalar_lea.vmem %s2179_s30, %s2195_s19  ;;  %s661_s19 = sld [smem:[#allocation5 + %s1782_s18]] }
  0x42   : > { %v1548_v42 = vld [vmem:[%s2180_s29] ss:$0 sm:$0xff] }
  0x43   : > { %v817_v45 = vadd.f32 %v1548_v42, %v809_v44  ;;  %v1553_v42 = vld [vmem:[%s632_s1] ss:$0 sm:$0xff] }
  0x47   : > { %v803_v51 = vstv %s661_s19 }
  0x48   : > { %vm804_vm5 = vcmp.lt.s32.totalorder %v802_v41, %v803_v51 }
  0x49   : > { %v805_v53 = vsel %vm804_vm5, 0.0, %v1806_v43 }
  0xc9   : > { %v668_v3 = vpop.xlane.xlu0 %667 }
  0xca   : > { %v670_v4 = vmul.f32 0.03125, %v668_v3 }
  0xcc   : > { %v671_v5 = vsub.f32 %v1992_v1, %v670_v4 }
  0xce   : > { %v672_v6 = vmul.f32 %v671_v5, %v671_v5 }
  0xd0   : > { %v673_v7 = vsel %vm665_vm1, %v672_v6, 0.0 }
  0xd1   : > { %674 = vadd.xlane.f32.xlu0 %v673_v7 }
 0x15e   : > { %v675_v11 = vpop.xlane.xlu0 %674 }
 0x15f   : > { %v676_v12 = vmul.f32 0.03125, %v675_v11 }
 0x161   : > { %v677_v14 = vadd.f32 1e-05, %v676_v12 }
 0x163   : > { %1730 = vrsqrt.f32 %v677_v14 }
 0x16d   : > { %v1731_v20 = vpop.eup %1730 }
 0x16e   : > { %v679_v21 = vmul.f32 %v1731_v20, %v671_v5 }
 0x170   : > { %v684_v23 = vmul.f32 %v683_v19, %v679_v21 }
 0x172   : > { %v689_v24 = vadd.f32 %v688_v22, %v684_v23 }
 0x174   : > { %v690_v25 = vpack.c.bf16 %v689_v24, %v689_v24 }
 0x176   : > { %1606 = vmatmul.mubr.msk.bf16.vlgmr.msra.gmra.mrb[0].mxu1 %vm665_vm1, %v690_v25 }
 0x177   : > { %1610 = vmatpush3.bf16.msra.mxu1 %v1720_v8  ;;  %1613 = vmatprep.mubr.msk.bf16.mxu1 %vm1802_vm2, %v1801_v9 }
 0x178   : > { %1611 = vmatprep.subr.bf16.mxu1 %v1801_v9 }
 0x17b   : > { %1612 = vmatpush3.bf16.msra.mxu1 %v1721_v10 }
 0x17c   : > { %1623 = vmatprep.subr.bf16.mxu1 %v1801_v9 }
 0x17e   : > { %1614 = vmatmul.mubr.msk.bf16.vlgmr.msra.gmra.mrb[4].mxu1 %vm665_vm1, %v757_v27 }
 0x17f   : > { %1625 = vmatprep.mubr.msk.bf16.mxu1 %vm1802_vm2, %v1801_v9 }
 0x249   : > { %v751_v29 = vpop.f32.mrb[0].mxu1 }
 0x24a   : > { %v752_v30 = vadd.f32 %v1543_v28, %v751_v29  ;;  %v1607_v31 = vpop.f32.mrb[1].mxu1  ;;  %v1722_v29 = vld [vmem:[%s1966_s24] sm:$0xff]  }
 0x24b   : > { %v754_v32 = vpop.f32.mrb[2].mxu1 }
 0x24c   : > { %v824_v33 = vpack.c.bf16 %v752_v30, %v752_v30  ;;  %v1608_v34 = vpop.f32.mrb[3].mxu1 }
 0x24e   : > { %938 = vrot.lane.b32.xlu0 %v824_v33, %s1803_s21 }
 0x251   : > { %v795_v35 = vpop.f32.mrb[4].mxu1 }
 0x252   : > { %v796_v36 = vadd.f32 %v1543_v28, %v795_v35  ;;  %v1615_v37 = vpop.f32.mrb[5].mxu1 }
 0x253   : > { %v798_v38 = vpop.f32.mrb[6].mxu1 }
 0x254   : > { %v2031_v39 = vpack.c.bf16 %v752_v30, %v796_v36  ;;  %v1616_v40 = vpop.f32.mrb[7].mxu1  ;;  %v1723_v30 = vld [vmem:[%s1966_s24 + $0x8] sm:$0xff]  }
 0x256   : > { %827 = vrot.lane.b32.xlu1 %v2031_v39, %s1804_s16 }
 0x25a   : > { %940 = vrot.lane.b32.xlu1 %v2031_v39, %s1805_s26 }
 0x25e   : > { %819 = vrot.lane.b32.xlu1 %v817_v45, %s1807_s15 }
 0x2c0   : > { %v939_v50 = vpop.permute.xlu0 %938 }
 0x2c8   : > { %v828_v46 = vpop.permute.xlu1 %827 }
 0x2c9   : > { %v834_v47 = vsel %vm829_vm4, %v828_v46, 0 }
 0x2ca   : > { %1618 = vmatpush3.bf16.xpose.msra.mxu0 %v834_v47 }
 0x2cb   : > { %1629 = vmatprep.subr.bf16.mxu0 %v1801_v9 }
 0x2cc   : > { %v941_v48 = vpop.permute.xlu1 %940 }
 0x2cd   : > { %v946_v49 = vsel %vm829_vm4, %v941_v48, 0 }
 0x2d0   : > { %v820_v52 = vpop.permute.xlu1 %819 }
 0x2d1   : > { %1620 = vmatmul.mubr.msk.bf16.vlgmr.msra.gmra.mrb[0].mxu0 %vm829_vm4, %v824_v33  ;;  %v823_v55 = vsel %vm822_vm6, %v805_v53, %v820_v52 }
 0x2d2   : > { %1630 = vmatpush3.bf16.xpose.msra.mxu0 %v946_v49  ;;  %1631 = vmatprep.mubr.msk.bf16.mxu0 %vm1802_vm2, %v1801_v9 }
 0x2d3   : > { %1641 = vmatprep.subr.bf16.mxu0 %v1801_v9 }
 0x2d9   : > { %1632 = vmatmul.mubr.msk.bf16.vlgmr.msra.gmra.mrb[4].mxu0 %vm829_vm4, %v939_v50 }
 0x2da   : > { %1645 = vmatprep.mubr.msk.bf16.mxu0 %vm1802_vm2, %v1801_v9  ;;  %1642 = vmatpush3.bf16.msra.mxu0 %v1722_v29 }
 0x2db   : > { %1643 = vmatprep.subr.bf16.mxu0 %v1801_v9 }
 0x2de   : > { %1644 = vmatpush3.bf16.msra.mxu0 %v1723_v30 }
 0x2df   : > { %1657 = vmatprep.subr.bf16.mxu0 %v1801_v9 }
 0x3a4   : > { %v870_v54 = vpop.f32.mrb[0].mxu0 }
 0x3a5   : > { %v876_v56 = vmul.f32 0.25, %v870_v54  ;;  %v1621_v57 = vpop.f32.mrb[1].mxu0 }
 0x3a6   : > { %v873_v58 = vpop.f32.mrb[2].mxu0 }
 0x3a7   : > { %v1622_v59 = vpop.f32.mrb[3].mxu0  ;;  %v877_v60 = vadd.f32 %v876_v56, %v823_v55  ;;  %v1725_v56 = vld [vmem:[%s1975_s4 + $0x8] sm:$0xff]  }
 0x3a8   : > { %v1138_v59 = vsub.s32 2, %v2008_v15 }
 0x3a9   : > { %v878_v61 = vsel %vm829_vm4, %v877_v60, -inf }
 0x3aa   : > { %879 = vmax.xlane.f32.xlu1 %v878_v61  ;;  %v1139_v61 = vrot.slane %v2012_v17, %v1138_v59 }
 0x3ac   : > { %v982_v62 = vpop.f32.mrb[4].mxu0 }
 0x3ad   : > { %v988_v63 = vmul.f32 0.25, %v982_v62  ;;  %v1633_v0 = vpop.f32.mrb[5].mxu0 }
 0x3ae   : > { %v985_v2 = vpop.f32.mrb[6].mxu0 }
 0x3af   : > { %v1634_v3 = vpop.f32.mrb[7].mxu0  ;;  %v989_v4 = vadd.f32 %v988_v63, %v823_v55  ;;  %v1724_v55 = vld [vmem:[%s1975_s4] sm:$0xff]  }
 0x3b1   : > { %v990_v5 = vsel %vm829_vm4, %v989_v4, -inf }
 0x3b2   : > { %991 = vmax.xlane.f32.xlu0 %v990_v5  ;;  %v1726_v5 = vld [vmem:[%s1989_s27] sm:$0xff]  }
 0x3c8   : > { %1002 = vrot.lane.b32.xlu0 %v2031_v39, %s1808_s3 }
 0x437   : > { %v880_v6 = vpop.xlane.xlu1 %879 }
 0x438   : > { %v881_v7 = vsub.f32 %v877_v60, %v880_v6  ;;  %v1143_v60 = vsub.s32 3, %v2008_v15  ;;  %v1727_v6 = vld [vmem:[%s1989_s27 + $0x8] sm:$0xff]   ;;  %v1728_v15 = vld [vmem:[%s1989_s27 + $0x10] sm:$0xff]  }
 0x43a   : > { %v882_v8 = vmul.f32 1.442695, %v881_v7  ;;  %v1144_v0 = vrot.slane %v2012_v17, %v1143_v60  ;;  %v1729_v7 = vld [vmem:[%s1989_s27 + $0x18] sm:$0xff]   ;;  %v1557_v17 = vld [vmem:[%s640_s5] ss:$0 sm:$0xff] }
 0x43c   : > { %1732 = vpow2.f32 %v882_v8 }
 0x43f   : > { %v992_v10 = vpop.xlane.xlu0 %991 }
 0x440   : > { %v993_v11 = vsub.f32 %v989_v4, %v992_v10 }
 0x442   : > { %v994_v12 = vmul.f32 1.442695, %v993_v11 }
 0x443   : > { %v1003_v25 = vpop.permute.xlu0 %1002 }
 0x444   : > { %1734 = vpow2.f32 %v994_v12 }
 0x446   : > { %v1733_v13 = vpop.eup %1732 }
 0x447   : > { %v884_v14 = vsel %vm829_vm4, %v1733_v13, 0.0 }
 0x448   : > { %885 = vadd.xlane.f32.xlu1 %v884_v14 }
 0x44e   : > { %v1735_v16 = vpop.eup %1734 }
 0x44f   : > { %v996_v18 = vsel %vm829_vm4, %v1735_v16, 0.0 }
 0x450   : > { %997 = vadd.xlane.f32.xlu1 %v996_v18 }
 0x461   : > { %890 = vrot.lane.b32.xlu1 %v2031_v39, %s1809_s13 }
 0x4d5   : > { %v886_v19 = vpop.xlane.xlu1 %885 }
 0x4d6   : > { %1736 = vrcp.f32 %v886_v19 }
 0x4dd   : > { %v998_v20 = vpop.xlane.xlu1 %997 }
 0x4de   : > { %1738 = vrcp.f32 %v998_v20 }
 0x4e0   : > { %v1737_v21 = vpop.eup %1736 }
 0x4e1   : > { %v888_v22 = vmul.f32 %v1737_v21, %v1733_v13  ;;  %v891_v23 = vpop.permute.xlu1 %890 }
 0x4e2   : > { %1624 = vmatpush3.bf16.msra.mxu1 %v891_v23 }
 0x4e3   : > { %v889_v24 = vpack.c.bf16 %v888_v22, %v888_v22  ;;  %1635 = vmatprep.subr.bf16.mxu1 %v1801_v9 }
 0x4e5   : > { %1626 = vmatmul.mubr.msk.bf16.vlgmr.msra.gmra.mrb[8].mxu1 %vm829_vm4, %v889_v24 }
 0x4e6   : > { %1636 = vmatpush3.bf16.msra.mxu1 %v1003_v25  ;;  %1637 = vmatprep.mubr.msk.bf16.mxu1 %vm1802_vm2, %v1801_v9  ;;  %v1561_v25 = vld [vmem:[%s648_s14] ss:$0 sm:$0xff] }
 0x4e7   : > { %1649 = vmatprep.subr.bf16.mxu1 %v1801_v9 }
 0x4e8   : > { %v1739_v26 = vpop.eup %1738 }
 0x4e9   : > { %v1000_v27 = vmul.f32 %v1739_v26, %v1735_v16 }
 0x4eb   : > { %v1001_v28 = vpack.c.bf16 %v1000_v27, %v1000_v27 }
 0x4ed   : > { %1638 = vmatmul.mubr.msk.bf16.vlgmr.msra.gmra.mrb[12].mxu1 %vm829_vm4, %v1001_v28 }
 0x4ee   : > { %1653 = vmatprep.mubr.msk.bf16.mxu1 %vm1802_vm2, %v1801_v9  ;;  %1650 = vmatpush3.bf16.msra.mxu1 %v1724_v55 }
 0x4ef   : > { %1651 = vmatprep.subr.bf16.mxu1 %v1801_v9 }
 0x4f2   : > { %1652 = vmatpush3.bf16.msra.mxu1 %v1725_v56 }
 0x5b8   : > { %v930_v31 = vpop.f32.mrb[8].mxu1 }
 0x5b9   : > { %936 = vst.msk [vmem:[#allocation3] sm:$0xff] %vm829_vm4, %v930_v31  ;;  %v1627_v32 = vpop.f32.mrb[9].mxu1 }
 0x5ba   : > { %v933_v33 = vpop.f32.mrb[10].mxu1 }
 0x5bb   : > { %v1628_v34 = vpop.f32.mrb[11].mxu1 }
 0x5c0   : > { %v1042_v35 = vpop.f32.mrb[12].mxu1 }
 0x5c1   : > { %1049 = vrot.lane.b32.xlu1 %v1042_v35, %s1810_s0  ;;  %v1639_v36 = vpop.f32.mrb[13].mxu1 }
 0x5c2   : > { %v1045_v37 = vpop.f32.mrb[14].mxu1 }
 0x5c3   : > { %v1640_v38 = vpop.f32.mrb[15].mxu1 }
 0x633   : > { %v1050_v39 = vpop.permute.xlu1 %1049 }
 0x634   : > { %1053 = vst.msk [vmem:[#allocation3] sm:$0xff] %vm1052_vm7, %v1050_v39 }
 0x63b   : > { %v1054_v40 = vld [vmem:[#allocation3] sm:$0xff] }
 0x63c   : > { %v1055_v41 = vpack.c.bf16 %v1054_v40, %v1054_v40 }
 0x63e   : > { %1646 = vmatmul.mubr.msk.bf16.vlgmr.msra.gmra.mrb[8].mxu0 %vm665_vm1, %v1055_v41 }
 0x63f   : > { %1665 = vmatprep.mubr.msk.bf16.mxu0 %vm1802_vm2, %v1801_v9  ;;  %1658 = vmatpush3.bf16.msra.mxu0 %v1726_v5 }
 0x640   : > { %1659 = vmatprep.subr.bf16.mxu0 %v1801_v9 }
 0x643   : > { %1660 = vmatpush3.bf16.msra.mxu0 %v1727_v6 }
 0x644   : > { %1661 = vmatprep.subr.bf16.mxu0 %v1801_v9 }
 0x647   : > { %1662 = vmatpush3.bf16.msra.mxu0 %v1728_v15 }
 0x648   : > { %1663 = vmatprep.subr.bf16.mxu0 %v1801_v9 }
 0x64b   : > { %1664 = vmatpush3.bf16.msra.mxu0 %v1729_v7 }
 0x711   : > { %v1116_v43 = vpop.f32.mrb[8].mxu0 }
 0x712   : > { %v1117_v44 = vadd.f32 %v1553_v42, %v1116_v43  ;;  %v1647_v45 = vpop.f32.mrb[9].mxu0  ;;  %v1568_v43 = vld [vmem:[%s2182_s28] ss:$0 sm:$0xff] (!%p1567_p0) }
 0x713   : > { %v1119_v46 = vpop.f32.mrb[10].mxu0  ;;  %v1569_v45 = vld [vmem:[%s2182_s28 + $0x1] ss:$0 sm:$0xff] (!%p1567_p0) }
 0x714   : > { %v2080_v47 = vadd.f32 %v1117_v44, %v1992_v1  ;;  %v1648_v48 = vpop.f32.mrb[11].mxu0 }
 0x716   : > { %v1123_v49 = vsel %vm665_vm1, %v2080_v47, 0.0 }
 0x717   : > { %1124 = vadd.xlane.f32.xlu1 %v1123_v49 }
 0x7a4   : > { %v1125_v50 = vpop.xlane.xlu1 %1124 }
 0x7a5   : > { %v1126_v51 = vmul.f32 0.03125, %v1125_v50 }
 0x7a7   : > { %v1127_v52 = vsub.f32 %v2080_v47, %v1126_v51 }
 0x7a9   : > { %v1128_v53 = vmul.f32 %v1127_v52, %v1127_v52 }
 0x7ab   : > { %v1129_v54 = vsel %vm665_vm1, %v1128_v53, 0.0 }
 0x7ac   : > { %1130 = vadd.xlane.f32.xlu0 %v1129_v54 }
 0x839   : > { %v1131_v1 = vpop.xlane.xlu0 %1130 }
 0x83a   : > { %v1132_v57 = vmul.f32 0.03125, %v1131_v1 }
 0x83c   : > { %v1133_v58 = vadd.f32 1e-05, %v1132_v57 }
 0x83e   : > { %1740 = vrsqrt.f32 %v1133_v58 }
 0x848   : > { %v1741_v62 = vpop.eup %1740 }
 0x849   : > { %v1135_v63 = vmul.f32 %v1741_v62, %v1127_v52 }
 0x84b   : > { %v1140_v2 = vmul.f32 %v1139_v61, %v1135_v63 }
 0x84d   : > { %v1145_v3 = vadd.f32 %v1144_v0, %v1140_v2 }
 0x84f   : > { %v1146_v4 = vpack.c.bf16 %v1145_v3, %v1145_v3 }
 0x851   : > { %1654 = vmatmul.mubr.msk.bf16.vlgmr.msra.gmra.mrb[16].mxu1 %vm665_vm1, %v1146_v4 }
 0x924   : > { %v1207_v8 = vpop.f32.mrb[16].mxu1 }
 0x925   : > { %v1208_v10 = vadd.f32 %v1557_v17, %v1207_v8  ;;  %v1655_v11 = vpop.f32.mrb[17].mxu1 }
 0x926   : > { %v1210_v12 = vpop.f32.mrb[18].mxu1 }
 0x927   : > { %v1213_v13 = vmul.f32 %v1208_v10, %v1208_v10  ;;  %v1656_v14 = vpop.f32.mrb[19].mxu1 }
 0x929   : > { %v1214_v16 = vmul.f32 %v1213_v13, %v1208_v10 }
 0x92b   : > { %v1215_v18 = vmul.f32 0.044715, %v1214_v16 }
 0x92d   : > { %v1216_v19 = vadd.f32 %v1215_v18, %v1208_v10 }
 0x92f   : > { %v1217_v20 = vmul.f32 0.7978846, %v1216_v19 }
 0x931   : > { %1742 = vtanh.f32 %v1217_v20 }
 0x93b   : > { %v1743_v9 = vpop.eup %1742 }
 0x93c   : > { %v1219_v21 = vadd.f32 1.0, %v1743_v9 }
 0x93e   : > { %v1220_v22 = vmul.f32 0.5, %v1219_v21 }
 0x940   : > { %v1221_v23 = vmul.f32 %v1220_v22, %v1208_v10 }
 0x942   : > { %v1222_v24 = vpack.c.bf16 %v1221_v23, %v1221_v23 }
 0x944   : > { %1666 = vmatmul.mubr.msk.bf16.vlgmr.msra.gmra.mrb[12].mxu0 %vm1262_vm8, %v1222_v24 }
 0xa16   : > { %1311 = sbr.rel (%p1567_p0) target bundleno = 2912 (0xb60), region = 80 }
 0xa17   : > { %v1300_v26 = vpop.f32.mrb[12].mxu0 }
 0xa18   : > { %v1301_v27 = vadd.f32 %v1561_v25, %v1300_v26  ;;  %v1667_v28 = vpop.f32.mrb[13].mxu0 }
 0xa19   : > { %v1303_v29 = vpop.f32.mrb[14].mxu0 }
 0xa1a   : > { %v1306_v30 = vadd.f32 %v1301_v27, %v2080_v47  ;;  %v1668_v31 = vpop.f32.mrb[15].mxu0 }
 0xa1c   : > { %1307 = vst.msk [vmem:[#allocation2] sm:$0xff] %vm665_vm1, %v1306_v30 }
 0xa23   : > { %v1312_v32 = vld [vmem:[#allocation2] sm:$0xff] }
 0xa24   : > { %v1315_v33 = vsel %vm665_vm1, %v1312_v32, 0.0 }
 0xa25   : > { %1316 = vadd.xlane.f32.xlu0 %v1315_v33 }
 0xab2   : > { %v1317_v34 = vpop.xlane.xlu0 %1316 }
 0xab3   : > { %v1318_v35 = vmul.f32 0.03125, %v1317_v34 }
 0xab5   : > { %v1319_v36 = vsub.f32 %v1312_v32, %v1318_v35 }
 0xab7   : > { %v1320_v37 = vmul.f32 %v1319_v36, %v1319_v36 }
 0xab9   : > { %v1321_v38 = vsel %vm665_vm1, %v1320_v37, 0.0 }
 0xaba   : > { %1322 = vadd.xlane.f32.xlu0 %v1321_v38 }
 0xb47   : > { %v1323_v39 = vpop.xlane.xlu0 %1322 }
 0xb48   : > { %v1324_v40 = vmul.f32 0.03125, %v1323_v39 }
 0xb4a   : > { %v1325_v41 = vadd.f32 1e-05, %v1324_v40 }
 0xb4c   : > { %1744 = vrsqrt.f32 %v1325_v41 }
 0xb56   : > { %v1745_v42 = vpop.eup %1744 }
 0xb57   : > { %v1327_v44 = vmul.f32 %v1745_v42, %v1319_v36 }
 0xb59   : > { %v1332_v46 = vmul.f32 %v1568_v43, %v1327_v44 }
 0xb5b   : > { %v1337_v47 = vadd.f32 %v1569_v45, %v1332_v46 }
 0xb5d   : > { %v1338_v48 = vpack.c.bf16 %v1337_v47, %v1337_v47 }
 0xb5f   : > { %1340 = vst.msk [vmem:[%s2181_s23] sm:$0xf] %vm1339_vm9, %v1338_v48 }
 0xb60 PF: > { %s2183_s20 = sld [smem:[#allocation9_spill]]  ;;  %s2184_s18 = sld [smem:[#allocation7_spill]] }
 0xb61   : > { %s2185_s19 = sld [smem:[#allocation8_spill]]  ;;  %s2187_s0 = sld [smem:[#allocation11_spill]] }
 0xb66   : > { %s30_s21 = sadd.s32 1, %s2183_s20   ;;  %s2186_s20 = sld [smem:[#allocation10_spill]] }
 0xb67   : > { %p27_p1 = scmp.ge.s32.totalorder %s30_s21, 6  }
 0xb69   :  { %29 = sbr.rel (!%p27_p1) target bundleno = 20 (0x14), region = 143 }

</bundles_post_ra>
